<compile_context>
chip_gen: v5e
topology: v5e:2x2
jax: 0.10.0
libtpu: 0.0.40
codegen_flags: <defaults>
</compile_context>

<pallas_src>
import functools

import jax
import jax.numpy as jnp
from jax.experimental import pallas as pl
from jax.experimental.pallas import tpu as pltpu

F32 = jnp.float32
BF16 = jnp.bfloat16
BN_EPS = 1e-5

# Above this M, tile the matmul over M (keeps double-buffered blocks inside the
# scoped-VMEM budget on every generation, including v7x's 64 MiB total VMEM).
_BM_CAP = 2048


# --------------------------- Pallas kernels ---------------------------------

def _mm_kernel(*refs, relu_out, has_res):
    """o = x @ w + b [+ res] [relu].

    `w` arrives with the trailing BatchNorm already folded in (W' = W*s,
    b' = b*s + t) and pre-cast to bf16; the dot runs on the MXU in bf16 with an
    f32 accumulator.  The optional residual fuses the branch addition; the
    optional relu is the leading activation of the *next* conv group.
    """
    if has_res:
        x_ref, w_ref, b_ref, r_ref, o_ref = refs
    else:
        x_ref, w_ref, b_ref, o_ref = refs
        r_ref = None
    y = jnp.dot(x_ref[...].astype(BF16), w_ref[...],
                preferred_element_type=jnp.float32)
    y = y + b_ref[...]
    if r_ref is not None:
        y = y + r_ref[...]
    if relu_out:
        y = jnp.maximum(y, 0.0)
    o_ref[...] = y


def _pool3_kernel(*refs, mode, C, has_inv, has_res):
    """3x3 / stride-1 / pad-1 pooling on a lane-merged (N, H+2, (W+2)*C) block.

    The 9 window taps are contiguous static slices of the padded block held in
    VMEM (no HBM tap materialisation).  `inv` carries the 1/count map for avg
    pooling (count_include_pad=False); `res` fuses a residual add.
    """
    it = iter(refs)
    xp_ref = next(it)
    inv_ref = next(it) if has_inv else None
    res_ref = next(it) if has_res else None
    o_ref = next(it)
    _, H, WC = o_ref.shape

    xp = xp_ref[...]                                    # (N, H+2, (W+2)*C)
    acc = None
    for di in range(3):
        for dj in range(3):
            win = xp[:, di:di + H, dj * C:dj * C + WC]
            if acc is None:
                acc = win
            elif mode == "max":
                acc = jnp.maximum(acc, win)
            else:
                acc = acc + win
    if inv_ref is not None:
        acc = acc * inv_ref[...]
    if res_ref is not None:
        acc = acc + res_ref[...]
    o_ref[...] = acc


# --------------------------- kernel wrappers ---------------------------------

def fused_matmul(x, w_mat, bias, *, res=None, relu_out=False):
    """(M,K)@(K,N) + bias [+ residual] [relu], BN pre-folded into w/bias."""
    M, K = x.shape
    N = w_mat.shape[1]
    kern = functools.partial(_mm_kernel, relu_out=relu_out,
                             has_res=res is not None)
    args = [x.astype(F32), w_mat.astype(BF16), bias.reshape(1, N).astype(F32)]
    if res is not None:
        args.append(res.reshape(M, N).astype(F32))
    out_shape = jax.ShapeDtypeStruct((M, N), F32)

    if M <= _BM_CAP:
        # Single VMEM block: per-grid-step pipeline overhead dominates at these
        # sizes and the (K,N) weight block is loaded exactly once.
        return pl.pallas_call(kern, out_shape=out_shape)(*args)

    # Production-size path: tile over M only.  The reduction axis K stays whole
    # (outputs here are lane-narrow; K-tiling would only add accumulator
    # traffic through the store path).
    divisors = [d for d in range(128, _BM_CAP + 1, 128) if M % d == 0]
    if not divisors:
        return pl.pallas_call(kern, out_shape=out_shape)(*args)
    bm = max(divisors)
    in_specs = [pl.BlockSpec((bm, K), lambda i: (i, 0)),
                pl.BlockSpec((K, N), lambda i: (0, 0)),
                pl.BlockSpec((1, N), lambda i: (0, 0))]
    if res is not None:
        in_specs.append(pl.BlockSpec((bm, N), lambda i: (i, 0)))
    return pl.pallas_call(
        kern, out_shape=out_shape, grid=(M // bm,),
        in_specs=in_specs,
        out_specs=pl.BlockSpec((bm, N), lambda i: (i, 0)),
        compiler_params=pltpu.CompilerParams(dimension_semantics=("parallel",)),
    )(*args)


def pallas_pool3(x, mode, *, res=None):
    """3x3 / stride-1 / pad-1 max or avg pool (count_include_pad=False), NHWC.

    Stride-2 callers decimate the stride-1 result (same window centres).
    Channels are merged into the lane axis so taps are contiguous lane slices
    and the output store is lane-dense.  `res` (NHWC, output-shaped) fuses a
    residual add into the kernel epilogue.
    """
    N, H, W, C = x.shape
    pad_val = -1e30 if mode == "max" else 0.0
    xp = jnp.pad(x.astype(F32), ((0, 0), (1, 1), (1, 1), (0, 0)),
                 constant_values=pad_val).reshape(N, H + 2, (W + 2) * C)
    args = [xp]
    has_inv = mode == "avg"
    if has_inv:
        rh = jnp.full((H,), 3.0).at[0].add(-1.0).at[H - 1].add(-1.0)
        rw = jnp.full((W,), 3.0).at[0].add(-1.0).at[W - 1].add(-1.0)
        inv_hw = 1.0 / (rh[:, None] * rw[None, :])
        args.append(jnp.broadcast_to(inv_hw[:, :, None], (H, W, C))
                    .reshape(1, H, W * C).astype(F32))
    if res is not None:
        args.append(res.reshape(N, H, W * C).astype(F32))
    # TODO(synk): at production spatial sizes add a grid over N*H rows here.
    out = pl.pallas_call(
        functools.partial(_pool3_kernel, mode=mode, C=C,
                          has_inv=has_inv, has_res=res is not None),
        out_shape=jax.ShapeDtypeStruct((N, H, W * C), F32),
    )(*args)
    return out.reshape(N, H, W, C)


# --------------------------- glue helpers ------------------------------------

def _im2col(x, k, stride, pad):
    N, H, W, C = x.shape
    xp = jnp.pad(x, ((0, 0), (pad, pad), (pad, pad), (0, 0)))
    Ho = (H + 2 * pad - k) // stride + 1
    Wo = (W + 2 * pad - k) // stride + 1
    cols = [xp[:, di:di + stride * (Ho - 1) + 1:stride,
               dj:dj + stride * (Wo - 1) + 1:stride, :]
            for di in range(k) for dj in range(k)]
    patches = jnp.concatenate(cols, axis=-1)            # (N,Ho,Wo,k*k*C)
    return patches.reshape(N * Ho * Wo, k * k * C), (N, Ho, Wo)


def _w_to_mat(w):
    cout, cin, kh, kw = w.shape
    # im2col patch order is (di, dj, cin); match it.
    return jnp.transpose(w, (2, 3, 1, 0)).reshape(kh * kw * cin, cout)


def _bn_scale_shift(bn):
    gamma, beta, mean, var = bn
    s = gamma / jnp.sqrt(var + BN_EPS)
    return s, beta - mean * s


def _fold_bn_out(w, b, bn):
    """Fold a trailing BatchNorm into the preceding conv: W' = W*s, b' = b*s+t."""
    s, t = _bn_scale_shift(bn)
    return w * s[:, None, None, None], b * s + t


def _block_diag_conv(wa, wb):
    """Block-diagonal combination of two conv weights (same spatial size)."""
    oa, ia, k, _ = wa.shape
    ob, ib, _, _ = wb.shape
    w = jnp.zeros((oa + ob, ia + ib, k, k), F32)
    w = w.at[:oa, :ia].set(wa)
    w = w.at[oa:, ia:].set(wb)
    return w


# --------------------------- parameter init ----------------------------------

def _init_conv(key, cout, cin, k):
    kw, kb = jax.random.split(key)
    w = 0.1 * jax.random.normal(kw, (cout, cin, k, k), F32)
    b = 0.05 * jax.random.normal(kb, (cout,), F32)
    return w, b


def _init_bn(key, c):
    k1, k2, k3, k4 = jax.random.split(key, 4)
    gamma = 1.0 + 0.1 * jax.random.normal(k1, (c,), F32)
    beta = 0.1 * jax.random.normal(k2, (c,), F32)
    mean = 0.1 * jax.random.normal(k3, (c,), F32)
    var = 1.0 + 0.1 * jnp.abs(jax.random.normal(k4, (c,), F32))
    return gamma, beta, mean, var


def _init_separable(key, cin, cout, k, mode):
    ks = jax.random.split(key, 6)
    if mode == 0:
        f = [cin, cin, cin, cout]
    else:
        f = [cin, cout, cout, cout]
    w1, b1 = _init_conv(ks[0], f[0], cin, k)
    w2, b2 = _init_conv(ks[1], f[1], f[0], 1)
    bn1 = _init_bn(ks[2], f[1])
    w3, b3 = _init_conv(ks[3], f[2], f[1], k)
    w4, b4 = _init_conv(ks[4], f[3], f[2], 1)
    bn2 = _init_bn(ks[5], f[3])
    return dict(w1=w1, b1=b1, w2=w2, b2=b2, bn1=bn1,
                w3=w3, b3=b3, w4=w4, b4=b4, bn2=bn2)


def init_cell_stem0(key, in_channels, filters):
    ks = jax.random.split(key, 8)
    w, b = _init_conv(ks[1], filters, in_channels, 1)
    return dict(
        conv1x1=dict(bn=_init_bn(ks[0], in_channels), w=w, b=b),
        bl1=_init_separable(ks[2], filters, filters, 5, 0),      # on y, stride 2
        br1=_init_separable(ks[3], in_channels, filters, 7, 1),  # on x, stride 2
        br2=_init_separable(ks[4], in_channels, filters, 7, 1),  # on x, stride 2
        br3=_init_separable(ks[5], in_channels, filters, 5, 1),  # on x, stride 2
        bl5=_init_separable(ks[6], filters, filters, 3, 0),      # on z1, stride 1
    )


# --------------------------- parameter preparation ---------------------------

def _prep_sep(p):
    """Fold BNs into the pointwise convs, matrify all weights (kernel-ready)."""
    w2, b2 = _fold_bn_out(p["w2"], p["b2"], p["bn1"])
    w4, b4 = _fold_bn_out(p["w4"], p["b4"], p["bn2"])
    return dict(k=p["w1"].shape[-1],
                w1m=_w_to_mat(p["w1"]), b1=p["b1"],
                w2m=_w_to_mat(w2), b2=b2,
                w3m=_w_to_mat(p["w3"]), b3=p["b3"],
                w4m=_w_to_mat(w4), b4=b4)


def _prep_sep_pair(pa, pb):
    """Combine two branches that consume the same input with the same k
    (br1/br2: 7x7 stride-2 on x): stage-1 weights concatenated along N, later
    stages block-diagonal, so the pair runs through one lane-wider matmul chain
    sharing a single im2col (half the launches)."""
    assert pa["w1"].shape[-1] == pb["w1"].shape[-1]
    w2a, b2a = _fold_bn_out(pa["w2"], pa["b2"], pa["bn1"])
    w2b, b2b = _fold_bn_out(pb["w2"], pb["b2"], pb["bn1"])
    w4a, b4a = _fold_bn_out(pa["w4"], pa["b4"], pa["bn2"])
    w4b, b4b = _fold_bn_out(pb["w4"], pb["b4"], pb["bn2"])
    return dict(
        k=pa["w1"].shape[-1],
        w1m=_w_to_mat(jnp.concatenate([pa["w1"], pb["w1"]], axis=0)),
        b1=jnp.concatenate([pa["b1"], pb["b1"]]),
        w2m=_w_to_mat(_block_diag_conv(w2a, w2b)),
        b2=jnp.concatenate([b2a, b2b]),
        w3m=_w_to_mat(_block_diag_conv(pa["w3"], pb["w3"])),
        b3=jnp.concatenate([pa["b3"], pb["b3"]]),
        w4m=_w_to_mat(_block_diag_conv(w4a, w4b)),
        b4=jnp.concatenate([b4a, b4b]))


def prepare_params(params):
    c = params["conv1x1"]
    s, t = _bn_scale_shift(c["bn"])
    return dict(
        conv1x1=dict(s=s, t=t, wm=_w_to_mat(c["w"]), b=c["b"]),
        bl1=_prep_sep(params["bl1"]),
        br12=_prep_sep_pair(params["br1"], params["br2"]),
        br3=_prep_sep(params["br3"]),
        bl5=_prep_sep(params["bl5"]))


# --------------------------- forward pass -------------------------------------

def apply_conv1x1(p, x):
    """'nac': BN -> ReLU -> 1x1 conv.  The BN affine + ReLU are applied once to
    the small raw input (pre-matmul); the kernel is a plain fused matmul."""
    n, h, w, c = x.shape
    xr = jnp.maximum(x * p["s"] + p["t"], 0.0)
    y = fused_matmul(xr.reshape(n * h * w, c), p["wm"], p["b"])
    return y.reshape(n, h, w, -1)


def apply_separable(p, xr, stride, *, res=None):
    """'a ccna ccn' branch.  `xr` already has the leading ReLU applied (done
    once per tensor, before im2col).  Trailing BNs are folded into the
    pointwise weights; the mid ReLU is fused into the stage-2 epilogue; the
    branch addition (if any) is fused into the final matmul as a residual."""
    k = p["k"]
    pad = k // 2
    x1, (n, ho, wo) = _im2col(xr, k, stride, pad)
    h1 = fused_matmul(x1, p["w1m"], p["b1"])                 # k x k conv (stride)
    h2 = fused_matmul(h1, p["w2m"], p["b2"], relu_out=True)  # 1x1 + BN + next ReLU
    x3, _ = _im2col(h2.reshape(n, ho, wo, -1), k, 1, pad)
    h3 = fused_matmul(x3, p["w3m"], p["b3"])                 # k x k conv (stride 1)
    h4 = fused_matmul(h3, p["w4m"], p["b4"], res=res)        # 1x1 + BN + fused add
    return h4.reshape(n, ho, wo, -1)


def cell_stem0_forward(params, x_nchw):
    p = prepare_params(params)
    x = jnp.transpose(x_nchw, (0, 2, 3, 1)).astype(F32)       # NCHW -> NHWC
    y = apply_conv1x1(p["conv1x1"], x)                         # (N,16,16,F)

    # Leading branch ReLUs, applied once per tensor and before im2col.
    rx = jnp.maximum(x, 0.0)
    ry = jnp.maximum(y, 0.0)

    # 3x3 stride-2 pools on y: one stride-1 pool kernel each, decimated in glue
    # (identical window centres).  maxpool(y) is computed once (reused z2, z5).
    mp_y = pallas_pool3(y, "max")[:, ::2, ::2, :]              # (N,8,8,F)
    ap_y = pallas_pool3(y, "avg")[:, ::2, ::2, :]

    bl1_out = apply_separable(p["bl1"], ry, 2)                 # (N,8,8,F)

    # Combined br1|br2 on shared im2col(relu(x), 7, stride 2).  Its fused
    # stage-4 residual is [bl1_out | maxpool(y)], so it emits [z1 | z2].
    z12 = apply_separable(p["br12"], rx, 2,
                          res=jnp.concatenate([bl1_out, mp_y], axis=-1))
    f = bl1_out.shape[-1]
    z1, z2 = z12[..., :f], z12[..., f:]

    z3 = apply_separable(p["br3"], rx, 2, res=ap_y)            # avgpool(y)+br3
    z4 = pallas_pool3(z1, "avg", res=z2)                       # avgpool(z1)+z2
    z5 = apply_separable(p["bl5"], jnp.maximum(z1, 0.0), 1, res=mp_y)

    out = jnp.concatenate([z2, z3, z4, z5], axis=-1)           # NHWC channel cat
    return jnp.transpose(out, (0, 3, 1, 2))                    # back to NCHW


if __name__ == "__main__":
    key = jax.random.PRNGKey(0)
    k_params, k_x = jax.random.split(key)
    N, C, H, W, FILTERS = 2, 4, 16, 16, 8
    params = init_cell_stem0(k_params, C, FILTERS)
    x = jax.random.normal(k_x, (N, C, H, W), F32)
    fwd = jax.jit(cell_stem0_forward)
    out = jax.block_until_ready(fwd(params, x))
    assert out.shape == (N, 4 * FILTERS, H // 2, W // 2), out.shape
    assert bool(jnp.all(jnp.isfinite(out)))
    print("KERNEL_OK")
</pallas_src>

<mosaic_0001>
module attributes {stable_mosaic.version = 11 : i64} {
  func.func @_mm_kernel(%arg0: memref<128x196xf32, #tpu.memory_space<vmem>>, %arg1: memref<196x8xbf16, #tpu.memory_space<vmem>>, %arg2: memref<1x8xf32, #tpu.memory_space<vmem>>, %arg3: memref<128x8xf32, #tpu.memory_space<vmem>>) attributes {dimension_semantics = [], scalar_prefetch = 0 : i64, scratch_operands = 0 : i64, tpu.core_type = #tpu.core_type<tc>} {
    %c0 = arith.constant 0 : index
    %c0_0 = arith.constant 0 : index
    %0 = vector.load %arg0[%c0, %c0_0] : memref<128x196xf32, #tpu.memory_space<vmem>>, vector<128x196xf32>
    %1 = arith.truncf %0 : vector<128x196xf32> to vector<128x196xbf16>
    %c0_1 = arith.constant 0 : index
    %c0_2 = arith.constant 0 : index
    %2 = vector.load %arg1[%c0_1, %c0_2] : memref<196x8xbf16, #tpu.memory_space<vmem>>, vector<196x8xbf16>
    %cst = arith.constant dense<0.000000e+00> : vector<128x8xf32>
    %3 = tpu.matmul %1, %2, %cst {dimension_numbers = #tpu.dot_dimension_numbers<[1], [0], [0], [1], [0, 0, 1, 1], [], []>} : vector<128x196xbf16>, vector<196x8xbf16>, vector<128x8xf32> -> vector<128x8xf32>
    %c0_3 = arith.constant 0 : index
    %c0_4 = arith.constant 0 : index
    %4 = vector.load %arg2[%c0_3, %c0_4] : memref<1x8xf32, #tpu.memory_space<vmem>>, vector<1x8xf32>
    %5 = vector.broadcast %4 : vector<1x8xf32> to vector<128x8xf32>
    %6 = arith.addf %3, %5 : vector<128x8xf32>
    %c0_5 = arith.constant 0 : index
    %c0_6 = arith.constant 0 : index
    %7 = vector.load %arg3[%c0_5, %c0_6] : memref<128x8xf32, #tpu.memory_space<vmem>>, vector<128x8xf32>
    tpu.vector_store %arg3[%c0_5, %c0_6], %6 {strides = array<i32>} : memref<128x8xf32, #tpu.memory_space<vmem>>, vector<128x8xf32>,
    return
  }
}

module attributes {stable_mosaic.version = 11 : i64} {
  func.func @_mm_kernel(%arg0: memref<128x8xf32, #tpu.memory_space<vmem>>, %arg1: memref<8x16xbf16, #tpu.memory_space<vmem>>, %arg2: memref<1x16xf32, #tpu.memory_space<vmem>>, %arg3: memref<128x16xf32, #tpu.memory_space<vmem>>) attributes {dimension_semantics = [], scalar_prefetch = 0 : i64, scratch_operands = 0 : i64, tpu.core_type = #tpu.core_type<tc>} {
    %c0 = arith.constant 0 : index
    %c0_0 = arith.constant 0 : index
    %0 = vector.load %arg0[%c0, %c0_0] : memref<128x8xf32, #tpu.memory_space<vmem>>, vector<128x8xf32>
    %1 = arith.truncf %0 : vector<128x8xf32> to vector<128x8xbf16>
    %c0_1 = arith.constant 0 : index
    %c0_2 = arith.constant 0 : index
    %2 = vector.load %arg1[%c0_1, %c0_2] : memref<8x16xbf16, #tpu.memory_space<vmem>>, vector<8x16xbf16>
    %cst = arith.constant dense<0.000000e+00> : vector<128x16xf32>
    %3 = tpu.matmul %1, %2, %cst {dimension_numbers = #tpu.dot_dimension_numbers<[1], [0], [0], [1], [0, 0, 1, 1], [], []>} : vector<128x8xbf16>, vector<8x16xbf16>, vector<128x16xf32> -> vector<128x16xf32>
    %c0_3 = arith.constant 0 : index
    %c0_4 = arith.constant 0 : index
    %4 = vector.load %arg2[%c0_3, %c0_4] : memref<1x16xf32, #tpu.memory_space<vmem>>, vector<1x16xf32>
    %5 = vector.broadcast %4 : vector<1x16xf32> to vector<128x16xf32>
    %6 = arith.addf %3, %5 : vector<128x16xf32>
    %cst_5 = arith.constant 0.000000e+00 : f32
    %7 = vector.broadcast %cst_5 : f32 to vector<128x16xf32>
    %8 = arith.maximumf %6, %7 : vector<128x16xf32>
    %c0_6 = arith.constant 0 : index
    %c0_7 = arith.constant 0 : index
    %9 = vector.load %arg3[%c0_6, %c0_7] : memref<128x16xf32, #tpu.memory_space<vmem>>, vector<128x16xf32>
    tpu.vector_store %arg3[%c0_6, %c0_7], %8 {strides = array<i32>} : memref<128x16xf32, #tpu.memory_space<vmem>>, vector<128x16xf32>,
    return
  }
}

module attributes {stable_mosaic.version = 11 : i64} {
  func.func @_mm_kernel(%arg0: memref<128x784xf32, #tpu.memory_space<vmem>>, %arg1: memref<784x16xbf16, #tpu.memory_space<vmem>>, %arg2: memref<1x16xf32, #tpu.memory_space<vmem>>, %arg3: memref<128x16xf32, #tpu.memory_space<vmem>>) attributes {dimension_semantics = [], scalar_prefetch = 0 : i64, scratch_operands = 0 : i64, tpu.core_type = #tpu.core_type<tc>} {
    %c0 = arith.constant 0 : index
    %c0_0 = arith.constant 0 : index
    %0 = vector.load %arg0[%c0, %c0_0] : memref<128x784xf32, #tpu.memory_space<vmem>>, vector<128x784xf32>
    %1 = arith.truncf %0 : vector<128x784xf32> to vector<128x784xbf16>
    %c0_1 = arith.constant 0 : index
    %c0_2 = arith.constant 0 : index
    %2 = vector.load %arg1[%c0_1, %c0_2] : memref<784x16xbf16, #tpu.memory_space<vmem>>, vector<784x16xbf16>
    %cst = arith.constant dense<0.000000e+00> : vector<128x16xf32>
    %3 = tpu.matmul %1, %2, %cst {dimension_numbers = #tpu.dot_dimension_numbers<[1], [0], [0], [1], [0, 0, 1, 1], [], []>} : vector<128x784xbf16>, vector<784x16xbf16>, vector<128x16xf32> -> vector<128x16xf32>
    %c0_3 = arith.constant 0 : index
    %c0_4 = arith.constant 0 : index
    %4 = vector.load %arg2[%c0_3, %c0_4] : memref<1x16xf32, #tpu.memory_space<vmem>>, vector<1x16xf32>
    %5 = vector.broadcast %4 : vector<1x16xf32> to vector<128x16xf32>
    %6 = arith.addf %3, %5 : vector<128x16xf32>
    %c0_5 = arith.constant 0 : index
    %c0_6 = arith.constant 0 : index
    %7 = vector.load %arg3[%c0_5, %c0_6] : memref<128x16xf32, #tpu.memory_space<vmem>>, vector<128x16xf32>
    tpu.vector_store %arg3[%c0_5, %c0_6], %6 {strides = array<i32>} : memref<128x16xf32, #tpu.memory_space<vmem>>, vector<128x16xf32>,
    return
  }
}

module attributes {stable_mosaic.version = 11 : i64} {
  func.func @_mm_kernel(%arg0: memref<512x4xf32, #tpu.memory_space<vmem>>, %arg1: memref<4x8xbf16, #tpu.memory_space<vmem>>, %arg2: memref<1x8xf32, #tpu.memory_space<vmem>>, %arg3: memref<512x8xf32, #tpu.memory_space<vmem>>) attributes {dimension_semantics = [], scalar_prefetch = 0 : i64, scratch_operands = 0 : i64, tpu.core_type = #tpu.core_type<tc>} {
    %c0 = arith.constant 0 : index
    %c0_0 = arith.constant 0 : index
    %0 = vector.load %arg0[%c0, %c0_0] : memref<512x4xf32, #tpu.memory_space<vmem>>, vector<512x4xf32>
    %1 = arith.truncf %0 : vector<512x4xf32> to vector<512x4xbf16>
    %c0_1 = arith.constant 0 : index
    %c0_2 = arith.constant 0 : index
    %2 = vector.load %arg1[%c0_1, %c0_2] : memref<4x8xbf16, #tpu.memory_space<vmem>>, vector<4x8xbf16>
    %cst = arith.constant dense<0.000000e+00> : vector<512x8xf32>
    %3 = tpu.matmul %1, %2, %cst {dimension_numbers = #tpu.dot_dimension_numbers<[1], [0], [0], [1], [0, 0, 1, 1], [], []>} : vector<512x4xbf16>, vector<4x8xbf16>, vector<512x8xf32> -> vector<512x8xf32>
    %c0_3 = arith.constant 0 : index
    %c0_4 = arith.constant 0 : index
    %4 = vector.load %arg2[%c0_3, %c0_4] : memref<1x8xf32, #tpu.memory_space<vmem>>, vector<1x8xf32>
    %5 = vector.broadcast %4 : vector<1x8xf32> to vector<512x8xf32>
    %6 = arith.addf %3, %5 : vector<512x8xf32>
    %c0_5 = arith.constant 0 : index
    %c0_6 = arith.constant 0 : index
    %7 = vector.load %arg3[%c0_5, %c0_6] : memref<512x8xf32, #tpu.memory_space<vmem>>, vector<512x8xf32>
    tpu.vector_store %arg3[%c0_5, %c0_6], %6 {strides = array<i32>} : memref<512x8xf32, #tpu.memory_space<vmem>>, vector<512x8xf32>,
    return
  }
}

module attributes {stable_mosaic.version = 11 : i64} {
  func.func @_pool3_kernel(%arg0: memref<2x18x144xf32, #tpu.memory_space<vmem>>, %arg1: memref<2x16x128xf32, #tpu.memory_space<vmem>>) attributes {dimension_semantics = [], scalar_prefetch = 0 : i64, scratch_operands = 0 : i64, tpu.core_type = #tpu.core_type<tc>} {
    %c0 = arith.constant 0 : index
    %c0_0 = arith.constant 0 : index
    %c0_1 = arith.constant 0 : index
    %0 = vector.load %arg0[%c0, %c0_0, %c0_1] : memref<2x18x144xf32, #tpu.memory_space<vmem>>, vector<2x18x144xf32>
    %1 = vector.extract_strided_slice %0 {offsets = [0, 0, 0], sizes = [2, 16, 128], strides = [1, 1, 1]} : vector<2x18x144xf32> to vector<2x16x128xf32>
    %2 = vector.extract_strided_slice %0 {offsets = [0, 0, 8], sizes = [2, 16, 128], strides = [1, 1, 1]} : vector<2x18x144xf32> to vector<2x16x128xf32>
    %3 = arith.maximumf %1, %2 : vector<2x16x128xf32>
    %4 = vector.extract_strided_slice %0 {offsets = [0, 0, 16], sizes = [2, 16, 128], strides = [1, 1, 1]} : vector<2x18x144xf32> to vector<2x16x128xf32>
    %5 = arith.maximumf %3, %4 : vector<2x16x128xf32>
    %6 = vector.extract_strided_slice %0 {offsets = [0, 1, 0], sizes = [2, 16, 128], strides = [1, 1, 1]} : vector<2x18x144xf32> to vector<2x16x128xf32>
    %7 = arith.maximumf %5, %6 : vector<2x16x128xf32>
    %8 = vector.extract_strided_slice %0 {offsets = [0, 1, 8], sizes = [2, 16, 128], strides = [1, 1, 1]} : vector<2x18x144xf32> to vector<2x16x128xf32>
    %9 = arith.maximumf %7, %8 : vector<2x16x128xf32>
    %10 = vector.extract_strided_slice %0 {offsets = [0, 1, 16], sizes = [2, 16, 128], strides = [1, 1, 1]} : vector<2x18x144xf32> to vector<2x16x128xf32>
    %11 = arith.maximumf %9, %10 : vector<2x16x128xf32>
    %12 = vector.extract_strided_slice %0 {offsets = [0, 2, 0], sizes = [2, 16, 128], strides = [1, 1, 1]} : vector<2x18x144xf32> to vector<2x16x128xf32>
    %13 = arith.maximumf %11, %12 : vector<2x16x128xf32>
    %14 = vector.extract_strided_slice %0 {offsets = [0, 2, 8], sizes = [2, 16, 128], strides = [1, 1, 1]} : vector<2x18x144xf32> to vector<2x16x128xf32>
    %15 = arith.maximumf %13, %14 : vector<2x16x128xf32>
    %16 = vector.extract_strided_slice %0 {offsets = [0, 2, 16], sizes = [2, 16, 128], strides = [1, 1, 1]} : vector<2x18x144xf32> to vector<2x16x128xf32>
    %17 = arith.maximumf %15, %16 : vector<2x16x128xf32>
    %c0_2 = arith.constant 0 : index
    %c0_3 = arith.constant 0 : index
    %c0_4 = arith.constant 0 : index
    %18 = vector.load %arg1[%c0_2, %c0_3, %c0_4] : memref<2x16x128xf32, #tpu.memory_space<vmem>>, vector<2x16x128xf32>
    tpu.vector_store %arg1[%c0_2, %c0_3, %c0_4], %17 {strides = array<i32>} : memref<2x16x128xf32, #tpu.memory_space<vmem>>, vector<2x16x128xf32>,
    return
  }
}

module attributes {stable_mosaic.version = 11 : i64} {
  func.func @_mm_kernel(%arg0: memref<128x200xf32, #tpu.memory_space<vmem>>, %arg1: memref<200x8xbf16, #tpu.memory_space<vmem>>, %arg2: memref<1x8xf32, #tpu.memory_space<vmem>>, %arg3: memref<128x8xf32, #tpu.memory_space<vmem>>) attributes {dimension_semantics = [], scalar_prefetch = 0 : i64, scratch_operands = 0 : i64, tpu.core_type = #tpu.core_type<tc>} {
    %c0 = arith.constant 0 : index
    %c0_0 = arith.constant 0 : index
    %0 = vector.load %arg0[%c0, %c0_0] : memref<128x200xf32, #tpu.memory_space<vmem>>, vector<128x200xf32>
    %1 = arith.truncf %0 : vector<128x200xf32> to vector<128x200xbf16>
    %c0_1 = arith.constant 0 : index
    %c0_2 = arith.constant 0 : index
    %2 = vector.load %arg1[%c0_1, %c0_2] : memref<200x8xbf16, #tpu.memory_space<vmem>>, vector<200x8xbf16>
    %cst = arith.constant dense<0.000000e+00> : vector<128x8xf32>
    %3 = tpu.matmul %1, %2, %cst {dimension_numbers = #tpu.dot_dimension_numbers<[1], [0], [0], [1], [0, 0, 1, 1], [], []>} : vector<128x200xbf16>, vector<200x8xbf16>, vector<128x8xf32> -> vector<128x8xf32>
    %c0_3 = arith.constant 0 : index
    %c0_4 = arith.constant 0 : index
    %4 = vector.load %arg2[%c0_3, %c0_4] : memref<1x8xf32, #tpu.memory_space<vmem>>, vector<1x8xf32>
    %5 = vector.broadcast %4 : vector<1x8xf32> to vector<128x8xf32>
    %6 = arith.addf %3, %5 : vector<128x8xf32>
    %c0_5 = arith.constant 0 : index
    %c0_6 = arith.constant 0 : index
    %7 = vector.load %arg3[%c0_5, %c0_6] : memref<128x8xf32, #tpu.memory_space<vmem>>, vector<128x8xf32>
    tpu.vector_store %arg3[%c0_5, %c0_6], %6 {strides = array<i32>} : memref<128x8xf32, #tpu.memory_space<vmem>>, vector<128x8xf32>,
    return
  }
}

module attributes {stable_mosaic.version = 11 : i64} {
  func.func @_mm_kernel(%arg0: memref<128x8xf32, #tpu.memory_space<vmem>>, %arg1: memref<8x8xbf16, #tpu.memory_space<vmem>>, %arg2: memref<1x8xf32, #tpu.memory_space<vmem>>, %arg3: memref<128x8xf32, #tpu.memory_space<vmem>>) attributes {dimension_semantics = [], scalar_prefetch = 0 : i64, scratch_operands = 0 : i64, tpu.core_type = #tpu.core_type<tc>} {
    %c0 = arith.constant 0 : index
    %c0_0 = arith.constant 0 : index
    %0 = vector.load %arg0[%c0, %c0_0] : memref<128x8xf32, #tpu.memory_space<vmem>>, vector<128x8xf32>
    %1 = arith.truncf %0 : vector<128x8xf32> to vector<128x8xbf16>
    %c0_1 = arith.constant 0 : index
    %c0_2 = arith.constant 0 : index
    %2 = vector.load %arg1[%c0_1, %c0_2] : memref<8x8xbf16, #tpu.memory_space<vmem>>, vector<8x8xbf16>
    %cst = arith.constant dense<0.000000e+00> : vector<128x8xf32>
    %3 = tpu.matmul %1, %2, %cst {dimension_numbers = #tpu.dot_dimension_numbers<[1], [0], [0], [1], [0, 0, 1, 1], [], []>} : vector<128x8xbf16>, vector<8x8xbf16>, vector<128x8xf32> -> vector<128x8xf32>
    %c0_3 = arith.constant 0 : index
    %c0_4 = arith.constant 0 : index
    %4 = vector.load %arg2[%c0_3, %c0_4] : memref<1x8xf32, #tpu.memory_space<vmem>>, vector<1x8xf32>
    %5 = vector.broadcast %4 : vector<1x8xf32> to vector<128x8xf32>
    %6 = arith.addf %3, %5 : vector<128x8xf32>
    %cst_5 = arith.constant 0.000000e+00 : f32
    %7 = vector.broadcast %cst_5 : f32 to vector<128x8xf32>
    %8 = arith.maximumf %6, %7 : vector<128x8xf32>
    %c0_6 = arith.constant 0 : index
    %c0_7 = arith.constant 0 : index
    %9 = vector.load %arg3[%c0_6, %c0_7] : memref<128x8xf32, #tpu.memory_space<vmem>>, vector<128x8xf32>
    tpu.vector_store %arg3[%c0_6, %c0_7], %8 {strides = array<i32>} : memref<128x8xf32, #tpu.memory_space<vmem>>, vector<128x8xf32>,
    return
  }
}

module attributes {stable_mosaic.version = 11 : i64} {
  func.func @_mm_kernel(%arg0: memref<128x8xf32, #tpu.memory_space<vmem>>, %arg1: memref<8x8xbf16, #tpu.memory_space<vmem>>, %arg2: memref<1x8xf32, #tpu.memory_space<vmem>>, %arg3: memref<128x8xf32, #tpu.memory_space<vmem>>) attributes {dimension_semantics = [], scalar_prefetch = 0 : i64, scratch_operands = 0 : i64, tpu.core_type = #tpu.core_type<tc>} {
    %c0 = arith.constant 0 : index
    %c0_0 = arith.constant 0 : index
    %0 = vector.load %arg0[%c0, %c0_0] : memref<128x8xf32, #tpu.memory_space<vmem>>, vector<128x8xf32>
    %1 = arith.truncf %0 : vector<128x8xf32> to vector<128x8xbf16>
    %c0_1 = arith.constant 0 : index
    %c0_2 = arith.constant 0 : index
    %2 = vector.load %arg1[%c0_1, %c0_2] : memref<8x8xbf16, #tpu.memory_space<vmem>>, vector<8x8xbf16>
    %cst = arith.constant dense<0.000000e+00> : vector<128x8xf32>
    %3 = tpu.matmul %1, %2, %cst {dimension_numbers = #tpu.dot_dimension_numbers<[1], [0], [0], [1], [0, 0, 1, 1], [], []>} : vector<128x8xbf16>, vector<8x8xbf16>, vector<128x8xf32> -> vector<128x8xf32>
    %c0_3 = arith.constant 0 : index
    %c0_4 = arith.constant 0 : index
    %4 = vector.load %arg2[%c0_3, %c0_4] : memref<1x8xf32, #tpu.memory_space<vmem>>, vector<1x8xf32>
    %5 = vector.broadcast %4 : vector<1x8xf32> to vector<128x8xf32>
    %6 = arith.addf %3, %5 : vector<128x8xf32>
    %c0_5 = arith.constant 0 : index
    %c0_6 = arith.constant 0 : index
    %7 = vector.load %arg3[%c0_5, %c0_6] : memref<128x8xf32, #tpu.memory_space<vmem>>, vector<128x8xf32>
    tpu.vector_store %arg3[%c0_5, %c0_6], %6 {strides = array<i32>} : memref<128x8xf32, #tpu.memory_space<vmem>>, vector<128x8xf32>,
    return
  }
}

module attributes {stable_mosaic.version = 11 : i64} {
  func.func @_mm_kernel(%arg0: memref<128x16xf32, #tpu.memory_space<vmem>>, %arg1: memref<16x16xbf16, #tpu.memory_space<vmem>>, %arg2: memref<1x16xf32, #tpu.memory_space<vmem>>, %arg3: memref<128x16xf32, #tpu.memory_space<vmem>>, %arg4: memref<128x16xf32, #tpu.memory_space<vmem>>) attributes {dimension_semantics = [], scalar_prefetch = 0 : i64, scratch_operands = 0 : i64, tpu.core_type = #tpu.core_type<tc>} {
    %c0 = arith.constant 0 : index
    %c0_0 = arith.constant 0 : index
    %0 = vector.load %arg0[%c0, %c0_0] : memref<128x16xf32, #tpu.memory_space<vmem>>, vector<128x16xf32>
    %1 = arith.truncf %0 : vector<128x16xf32> to vector<128x16xbf16>
    %c0_1 = arith.constant 0 : index
    %c0_2 = arith.constant 0 : index
    %2 = vector.load %arg1[%c0_1, %c0_2] : memref<16x16xbf16, #tpu.memory_space<vmem>>, vector<16x16xbf16>
    %cst = arith.constant dense<0.000000e+00> : vector<128x16xf32>
    %3 = tpu.matmul %1, %2, %cst {dimension_numbers = #tpu.dot_dimension_numbers<[1], [0], [0], [1], [0, 0, 1, 1], [], []>} : vector<128x16xbf16>, vector<16x16xbf16>, vector<128x16xf32> -> vector<128x16xf32>
    %c0_3 = arith.constant 0 : index
    %c0_4 = arith.constant 0 : index
    %4 = vector.load %arg2[%c0_3, %c0_4] : memref<1x16xf32, #tpu.memory_space<vmem>>, vector<1x16xf32>
    %5 = vector.broadcast %4 : vector<1x16xf32> to vector<128x16xf32>
    %6 = arith.addf %3, %5 : vector<128x16xf32>
    %c0_5 = arith.constant 0 : index
    %c0_6 = arith.constant 0 : index
    %7 = vector.load %arg3[%c0_5, %c0_6] : memref<128x16xf32, #tpu.memory_space<vmem>>, vector<128x16xf32>
    %8 = arith.addf %6, %7 : vector<128x16xf32>
    %c0_7 = arith.constant 0 : index
    %c0_8 = arith.constant 0 : index
    %9 = vector.load %arg4[%c0_7, %c0_8] : memref<128x16xf32, #tpu.memory_space<vmem>>, vector<128x16xf32>
    tpu.vector_store %arg4[%c0_7, %c0_8], %8 {strides = array<i32>} : memref<128x16xf32, #tpu.memory_space<vmem>>, vector<128x16xf32>,
    return
  }
}

module attributes {stable_mosaic.version = 11 : i64} {
  func.func @_mm_kernel(%arg0: memref<128x8xf32, #tpu.memory_space<vmem>>, %arg1: memref<8x8xbf16, #tpu.memory_space<vmem>>, %arg2: memref<1x8xf32, #tpu.memory_space<vmem>>, %arg3: memref<128x8xf32, #tpu.memory_space<vmem>>, %arg4: memref<128x8xf32, #tpu.memory_space<vmem>>) attributes {dimension_semantics = [], scalar_prefetch = 0 : i64, scratch_operands = 0 : i64, tpu.core_type = #tpu.core_type<tc>} {
    %c0 = arith.constant 0 : index
    %c0_0 = arith.constant 0 : index
    %0 = vector.load %arg0[%c0, %c0_0] : memref<128x8xf32, #tpu.memory_space<vmem>>, vector<128x8xf32>
    %1 = arith.truncf %0 : vector<128x8xf32> to vector<128x8xbf16>
    %c0_1 = arith.constant 0 : index
    %c0_2 = arith.constant 0 : index
    %2 = vector.load %arg1[%c0_1, %c0_2] : memref<8x8xbf16, #tpu.memory_space<vmem>>, vector<8x8xbf16>
    %cst = arith.constant dense<0.000000e+00> : vector<128x8xf32>
    %3 = tpu.matmul %1, %2, %cst {dimension_numbers = #tpu.dot_dimension_numbers<[1], [0], [0], [1], [0, 0, 1, 1], [], []>} : vector<128x8xbf16>, vector<8x8xbf16>, vector<128x8xf32> -> vector<128x8xf32>
    %c0_3 = arith.constant 0 : index
    %c0_4 = arith.constant 0 : index
    %4 = vector.load %arg2[%c0_3, %c0_4] : memref<1x8xf32, #tpu.memory_space<vmem>>, vector<1x8xf32>
    %5 = vector.broadcast %4 : vector<1x8xf32> to vector<128x8xf32>
    %6 = arith.addf %3, %5 : vector<128x8xf32>
    %c0_5 = arith.constant 0 : index
    %c0_6 = arith.constant 0 : index
    %7 = vector.load %arg3[%c0_5, %c0_6] : memref<128x8xf32, #tpu.memory_space<vmem>>, vector<128x8xf32>
    %8 = arith.addf %6, %7 : vector<128x8xf32>
    %c0_7 = arith.constant 0 : index
    %c0_8 = arith.constant 0 : index
    %9 = vector.load %arg4[%c0_7, %c0_8] : memref<128x8xf32, #tpu.memory_space<vmem>>, vector<128x8xf32>
    tpu.vector_store %arg4[%c0_7, %c0_8], %8 {strides = array<i32>} : memref<128x8xf32, #tpu.memory_space<vmem>>, vector<128x8xf32>,
    return
  }
}

module attributes {stable_mosaic.version = 11 : i64} {
  func.func @_mm_kernel(%arg0: memref<128x72xf32, #tpu.memory_space<vmem>>, %arg1: memref<72x8xbf16, #tpu.memory_space<vmem>>, %arg2: memref<1x8xf32, #tpu.memory_space<vmem>>, %arg3: memref<128x8xf32, #tpu.memory_space<vmem>>) attributes {dimension_semantics = [], scalar_prefetch = 0 : i64, scratch_operands = 0 : i64, tpu.core_type = #tpu.core_type<tc>} {
    %c0 = arith.constant 0 : index
    %c0_0 = arith.constant 0 : index
    %0 = vector.load %arg0[%c0, %c0_0] : memref<128x72xf32, #tpu.memory_space<vmem>>, vector<128x72xf32>
    %1 = arith.truncf %0 : vector<128x72xf32> to vector<128x72xbf16>
    %c0_1 = arith.constant 0 : index
    %c0_2 = arith.constant 0 : index
    %2 = vector.load %arg1[%c0_1, %c0_2] : memref<72x8xbf16, #tpu.memory_space<vmem>>, vector<72x8xbf16>
    %cst = arith.constant dense<0.000000e+00> : vector<128x8xf32>
    %3 = tpu.matmul %1, %2, %cst {dimension_numbers = #tpu.dot_dimension_numbers<[1], [0], [0], [1], [0, 0, 1, 1], [], []>} : vector<128x72xbf16>, vector<72x8xbf16>, vector<128x8xf32> -> vector<128x8xf32>
    %c0_3 = arith.constant 0 : index
    %c0_4 = arith.constant 0 : index
    %4 = vector.load %arg2[%c0_3, %c0_4] : memref<1x8xf32, #tpu.memory_space<vmem>>, vector<1x8xf32>
    %5 = vector.broadcast %4 : vector<1x8xf32> to vector<128x8xf32>
    %6 = arith.addf %3, %5 : vector<128x8xf32>
    %c0_5 = arith.constant 0 : index
    %c0_6 = arith.constant 0 : index
    %7 = vector.load %arg3[%c0_5, %c0_6] : memref<128x8xf32, #tpu.memory_space<vmem>>, vector<128x8xf32>
    tpu.vector_store %arg3[%c0_5, %c0_6], %6 {strides = array<i32>} : memref<128x8xf32, #tpu.memory_space<vmem>>, vector<128x8xf32>,
    return
  }
}

module attributes {stable_mosaic.version = 11 : i64} {
  func.func @_pool3_kernel(%arg0: memref<2x10x80xf32, #tpu.memory_space<vmem>>, %arg1: memref<1x8x64xf32, #tpu.memory_space<vmem>>, %arg2: memref<2x8x64xf32, #tpu.memory_space<vmem>>, %arg3: memref<2x8x64xf32, #tpu.memory_space<vmem>>) attributes {dimension_semantics = [], scalar_prefetch = 0 : i64, scratch_operands = 0 : i64, tpu.core_type = #tpu.core_type<tc>} {
    %c0 = arith.constant 0 : index
    %c0_0 = arith.constant 0 : index
    %c0_1 = arith.constant 0 : index
    %0 = vector.load %arg0[%c0, %c0_0, %c0_1] : memref<2x10x80xf32, #tpu.memory_space<vmem>>, vector<2x10x80xf32>
    %1 = vector.extract_strided_slice %0 {offsets = [0, 0, 0], sizes = [2, 8, 64], strides = [1, 1, 1]} : vector<2x10x80xf32> to vector<2x8x64xf32>
    %2 = vector.extract_strided_slice %0 {offsets = [0, 0, 8], sizes = [2, 8, 64], strides = [1, 1, 1]} : vector<2x10x80xf32> to vector<2x8x64xf32>
    %3 = arith.addf %1, %2 : vector<2x8x64xf32>
    %4 = vector.extract_strided_slice %0 {offsets = [0, 0, 16], sizes = [2, 8, 64], strides = [1, 1, 1]} : vector<2x10x80xf32> to vector<2x8x64xf32>
    %5 = arith.addf %3, %4 : vector<2x8x64xf32>
    %6 = vector.extract_strided_slice %0 {offsets = [0, 1, 0], sizes = [2, 8, 64], strides = [1, 1, 1]} : vector<2x10x80xf32> to vector<2x8x64xf32>
    %7 = arith.addf %5, %6 : vector<2x8x64xf32>
    %8 = vector.extract_strided_slice %0 {offsets = [0, 1, 8], sizes = [2, 8, 64], strides = [1, 1, 1]} : vector<2x10x80xf32> to vector<2x8x64xf32>
    %9 = arith.addf %7, %8 : vector<2x8x64xf32>
    %10 = vector.extract_strided_slice %0 {offsets = [0, 1, 16], sizes = [2, 8, 64], strides = [1, 1, 1]} : vector<2x10x80xf32> to vector<2x8x64xf32>
    %11 = arith.addf %9, %10 : vector<2x8x64xf32>
    %12 = vector.extract_strided_slice %0 {offsets = [0, 2, 0], sizes = [2, 8, 64], strides = [1, 1, 1]} : vector<2x10x80xf32> to vector<2x8x64xf32>
    %13 = arith.addf %11, %12 : vector<2x8x64xf32>
    %14 = vector.extract_strided_slice %0 {offsets = [0, 2, 8], sizes = [2, 8, 64], strides = [1, 1, 1]} : vector<2x10x80xf32> to vector<2x8x64xf32>
    %15 = arith.addf %13, %14 : vector<2x8x64xf32>
    %16 = vector.extract_strided_slice %0 {offsets = [0, 2, 16], sizes = [2, 8, 64], strides = [1, 1, 1]} : vector<2x10x80xf32> to vector<2x8x64xf32>
    %17 = arith.addf %15, %16 : vector<2x8x64xf32>
    %c0_2 = arith.constant 0 : index
    %c0_3 = arith.constant 0 : index
    %c0_4 = arith.constant 0 : index
    %18 = vector.load %arg1[%c0_2, %c0_3, %c0_4] : memref<1x8x64xf32, #tpu.memory_space<vmem>>, vector<1x8x64xf32>
    %19 = vector.broadcast %18 : vector<1x8x64xf32> to vector<2x8x64xf32>
    %20 = arith.mulf %17, %19 : vector<2x8x64xf32>
    %c0_5 = arith.constant 0 : index
    %c0_6 = arith.constant 0 : index
    %c0_7 = arith.constant 0 : index
    %21 = vector.load %arg2[%c0_5, %c0_6, %c0_7] : memref<2x8x64xf32, #tpu.memory_space<vmem>>, vector<2x8x64xf32>
    %22 = arith.addf %20, %21 : vector<2x8x64xf32>
    %c0_8 = arith.constant 0 : index
    %c0_9 = arith.constant 0 : index
    %c0_10 = arith.constant 0 : index
    %23 = vector.load %arg3[%c0_8, %c0_9, %c0_10] : memref<2x8x64xf32, #tpu.memory_space<vmem>>, vector<2x8x64xf32>
    tpu.vector_store %arg3[%c0_8, %c0_9, %c0_10], %22 {strides = array<i32>} : memref<2x8x64xf32, #tpu.memory_space<vmem>>, vector<2x8x64xf32>,
    return
  }
}

module attributes {stable_mosaic.version = 11 : i64} {
  func.func @_mm_kernel(%arg0: memref<128x100xf32, #tpu.memory_space<vmem>>, %arg1: memref<100x4xbf16, #tpu.memory_space<vmem>>, %arg2: memref<1x4xf32, #tpu.memory_space<vmem>>, %arg3: memref<128x4xf32, #tpu.memory_space<vmem>>) attributes {dimension_semantics = [], scalar_prefetch = 0 : i64, scratch_operands = 0 : i64, tpu.core_type = #tpu.core_type<tc>} {
    %c0 = arith.constant 0 : index
    %c0_0 = arith.constant 0 : index
    %0 = vector.load %arg0[%c0, %c0_0] : memref<128x100xf32, #tpu.memory_space<vmem>>, vector<128x100xf32>
    %1 = arith.truncf %0 : vector<128x100xf32> to vector<128x100xbf16>
    %c0_1 = arith.constant 0 : index
    %c0_2 = arith.constant 0 : index
    %2 = vector.load %arg1[%c0_1, %c0_2] : memref<100x4xbf16, #tpu.memory_space<vmem>>, vector<100x4xbf16>
    %cst = arith.constant dense<0.000000e+00> : vector<128x4xf32>
    %3 = tpu.matmul %1, %2, %cst {dimension_numbers = #tpu.dot_dimension_numbers<[1], [0], [0], [1], [0, 0, 1, 1], [], []>} : vector<128x100xbf16>, vector<100x4xbf16>, vector<128x4xf32> -> vector<128x4xf32>
    %c0_3 = arith.constant 0 : index
    %c0_4 = arith.constant 0 : index
    %4 = vector.load %arg2[%c0_3, %c0_4] : memref<1x4xf32, #tpu.memory_space<vmem>>, vector<1x4xf32>
    %5 = vector.broadcast %4 : vector<1x4xf32> to vector<128x4xf32>
    %6 = arith.addf %3, %5 : vector<128x4xf32>
    %c0_5 = arith.constant 0 : index
    %c0_6 = arith.constant 0 : index
    %7 = vector.load %arg3[%c0_5, %c0_6] : memref<128x4xf32, #tpu.memory_space<vmem>>, vector<128x4xf32>
    tpu.vector_store %arg3[%c0_5, %c0_6], %6 {strides = array<i32>} : memref<128x4xf32, #tpu.memory_space<vmem>>, vector<128x4xf32>,
    return
  }
}

module attributes {stable_mosaic.version = 11 : i64} {
  func.func @_mm_kernel(%arg0: memref<128x4xf32, #tpu.memory_space<vmem>>, %arg1: memref<4x8xbf16, #tpu.memory_space<vmem>>, %arg2: memref<1x8xf32, #tpu.memory_space<vmem>>, %arg3: memref<128x8xf32, #tpu.memory_space<vmem>>) attributes {dimension_semantics = [], scalar_prefetch = 0 : i64, scratch_operands = 0 : i64, tpu.core_type = #tpu.core_type<tc>} {
    %c0 = arith.constant 0 : index
    %c0_0 = arith.constant 0 : index
    %0 = vector.load %arg0[%c0, %c0_0] : memref<128x4xf32, #tpu.memory_space<vmem>>, vector<128x4xf32>
    %1 = arith.truncf %0 : vector<128x4xf32> to vector<128x4xbf16>
    %c0_1 = arith.constant 0 : index
    %c0_2 = arith.constant 0 : index
    %2 = vector.load %arg1[%c0_1, %c0_2] : memref<4x8xbf16, #tpu.memory_space<vmem>>, vector<4x8xbf16>
    %cst = arith.constant dense<0.000000e+00> : vector<128x8xf32>
    %3 = tpu.matmul %1, %2, %cst {dimension_numbers = #tpu.dot_dimension_numbers<[1], [0], [0], [1], [0, 0, 1, 1], [], []>} : vector<128x4xbf16>, vector<4x8xbf16>, vector<128x8xf32> -> vector<128x8xf32>
    %c0_3 = arith.constant 0 : index
    %c0_4 = arith.constant 0 : index
    %4 = vector.load %arg2[%c0_3, %c0_4] : memref<1x8xf32, #tpu.memory_space<vmem>>, vector<1x8xf32>
    %5 = vector.broadcast %4 : vector<1x8xf32> to vector<128x8xf32>
    %6 = arith.addf %3, %5 : vector<128x8xf32>
    %cst_5 = arith.constant 0.000000e+00 : f32
    %7 = vector.broadcast %cst_5 : f32 to vector<128x8xf32>
    %8 = arith.maximumf %6, %7 : vector<128x8xf32>
    %c0_6 = arith.constant 0 : index
    %c0_7 = arith.constant 0 : index
    %9 = vector.load %arg3[%c0_6, %c0_7] : memref<128x8xf32, #tpu.memory_space<vmem>>, vector<128x8xf32>
    tpu.vector_store %arg3[%c0_6, %c0_7], %8 {strides = array<i32>} : memref<128x8xf32, #tpu.memory_space<vmem>>, vector<128x8xf32>,
    return
  }
}

module attributes {stable_mosaic.version = 11 : i64} {
  func.func @_pool3_kernel(%arg0: memref<2x18x144xf32, #tpu.memory_space<vmem>>, %arg1: memref<1x16x128xf32, #tpu.memory_space<vmem>>, %arg2: memref<2x16x128xf32, #tpu.memory_space<vmem>>) attributes {dimension_semantics = [], scalar_prefetch = 0 : i64, scratch_operands = 0 : i64, tpu.core_type = #tpu.core_type<tc>} {
    %c0 = arith.constant 0 : index
    %c0_0 = arith.constant 0 : index
    %c0_1 = arith.constant 0 : index
    %0 = vector.load %arg0[%c0, %c0_0, %c0_1] : memref<2x18x144xf32, #tpu.memory_space<vmem>>, vector<2x18x144xf32>
    %1 = vector.extract_strided_slice %0 {offsets = [0, 0, 0], sizes = [2, 16, 128], strides = [1, 1, 1]} : vector<2x18x144xf32> to vector<2x16x128xf32>
    %2 = vector.extract_strided_slice %0 {offsets = [0, 0, 8], sizes = [2, 16, 128], strides = [1, 1, 1]} : vector<2x18x144xf32> to vector<2x16x128xf32>
    %3 = arith.addf %1, %2 : vector<2x16x128xf32>
    %4 = vector.extract_strided_slice %0 {offsets = [0, 0, 16], sizes = [2, 16, 128], strides = [1, 1, 1]} : vector<2x18x144xf32> to vector<2x16x128xf32>
    %5 = arith.addf %3, %4 : vector<2x16x128xf32>
    %6 = vector.extract_strided_slice %0 {offsets = [0, 1, 0], sizes = [2, 16, 128], strides = [1, 1, 1]} : vector<2x18x144xf32> to vector<2x16x128xf32>
    %7 = arith.addf %5, %6 : vector<2x16x128xf32>
    %8 = vector.extract_strided_slice %0 {offsets = [0, 1, 8], sizes = [2, 16, 128], strides = [1, 1, 1]} : vector<2x18x144xf32> to vector<2x16x128xf32>
    %9 = arith.addf %7, %8 : vector<2x16x128xf32>
    %10 = vector.extract_strided_slice %0 {offsets = [0, 1, 16], sizes = [2, 16, 128], strides = [1, 1, 1]} : vector<2x18x144xf32> to vector<2x16x128xf32>
    %11 = arith.addf %9, %10 : vector<2x16x128xf32>
    %12 = vector.extract_strided_slice %0 {offsets = [0, 2, 0], sizes = [2, 16, 128], strides = [1, 1, 1]} : vector<2x18x144xf32> to vector<2x16x128xf32>
    %13 = arith.addf %11, %12 : vector<2x16x128xf32>
    %14 = vector.extract_strided_slice %0 {offsets = [0, 2, 8], sizes = [2, 16, 128], strides = [1, 1, 1]} : vector<2x18x144xf32> to vector<2x16x128xf32>
    %15 = arith.addf %13, %14 : vector<2x16x128xf32>
    %16 = vector.extract_strided_slice %0 {offsets = [0, 2, 16], sizes = [2, 16, 128], strides = [1, 1, 1]} : vector<2x18x144xf32> to vector<2x16x128xf32>
    %17 = arith.addf %15, %16 : vector<2x16x128xf32>
    %c0_2 = arith.constant 0 : index
    %c0_3 = arith.constant 0 : index
    %c0_4 = arith.constant 0 : index
    %18 = vector.load %arg1[%c0_2, %c0_3, %c0_4] : memref<1x16x128xf32, #tpu.memory_space<vmem>>, vector<1x16x128xf32>
    %19 = vector.broadcast %18 : vector<1x16x128xf32> to vector<2x16x128xf32>
    %20 = arith.mulf %17, %19 : vector<2x16x128xf32>
    %c0_5 = arith.constant 0 : index
    %c0_6 = arith.constant 0 : index
    %c0_7 = arith.constant 0 : index
    %21 = vector.load %arg2[%c0_5, %c0_6, %c0_7] : memref<2x16x128xf32, #tpu.memory_space<vmem>>, vector<2x16x128xf32>
    tpu.vector_store %arg2[%c0_5, %c0_6, %c0_7], %20 {strides = array<i32>} : memref<2x16x128xf32, #tpu.memory_space<vmem>>, vector<2x16x128xf32>,
    return
  }
}

</mosaic_0001>

<bundles_post_ra>
// kernel: cell_stem0_forward.27
= control target key start
LH: loop header
LB: loop body
LE: loop exit
PB: predicated region body
PF: predicated region fallthrough
CT: control target
= control target key end

     0   :  { %vm192_vm0 = vcmask 1041408   ;;  %vm167_vm1 = vcmask 556032   ;;  %vm294_vm2 = vcmask 64512   ;;  %s645_s1 = inlined_call_operand.vmem [shape: bf16[196,8], index: 1, kind: input, shape index: {}]   ;;  %s646_s0 = inlined_call_operand.vmem [shape: f32[128,196], index: 0, kind: input, shape index: {}]   ;;  %s647_s2 = inlined_call_operand.vmem [shape: f32[1,8], index: 2, kind: input, shape index: {}]   ;;  %s648_s3 = inlined_call_operand.vmem [shape: f32[128,8], index: 3, kind: output, shape index: {}]  }
   0x1   :  { %v378_v0 = vld [vmem:[%s645_s1 + $0x38] sm:$0xff]  ;;  %v87_v1 = vld [vmem:[%s645_s1 + $0x60] sm:$0x3]  ;;  %v377_v3 = vld [vmem:[%s645_s1 + $0x30] sm:$0xff] }
   0x2   :  { %v141_v2 = vunpack.c.l.b16 %v87_v1  ;;  %196 = vmatpush.bf16.msra.mxu0 %v378_v0  ;;  %383 = vmatpush.bf16.msra.mxu2 %v378_v0  ;;  %v382_v6 = vld [vmem:[%s645_s1 + $0x58] sm:$0xff]  ;;  %v376_v7 = vld [vmem:[%s645_s1 + $0x28] sm:$0xff]  ;;  %v381_v8 = vld [vmem:[%s645_s1 + $0x50] sm:$0xff] }
   0x3   :  { %v375_v9 = vld [vmem:[%s645_s1 + $0x20] sm:$0xff]  ;;  %v380_v10 = vld [vmem:[%s645_s1 + $0x48] sm:$0xff]  ;;  %v374_v11 = vld [vmem:[%s645_s1 + $0x18] sm:$0xff] }
   0x4   :  { %v154_v4 = vpack.c.b16 %v141_v2, %v141_v2  ;;  %v379_v12 = vld [vmem:[%s645_s1 + $0x40] sm:$0xff]  ;;  %v373_v13 = vld [vmem:[%s645_s1 + $0x10] sm:$0xff]  ;;  %v16_v14 = vld [vmem:[%s646_s0 + $0x8] sm:$0xff] }
   0x5   :  { %v18_v15 = vld [vmem:[%s646_s0 + $0x18] sm:$0xff]  ;;  %v36_v16 = vld [vmem:[%s646_s0 + $0xa8] sm:$0xff]  ;;  %v371_v21 = vld [vmem:[%s645_s1] sm:$0xff] }
   0x6   :  { %v194_v5 = vsel %vm192_vm0, %v154_v4, 0  ;;  %197 = vmatpush.bf16.msra.mxu0 %v377_v3  ;;  %384 = vmatpush.bf16.msra.mxu2 %v377_v3  ;;  %v38_v17 = vld [vmem:[%s646_s0 + $0xb8] sm:$0xff]  ;;  %v48_v18 = vpack.c.bf16 %v18_v15, %v16_v14  ;;  %v372_v19 = vld [vmem:[%s645_s1 + $0x8] sm:$0xff]  ;;  %v15_v22 = vld [vmem:[%s646_s0] sm:$0xff] }
   0x7   :  { %248 = vmatpush.bf16.msra.mxu1 %v194_v5  ;;  %391 = vmatpush.bf16.msra.mxu3 %v194_v5  ;;  %v58_v20 = vpack.c.bf16 %v38_v17, %v36_v16  ;;  %v17_v23 = vld [vmem:[%s646_s0 + $0x10] sm:$0xff]  ;;  %v31_v24 = vld [vmem:[%s646_s0 + $0x80] sm:$0xff]  ;;  %v20_v28 = vld [vmem:[%s646_s0 + $0x28] sm:$0xff] }
   0x8   :  { %v33_v25 = vld [vmem:[%s646_s0 + $0x90] sm:$0xff]  ;;  %v47_v26 = vpack.c.bf16 %v17_v23, %v15_v22  ;;  %v22_v29 = vld [vmem:[%s646_s0 + $0x38] sm:$0xff]  ;;  %v40_v30 = vld [vmem:[%s646_s0 + $0xc8] sm:$0xff] }
   0x9   :  { %v55_v27 = vpack.c.bf16 %v33_v25, %v31_v24  ;;  %v42_v31 = vld [vmem:[%s646_s0 + $0xd8] sm:$0xff]  ;;  %v50_v32 = vpack.c.bf16 %v22_v29, %v20_v28  ;;  %v19_v34 = vld [vmem:[%s646_s0 + $0x20] sm:$0xff]  ;;  %v21_v35 = vld [vmem:[%s646_s0 + $0x30] sm:$0xff] }
   0xa   :  { %198 = vmatpush.bf16.msra.mxu0 %v376_v7  ;;  %385 = vmatpush.bf16.msra.mxu2 %v376_v7  ;;  %v60_v33 = vpack.c.bf16 %v42_v31, %v40_v30  ;;  %v35_v36 = vld [vmem:[%s646_s0 + $0xa0] sm:$0xff]  ;;  %v37_v37 = vld [vmem:[%s646_s0 + $0xb0] sm:$0xff]  ;;  %v49_v38 = vpack.c.bf16 %v21_v35, %v19_v34  ;;  %v24_v40 = vld [vmem:[%s646_s0 + $0x48] sm:$0xff] }
   0xb   :  { %249 = vmatpush.bf16.msra.mxu1 %v382_v6  ;;  %392 = vmatpush.bf16.msra.mxu3 %v382_v6  ;;  %v57_v39 = vpack.c.bf16 %v37_v37, %v35_v36  ;;  %v26_v41 = vld [vmem:[%s646_s0 + $0x58] sm:$0xff]  ;;  %v44_v42 = vld [vmem:[%s646_s0 + $0xe8] sm:$0xff]  ;;  %v23_v46 = vld [vmem:[%s646_s0 + $0x40] sm:$0xff] }
   0xc   :  { %v46_v43 = vld [vmem:[%s646_s0 + $0xf8] sm:$0xff]  ;;  %v52_v44 = vpack.c.bf16 %v26_v41, %v24_v40  ;;  %v25_v47 = vld [vmem:[%s646_s0 + $0x50] sm:$0xff]  ;;  %v39_v48 = vld [vmem:[%s646_s0 + $0xc0] sm:$0xff] }
   0xd   :  { %v62_v45 = vpack.c.bf16 %v46_v43, %v44_v42  ;;  %v41_v49 = vld [vmem:[%s646_s0 + $0xd0] sm:$0xff]  ;;  %v51_v50 = vpack.c.bf16 %v25_v47, %v23_v46  ;;  %v28_v52 = vld [vmem:[%s646_s0 + $0x68] sm:$0xff]  ;;  %v30_v53 = vld [vmem:[%s646_s0 + $0x78] sm:$0xff] }
   0xe   :  { %199 = vmatpush.bf16.msra.mxu0 %v375_v9  ;;  %386 = vmatpush.bf16.msra.mxu2 %v375_v9  ;;  %v59_v51 = vpack.c.bf16 %v41_v49, %v39_v48  ;;  %v54_v54 = vpack.c.bf16 %v30_v53, %v28_v52  ;;  %v27_v55 = vld [vmem:[%s646_s0 + $0x60] sm:$0xff]  ;;  %v29_v56 = vld [vmem:[%s646_s0 + $0x70] sm:$0xff]  ;;  %v32_v61 = vld [vmem:[%s646_s0 + $0x88] sm:$0xff] }
   0xf   :  { %250 = vmatpush.bf16.msra.mxu1 %v381_v8  ;;  %393 = vmatpush.bf16.msra.mxu3 %v381_v8  ;;  %v43_v57 = vld [vmem:[%s646_s0 + $0xe0] sm:$0xff]  ;;  %v45_v58 = vld [vmem:[%s646_s0 + $0xf0] sm:$0xff]  ;;  %v53_v59 = vpack.c.bf16 %v29_v56, %v27_v55  ;;  %v34_v62 = vld [vmem:[%s646_s0 + $0x98] sm:$0xff] }
  0x10   :  { %v61_v60 = vpack.c.bf16 %v45_v58, %v43_v57  ;;  %v56_v63 = vpack.c.bf16 %v34_v62, %v32_v61  ;;  %v563_v1 = vld [vmem:[%s647_s2] ss:$0 sm:$0xff] }
  0x12   :  { %200 = vmatpush.bf16.msra.mxu0 %v374_v11  ;;  %387 = vmatpush.bf16.msra.mxu2 %v374_v11 }
  0x13   :  { %251 = vmatpush.bf16.msra.mxu1 %v380_v10  ;;  %394 = vmatpush.bf16.msra.mxu3 %v380_v10 }
  0x16   :  { %201 = vmatpush.bf16.msra.mxu0 %v373_v13  ;;  %388 = vmatpush.bf16.msra.mxu2 %v373_v13 }
  0x17   :  { %252 = vmatpush.bf16.msra.mxu1 %v379_v12  ;;  %395 = vmatpush.bf16.msra.mxu3 %v379_v12 }
  0x1a   :  { %363 = vmatmul.msk.bf16.vlgmr.msra.gmra.mxu1 %vm167_vm1, %v48_v18  ;;  %202 = vmatpush.bf16.msra.mxu0 %v372_v19 }
  0x1b   :  { %368 = vmatmul.msk.bf16.vlgmr.msra.gmra.mxu3 %vm167_vm1, %v58_v20  ;;  %389 = vmatpush.bf16.msra.mxu2 %v372_v19 }
  0x1e   :  { %203 = vmatpush.bf16.msra.mxu0 %v371_v21 }
  0x1f   :  { %390 = vmatpush.bf16.msra.mxu2 %v371_v21 }
  0x21   :  { %204 = vmatmul.bf16.vlgmr.msra.gmra.mxu0 %v47_v26 }
  0x22   :  { %224 = vmatmul.bf16.vlgmr.msra.gmra.mxu2 %v55_v27 }
  0x2a   :  { %364 = vmatmul.msk.bf16.gmra.mxu1 %vm167_vm1, %v50_v32 }
  0x2b   :  { %369 = vmatmul.msk.bf16.gmra.mxu3 %vm167_vm1, %v60_v33 }
  0x31   :  { %209 = vmatmul.bf16.gmra.mxu0 %v49_v38 }
  0x32   :  { %229 = vmatmul.bf16.gmra.mxu2 %v57_v39 }
  0x3a   :  { %365 = vmatmul.msk.bf16.gmra.mxu1 %vm167_vm1, %v52_v44 }
  0x3b   :  { %370 = vmatmul.msk.bf16.gmra.mxu3 %vm167_vm1, %v62_v45 }
  0x41   :  { %214 = vmatmul.bf16.gmra.mxu0 %v51_v50 }
  0x42   :  { %234 = vmatmul.bf16.gmra.mxu2 %v59_v51 }
  0x4a   :  { %366 = vmatmul.msk.bf16.gmra.mxu1 %vm167_vm1, %v54_v54 }
  0x51   :  { %219 = vmatmul.bf16.gmra.mxu0 %v53_v59 }
  0x52   :  { %239 = vmatmul.bf16.gmra.mxu2 %v61_v60 }
  0x5a   :  { %367 = vmatmul.msk.bf16.gmra.mxu1 %vm167_vm1, %v56_v63 }
  0x97   :  { %v254_v0 = vpop.f32.mrf.mxu1 }
  0x9e   :  { %v205_v3 = vpop.f32.mrf.mxu0  ;;  %v279_v12 = vpop.f32.mrf.mxu3 }
  0x9f   :  { %v256_v2 = vpop.f32.mrf.mxu1  ;;  %v206_v4 = vadd.f32 %v563_v1, %v205_v3 }
  0xa1   :  { %v255_v5 = vadd.f32 %v254_v0, %v206_v4 }
  0xa3   :  { %295 = vst.msk [vmem:[%s648_s3] sm:$0xff] %vm294_vm2, %v255_v5 }
  0xa5   :  { %v225_v6 = vpop.f32.mrf.mxu2 }
  0xa6   :  { %v207_v8 = vpop.f32.mrf.mxu0  ;;  %v281_v22 = vpop.f32.mrf.mxu3  ;;  %v226_v48 = vadd.f32 %v563_v1, %v225_v6 }
  0xa7   :  { %v259_v7 = vpop.f32.mrf.mxu1  ;;  %v208_v9 = vadd.f32 %v563_v1, %v207_v8 }
  0xa9   :  { %v257_v10 = vadd.f32 %v256_v2, %v208_v9 }
  0xab   :  { %296 = vst.msk [vmem:[%s648_s3 + $0x8] sm:$0xff] %vm294_vm2, %v257_v10 }
  0xad   :  { %v227_v11 = vpop.f32.mrf.mxu2 }
  0xae   :  { %v210_v14 = vpop.f32.mrf.mxu0  ;;  %v284_v32 = vpop.f32.mrf.mxu3  ;;  %v228_v58 = vadd.f32 %v563_v1, %v227_v11 }
  0xaf   :  { %v261_v13 = vpop.f32.mrf.mxu1  ;;  %v211_v15 = vadd.f32 %v563_v1, %v210_v14 }
  0xb1   :  { %v260_v16 = vadd.f32 %v259_v7, %v211_v15 }
  0xb3   :  { %297 = vst.msk [vmem:[%s648_s3 + $0x10] sm:$0xff] %vm294_vm2, %v260_v16 }
  0xb5   :  { %v230_v17 = vpop.f32.mrf.mxu2 }
  0xb6   :  { %v231_v18 = vadd.f32 %v563_v1, %v230_v17  ;;  %v212_v20 = vpop.f32.mrf.mxu0  ;;  %v286_v40 = vpop.f32.mrf.mxu3 }
  0xb7   :  { %v264_v19 = vpop.f32.mrf.mxu1  ;;  %v213_v21 = vadd.f32 %v563_v1, %v212_v20 }
  0xb8   :  { %v280_v23 = vadd.f32 %v279_v12, %v231_v18 }
  0xb9   :  { %v262_v24 = vadd.f32 %v261_v13, %v213_v21 }
  0xba   :  { %305 = vst.msk [vmem:[%s648_s3 + $0x50] sm:$0xff] %vm294_vm2, %v280_v23 }
  0xbb   :  { %298 = vst.msk [vmem:[%s648_s3 + $0x18] sm:$0xff] %vm294_vm2, %v262_v24 }
  0xbd   :  { %v232_v25 = vpop.f32.mrf.mxu2 }
  0xbe   :  { %v233_v26 = vadd.f32 %v563_v1, %v232_v25  ;;  %v215_v28 = vpop.f32.mrf.mxu0  ;;  %v289_v49 = vpop.f32.mrf.mxu3 }
  0xbf   :  { %v266_v27 = vpop.f32.mrf.mxu1  ;;  %v216_v29 = vadd.f32 %v563_v1, %v215_v28 }
  0xc0   :  { %v282_v30 = vadd.f32 %v281_v22, %v233_v26 }
  0xc1   :  { %v265_v31 = vadd.f32 %v264_v19, %v216_v29 }
  0xc2   :  { %306 = vst.msk [vmem:[%s648_s3 + $0x58] sm:$0xff] %vm294_vm2, %v282_v30 }
  0xc3   :  { %299 = vst.msk [vmem:[%s648_s3 + $0x20] sm:$0xff] %vm294_vm2, %v265_v31 }
  0xc5   :  { %v235_v33 = vpop.f32.mrf.mxu2 }
  0xc6   :  { %v236_v34 = vadd.f32 %v563_v1, %v235_v33  ;;  %v217_v36 = vpop.f32.mrf.mxu0  ;;  %v291_v62 = vpop.f32.mrf.mxu3 }
  0xc7   :  { %v269_v35 = vpop.f32.mrf.mxu1  ;;  %v218_v37 = vadd.f32 %v563_v1, %v217_v36 }
  0xc8   :  { %v285_v38 = vadd.f32 %v284_v32, %v236_v34 }
  0xc9   :  { %v267_v39 = vadd.f32 %v266_v27, %v218_v37 }
  0xca   :  { %307 = vst.msk [vmem:[%s648_s3 + $0x60] sm:$0xff] %vm294_vm2, %v285_v38 }
  0xcb   :  { %300 = vst.msk [vmem:[%s648_s3 + $0x28] sm:$0xff] %vm294_vm2, %v267_v39 }
  0xcd   :  { %v237_v41 = vpop.f32.mrf.mxu2 }
  0xce   :  { %v238_v42 = vadd.f32 %v563_v1, %v237_v41  ;;  %v220_v44 = vpop.f32.mrf.mxu0 }
  0xcf   :  { %v271_v43 = vpop.f32.mrf.mxu1  ;;  %v221_v45 = vadd.f32 %v563_v1, %v220_v44 }
  0xd0   :  { %v287_v46 = vadd.f32 %v286_v40, %v238_v42 }
  0xd1   :  { %v270_v47 = vadd.f32 %v269_v35, %v221_v45 }
  0xd2   :  { %308 = vst.msk [vmem:[%s648_s3 + $0x68] sm:$0xff] %vm294_vm2, %v287_v46 }
  0xd3   :  { %301 = vst.msk [vmem:[%s648_s3 + $0x30] sm:$0xff] %vm294_vm2, %v270_v47 }
  0xd5   :  { %v240_v50 = vpop.f32.mrf.mxu2 }
  0xd6   :  { %v241_v51 = vadd.f32 %v563_v1, %v240_v50  ;;  %v222_v53 = vpop.f32.mrf.mxu0 }
  0xd7   :  { %v274_v52 = vpop.f32.mrf.mxu1  ;;  %v223_v55 = vadd.f32 %v563_v1, %v222_v53 }
  0xd8   :  { %v275_v54 = vadd.f32 %v274_v52, %v226_v48  ;;  %v290_v56 = vadd.f32 %v289_v49, %v241_v51 }
  0xd9   :  { %v272_v57 = vadd.f32 %v271_v43, %v223_v55 }
  0xda   :  { %303 = vst.msk [vmem:[%s648_s3 + $0x40] sm:$0xff] %vm294_vm2, %v275_v54 }
  0xdb   :  { %309 = vst.msk [vmem:[%s648_s3 + $0x70] sm:$0xff] %vm294_vm2, %v290_v56 }
  0xdc   :  { %302 = vst.msk [vmem:[%s648_s3 + $0x38] sm:$0xff] %vm294_vm2, %v272_v57 }
  0xdd   :  { %v242_v59 = vpop.f32.mrf.mxu2 }
  0xde   :  { %v243_v60 = vadd.f32 %v563_v1, %v242_v59 }
  0xdf   :  { %v276_v61 = vpop.f32.mrf.mxu1 }
  0xe0   :  { %v277_v63 = vadd.f32 %v276_v61, %v228_v58  ;;  %v292_v0 = vadd.f32 %v291_v62, %v243_v60 }
  0xe2   :  { %304 = vst.msk [vmem:[%s648_s3 + $0x48] sm:$0xff] %vm294_vm2, %v277_v63 }
  0xe3   :  { %310 = vst.msk [vmem:[%s648_s3 + $0x78] sm:$0xff] %vm294_vm2, %v292_v0 }

// kernel: cell_stem0_forward.28
= control target key start
LH: loop header
LB: loop body
LE: loop exit
PB: predicated region body
PF: predicated region fallthrough
CT: control target
= control target key end

     0   :  { %vm69_vm0 = vcmask 1043456   ;;  %vm44_vm1 = vcmask 64512   ;;  %vm138_vm2 = vcmask 130048   ;;  %s317_s1 = inlined_call_operand.vmem [shape: bf16[8,16], index: 1, kind: input, shape index: {}]   ;;  %s318_s0 = inlined_call_operand.vmem [shape: f32[128,8], index: 0, kind: input, shape index: {}]   ;;  %s319_s2 = inlined_call_operand.vmem [shape: f32[1,16], index: 2, kind: input, shape index: {}]   ;;  %s320_s3 = inlined_call_operand.vmem [shape: f32[128,16], index: 3, kind: output, shape index: {}]  }
   0x1   :  { %v39_v0 = vld [vmem:[%s317_s1] sm:$0xf]  ;;  %v16_v2 = vld [vmem:[%s318_s0 + $0x8] sm:$0xff]  ;;  %v17_v14 = vld [vmem:[%s318_s0 + $0x10] sm:$0xff] }
   0x2   :  { %v15_v1 = vld [vmem:[%s318_s0] sm:$0xff]  ;;  %v71_v3 = vsel %vm69_vm0, %v39_v0, 0  ;;  %v20_v6 = vld [vmem:[%s318_s0 + $0x28] sm:$0xff]  ;;  %v18_v15 = vld [vmem:[%s318_s0 + $0x18] sm:$0xff] }
   0x3   :  { %v31_v4 = vpack.c.bf16 %v16_v2, %v15_v1  ;;  %v19_v5 = vld [vmem:[%s318_s0 + $0x20] sm:$0xff]  ;;  %80 = vmatpush.bf16.msra.mxu0 %v71_v3  ;;  %167 = vmatpush.bf16.msra.mxu1 %v71_v3  ;;  %v24_v9 = vld [vmem:[%s318_s0 + $0x48] sm:$0xff]  ;;  %v21_v16 = vld [vmem:[%s318_s0 + $0x30] sm:$0xff]  ;;  %v32_v22 = vpack.c.bf16 %v18_v15, %v17_v14 }
   0x4   :  { %v23_v7 = vld [vmem:[%s318_s0 + $0x40] sm:$0xff]  ;;  %v33_v8 = vpack.c.bf16 %v20_v6, %v19_v5  ;;  %v28_v11 = vld [vmem:[%s318_s0 + $0x68] sm:$0xff]  ;;  %168 = vmatpush.bf16.msra.mxu2 %v71_v3  ;;  %169 = vmatpush.bf16.msra.mxu3 %v71_v3  ;;  %v22_v17 = vld [vmem:[%s318_s0 + $0x38] sm:$0xff] }
   0x5   :  { %v27_v10 = vld [vmem:[%s318_s0 + $0x60] sm:$0xff]  ;;  %v35_v12 = vpack.c.bf16 %v24_v9, %v23_v7  ;;  %v25_v18 = vld [vmem:[%s318_s0 + $0x50] sm:$0xff]  ;;  %v26_v19 = vld [vmem:[%s318_s0 + $0x58] sm:$0xff]  ;;  %v34_v23 = vpack.c.bf16 %v22_v17, %v21_v16 }
   0x6   :  { %v37_v13 = vpack.c.bf16 %v28_v11, %v27_v10  ;;  %159 = vmatmul.msk.bf16.vlgmr.msra.gmra.mxu0 %vm44_vm1, %v31_v4  ;;  %161 = vmatmul.msk.bf16.vlgmr.msra.gmra.mxu1 %vm44_vm1, %v33_v8  ;;  %v29_v20 = vld [vmem:[%s318_s0 + $0x70] sm:$0xff]  ;;  %v30_v21 = vld [vmem:[%s318_s0 + $0x78] sm:$0xff]  ;;  %v36_v24 = vpack.c.bf16 %v26_v19, %v25_v18  ;;  %v170_v26 = vld [vmem:[%s319_s2] ss:$0 sm:$0xff] }
   0x7   :  { %163 = vmatmul.msk.bf16.vlgmr.msra.gmra.mxu2 %vm44_vm1, %v35_v12  ;;  %v38_v25 = vpack.c.bf16 %v30_v21, %v29_v20 }
   0x8   :  { %165 = vmatmul.msk.bf16.vlgmr.msra.gmra.mxu3 %vm44_vm1, %v37_v13 }
  0x16   :  { %160 = vmatmul.msk.bf16.gmra.mxu0 %vm44_vm1, %v32_v22  ;;  %162 = vmatmul.msk.bf16.gmra.mxu1 %vm44_vm1, %v34_v23 }
  0x17   :  { %164 = vmatmul.msk.bf16.gmra.mxu2 %vm44_vm1, %v36_v24 }
  0x18   :  { %166 = vmatmul.msk.bf16.gmra.mxu3 %vm44_vm1, %v38_v25 }
  0x83   :  { %v82_v27 = vpop.f32.mrf.mxu0  ;;  %v92_v28 = vpop.f32.mrf.mxu1 }
  0x84   :  { %v83_v29 = vadd.f32 %v170_v26, %v82_v27  ;;  %v93_v30 = vadd.f32 %v170_v26, %v92_v28 }
  0x86   :  { %v122_v31 = vmax.f32 %v83_v29, 0.0  ;;  %v126_v32 = vmax.f32 %v93_v30, 0.0 }
  0x88   :  { %139 = vst.msk [vmem:[%s320_s3] sm:$0xff] %vm138_vm2, %v122_v31 }
  0x89   :  { %143 = vst.msk [vmem:[%s320_s3 + $0x20] sm:$0xff] %vm138_vm2, %v126_v32 }
  0x8a   :  { %v102_v33 = vpop.f32.mrf.mxu2 }
  0x8b   :  { %v112_v34 = vpop.f32.mrf.mxu3  ;;  %v103_v35 = vadd.f32 %v170_v26, %v102_v33  ;;  %v84_v37 = vpop.f32.mrf.mxu0 }
  0x8c   :  { %v113_v36 = vadd.f32 %v170_v26, %v112_v34  ;;  %v94_v38 = vpop.f32.mrf.mxu1  ;;  %v85_v39 = vadd.f32 %v170_v26, %v84_v37 }
  0x8d   :  { %v95_v40 = vadd.f32 %v170_v26, %v94_v38  ;;  %v130_v41 = vmax.f32 %v103_v35, 0.0 }
  0x8e   :  { %v134_v42 = vmax.f32 %v113_v36, 0.0  ;;  %v123_v43 = vmax.f32 %v85_v39, 0.0 }
  0x8f   :  { %v127_v44 = vmax.f32 %v95_v40, 0.0  ;;  %147 = vst.msk [vmem:[%s320_s3 + $0x40] sm:$0xff] %vm138_vm2, %v130_v41 }
  0x90   :  { %151 = vst.msk [vmem:[%s320_s3 + $0x60] sm:$0xff] %vm138_vm2, %v134_v42 }
  0x91   :  { %140 = vst.msk [vmem:[%s320_s3 + $0x8] sm:$0xff] %vm138_vm2, %v123_v43 }
  0x92   :  { %144 = vst.msk [vmem:[%s320_s3 + $0x28] sm:$0xff] %vm138_vm2, %v127_v44  ;;  %v104_v45 = vpop.f32.mrf.mxu2 }
  0x93   :  { %v114_v46 = vpop.f32.mrf.mxu3  ;;  %v105_v47 = vadd.f32 %v170_v26, %v104_v45  ;;  %v87_v49 = vpop.f32.mrf.mxu0 }
  0x94   :  { %v115_v48 = vadd.f32 %v170_v26, %v114_v46  ;;  %v97_v50 = vpop.f32.mrf.mxu1  ;;  %v88_v51 = vadd.f32 %v170_v26, %v87_v49 }
  0x95   :  { %v98_v52 = vadd.f32 %v170_v26, %v97_v50  ;;  %v131_v53 = vmax.f32 %v105_v47, 0.0 }
  0x96   :  { %v135_v54 = vmax.f32 %v115_v48, 0.0  ;;  %v124_v55 = vmax.f32 %v88_v51, 0.0 }
  0x97   :  { %v128_v56 = vmax.f32 %v98_v52, 0.0  ;;  %148 = vst.msk [vmem:[%s320_s3 + $0x48] sm:$0xff] %vm138_vm2, %v131_v53 }
  0x98   :  { %152 = vst.msk [vmem:[%s320_s3 + $0x68] sm:$0xff] %vm138_vm2, %v135_v54 }
  0x99   :  { %141 = vst.msk [vmem:[%s320_s3 + $0x10] sm:$0xff] %vm138_vm2, %v124_v55 }
  0x9a   :  { %145 = vst.msk [vmem:[%s320_s3 + $0x30] sm:$0xff] %vm138_vm2, %v128_v56  ;;  %v107_v57 = vpop.f32.mrf.mxu2 }
  0x9b   :  { %v117_v58 = vpop.f32.mrf.mxu3  ;;  %v108_v59 = vadd.f32 %v170_v26, %v107_v57  ;;  %v89_v61 = vpop.f32.mrf.mxu0 }
  0x9c   :  { %v118_v60 = vadd.f32 %v170_v26, %v117_v58  ;;  %v99_v62 = vpop.f32.mrf.mxu1  ;;  %v90_v63 = vadd.f32 %v170_v26, %v89_v61 }
  0x9d   :  { %v100_v0 = vadd.f32 %v170_v26, %v99_v62  ;;  %v132_v1 = vmax.f32 %v108_v59, 0.0 }
  0x9e   :  { %v136_v2 = vmax.f32 %v118_v60, 0.0  ;;  %v125_v3 = vmax.f32 %v90_v63, 0.0 }
  0x9f   :  { %v129_v4 = vmax.f32 %v100_v0, 0.0  ;;  %149 = vst.msk [vmem:[%s320_s3 + $0x50] sm:$0xff] %vm138_vm2, %v132_v1 }
  0xa0   :  { %153 = vst.msk [vmem:[%s320_s3 + $0x70] sm:$0xff] %vm138_vm2, %v136_v2 }
  0xa1   :  { %142 = vst.msk [vmem:[%s320_s3 + $0x18] sm:$0xff] %vm138_vm2, %v125_v3 }
  0xa2   :  { %146 = vst.msk [vmem:[%s320_s3 + $0x38] sm:$0xff] %vm138_vm2, %v129_v4  ;;  %v109_v5 = vpop.f32.mrf.mxu2 }
  0xa3   :  { %v119_v6 = vpop.f32.mrf.mxu3  ;;  %v110_v7 = vadd.f32 %v170_v26, %v109_v5 }
  0xa4   :  { %v120_v8 = vadd.f32 %v170_v26, %v119_v6 }
  0xa5   :  { %v133_v9 = vmax.f32 %v110_v7, 0.0 }
  0xa6   :  { %v137_v10 = vmax.f32 %v120_v8, 0.0 }
  0xa7   :  { %150 = vst.msk [vmem:[%s320_s3 + $0x58] sm:$0xff] %vm138_vm2, %v133_v9 }
  0xa8   :  { %154 = vst.msk [vmem:[%s320_s3 + $0x78] sm:$0xff] %vm138_vm2, %v137_v10 }

// kernel: cell_stem0_forward.29
= control target key start
LH: loop header
LB: loop body
LE: loop exit
PB: predicated region body
PF: predicated region fallthrough
CT: control target
= control target key end

     0   :  { %vm579_vm0 = vcmask 130048   ;;  %s1965_s1 = inlined_call_operand.vmem [shape: bf16[784,16], index: 1, kind: input, shape index: {}]   ;;  %s1966_s2 = inlined_call_operand.vmem [shape: f32[1,16], index: 2, kind: input, shape index: {}]   ;;  %s1967_s0 = inlined_call_operand.vmem [shape: f32[128,784], index: 0, kind: input, shape index: {}]   ;;  %s1968_s3 = inlined_call_operand.vmem [shape: f32[128,16], index: 3, kind: output, shape index: {}]  }
   0x1   :  { %v1178_v0 = vld [vmem:[%s1965_s1 + $0x38] sm:$0xff]  ;;  %v1177_v3 = vld [vmem:[%s1965_s1 + $0x30] sm:$0xff]  ;;  %v1176_v6 = vld [vmem:[%s1965_s1 + $0x28] sm:$0xff] }
   0x2   :  { %v1271_v1 = vld [vmem:[%s1965_s1 + $0xb8] sm:$0xff]  ;;  %604 = vmatpush.bf16.msra.mxu0 %v1178_v0  ;;  %1220 = vmatpush.bf16.msra.mxu3 %v1178_v0  ;;  %v1286_v4 = vld [vmem:[%s1965_s1 + $0xb0] sm:$0xff]  ;;  %v1301_v7 = vld [vmem:[%s1965_s1 + $0xa8] sm:$0xff] }
   0x3   :  { %v1276_v2 = vld [vmem:[%s1965_s1 + $0x78] sm:$0xff]  ;;  %1236 = vmatpush.bf16.msra.mxu2 %v1271_v1  ;;  %v1291_v5 = vld [vmem:[%s1965_s1 + $0x70] sm:$0xff]  ;;  %v1306_v8 = vld [vmem:[%s1965_s1 + $0x68] sm:$0xff] }
   0x4   :  { %1228 = vmatpush.bf16.msra.mxu1 %v1276_v2  ;;  %v1175_v9 = vld [vmem:[%s1965_s1 + $0x20] sm:$0xff]  ;;  %v1174_v12 = vld [vmem:[%s1965_s1 + $0x18] sm:$0xff]  ;;  %v1173_v15 = vld [vmem:[%s1965_s1 + $0x10] sm:$0xff] }
   0x5   :  { %v1316_v10 = vld [vmem:[%s1965_s1 + $0xa0] sm:$0xff]  ;;  %v1331_v13 = vld [vmem:[%s1965_s1 + $0x98] sm:$0xff]  ;;  %v1346_v16 = vld [vmem:[%s1965_s1 + $0x90] sm:$0xff] }
   0x6   :  { %605 = vmatpush.bf16.msra.mxu0 %v1177_v3  ;;  %1221 = vmatpush.bf16.msra.mxu3 %v1177_v3  ;;  %v1321_v11 = vld [vmem:[%s1965_s1 + $0x60] sm:$0xff]  ;;  %v1336_v14 = vld [vmem:[%s1965_s1 + $0x58] sm:$0xff]  ;;  %v1351_v17 = vld [vmem:[%s1965_s1 + $0x50] sm:$0xff] }
   0x7   :  { %1237 = vmatpush.bf16.msra.mxu2 %v1286_v4  ;;  %v1172_v18 = vld [vmem:[%s1965_s1 + $0x8] sm:$0xff]  ;;  %v1171_v21 = vld [vmem:[%s1965_s1] sm:$0xff]  ;;  %v22_v25 = vld [vmem:[%s1967_s0 + $0x38] sm:$0xff] }
   0x8   :  { %1229 = vmatpush.bf16.msra.mxu1 %v1291_v5  ;;  %v1361_v19 = vld [vmem:[%s1965_s1 + $0x88] sm:$0xff]  ;;  %v1374_v22 = vld [vmem:[%s1965_s1 + $0x80] sm:$0xff]  ;;  %v50_v27 = vld [vmem:[%s1967_s0 + $0x118] sm:$0xff] }
   0x9   :  { %v1366_v20 = vld [vmem:[%s1965_s1 + $0x48] sm:$0xff]  ;;  %v1379_v23 = vld [vmem:[%s1965_s1 + $0x40] sm:$0xff]  ;;  %v45_v28 = vld [vmem:[%s1967_s0 + $0xf0] sm:$0xff] }
   0xa   :  { %606 = vmatpush.bf16.msra.mxu0 %v1176_v6  ;;  %1222 = vmatpush.bf16.msra.mxu3 %v1176_v6  ;;  %v15_v24 = vld [vmem:[%s1967_s0] sm:$0xff]  ;;  %v52_v29 = vld [vmem:[%s1967_s0 + $0x128] sm:$0xff]  ;;  %v1202_v32 = vld [vmem:[%s1965_s1 + $0xf8] sm:$0xff] }
   0xb   :  { %1238 = vmatpush.bf16.msra.mxu2 %v1301_v7  ;;  %v43_v26 = vld [vmem:[%s1967_s0 + $0xe0] sm:$0xff]  ;;  %v44_v30 = vld [vmem:[%s1967_s0 + $0xe8] sm:$0xff]  ;;  %v127_v33 = vpack.c.bf16 %v22_v25, %v15_v24  ;;  %v143_v35 = vpack.c.bf16 %v52_v29, %v45_v28  ;;  %v1218_v38 = vld [vmem:[%s1965_s1 + $0x178] sm:$0xff] }
   0xc   :  { %1230 = vmatpush.bf16.msra.mxu1 %v1306_v8  ;;  %v51_v31 = vld [vmem:[%s1967_s0 + $0x120] sm:$0xff]  ;;  %v141_v34 = vpack.c.bf16 %v50_v27, %v43_v26  ;;  %v1201_v39 = vld [vmem:[%s1965_s1 + $0xf0] sm:$0xff]  ;;  %v1200_v41 = vld [vmem:[%s1965_s1 + $0xe8] sm:$0xff] }
   0xd   :  { %v142_v36 = vpack.c.bf16 %v51_v31, %v44_v30  ;;  %v1219_v37 = vld [vmem:[%s1965_s1 + $0x180] sm:$0xff]  ;;  %v1217_v40 = vld [vmem:[%s1965_s1 + $0x170] sm:$0xff]  ;;  %v1216_v42 = vld [vmem:[%s1965_s1 + $0x168] sm:$0xff] }
   0xe   :  { %607 = vmatpush.bf16.msra.mxu0 %v1175_v9  ;;  %1223 = vmatpush.bf16.msra.mxu3 %v1175_v9  ;;  %v1199_v43 = vld [vmem:[%s1965_s1 + $0xe0] sm:$0xff]  ;;  %v29_v44 = vld [vmem:[%s1967_s0 + $0x70] sm:$0xff]  ;;  %v36_v45 = vld [vmem:[%s1967_s0 + $0xa8] sm:$0xff] }
   0xf   :  { %1239 = vmatpush.bf16.msra.mxu2 %v1316_v10  ;;  %v57_v46 = vld [vmem:[%s1967_s0 + $0x150] sm:$0xff]  ;;  %v64_v47 = vld [vmem:[%s1967_s0 + $0x188] sm:$0xff]  ;;  %v59_v48 = vld [vmem:[%s1967_s0 + $0x160] sm:$0xff]  ;;  %v134_v53 = vpack.c.bf16 %v36_v45, %v29_v44 }
  0x10   :  { %1231 = vmatpush.bf16.msra.mxu1 %v1321_v11  ;;  %v66_v49 = vld [vmem:[%s1967_s0 + $0x198] sm:$0xff]  ;;  %v65_v51 = vld [vmem:[%s1967_s0 + $0x190] sm:$0xff]  ;;  %v1215_v52 = vld [vmem:[%s1965_s1 + $0x160] sm:$0xff]  ;;  %v148_v54 = vpack.c.bf16 %v64_v47, %v57_v46 }
  0x11   :  { %v58_v50 = vld [vmem:[%s1967_s0 + $0x158] sm:$0xff]  ;;  %v150_v55 = vpack.c.bf16 %v66_v49, %v59_v48  ;;  %v1197_v59 = vld [vmem:[%s1965_s1 + $0xd0] sm:$0xff]  ;;  %v71_v60 = vld [vmem:[%s1967_s0 + $0x1c0] sm:$0xff] }
  0x12   :  { %608 = vmatpush.bf16.msra.mxu0 %v1174_v12  ;;  %1224 = vmatpush.bf16.msra.mxu3 %v1174_v12  ;;  %v149_v56 = vpack.c.bf16 %v65_v51, %v58_v50  ;;  %v1198_v57 = vld [vmem:[%s1965_s1 + $0xd8] sm:$0xff]  ;;  %v16_v62 = vld [vmem:[%s1967_s0 + $0x8] sm:$0xff]  ;;  %v23_v63 = vld [vmem:[%s1967_s0 + $0x40] sm:$0xff] }
  0x13   :  { %1240 = vmatpush.bf16.msra.mxu2 %v1331_v13  ;;  %v1214_v58 = vld [vmem:[%s1965_s1 + $0x158] sm:$0xff]  ;;  %v73_v0 = vld [vmem:[%s1967_s0 + $0x1d0] sm:$0xff]  ;;  %v72_v3 = vld [vmem:[%s1967_s0 + $0x1c8] sm:$0xff] }
  0x14   :  { %1232 = vmatpush.bf16.msra.mxu1 %v1336_v14  ;;  %v78_v61 = vld [vmem:[%s1967_s0 + $0x1f8] sm:$0xff]  ;;  %v1213_v12 = vld [vmem:[%s1965_s1 + $0x150] sm:$0xff]  ;;  %v1195_v27 = vld [vmem:[%s1965_s1 + $0xc0] sm:$0xff] }
  0x15   :  { %v155_v6 = vpack.c.bf16 %v78_v61, %v71_v60  ;;  %v1211_v28 = vld [vmem:[%s1965_s1 + $0x140] sm:$0xff]  ;;  %v24_v30 = vld [vmem:[%s1967_s0 + $0x48] sm:$0xff]  ;;  %v101_v31 = vld [vmem:[%s1967_s0 + $0x2b0] sm:$0xff] }
  0x16   :  { %609 = vmatpush.bf16.msra.mxu0 %v1173_v15  ;;  %1225 = vmatpush.bf16.msra.mxu3 %v1173_v15  ;;  %v92_v15 = vld [vmem:[%s1967_s0 + $0x268] sm:$0xff]  ;;  %v99_v29 = vld [vmem:[%s1967_s0 + $0x2a0] sm:$0xff]  ;;  %v38_v45 = vld [vmem:[%s1967_s0 + $0xb8] sm:$0xff] }
  0x17   :  { %1241 = vmatpush.bf16.msra.mxu2 %v1346_v16  ;;  %v31_v44 = vld [vmem:[%s1967_s0 + $0x80] sm:$0xff]  ;;  %v122_v47 = vld [vmem:[%s1967_s0 + $0x358] sm:$0xff]  ;;  %v121_v49 = vld [vmem:[%s1967_s0 + $0x350] sm:$0xff] }
  0x18   :  { %1233 = vmatpush.bf16.msra.mxu1 %v1351_v17  ;;  %v115_v46 = vld [vmem:[%s1967_s0 + $0x320] sm:$0xff]  ;;  %v114_v48 = vld [vmem:[%s1967_s0 + $0x318] sm:$0xff]  ;;  %v1205_v50 = vld [vmem:[%s1965_s1 + $0x110] sm:$0xff] }
  0x19   :  { %v26_v60 = vld [vmem:[%s1967_s0 + $0x58] sm:$0xff]  ;;  %v21_v61 = vld [vmem:[%s1967_s0 + $0x30] sm:$0xff] }
  0x1a   :  { %610 = vmatpush.bf16.msra.mxu0 %v1172_v18  ;;  %1226 = vmatpush.bf16.msra.mxu3 %v1172_v18  ;;  %v94_v18 = vld [vmem:[%s1967_s0 + $0x278] sm:$0xff] }
  0x1b   :  { %1242 = vmatpush.bf16.msra.mxu2 %v1361_v19 }
  0x1c   :  { %1234 = vmatpush.bf16.msra.mxu1 %v1366_v20 }
  0x1e   :  { %611 = vmatpush.bf16.msra.mxu0 %v1171_v21  ;;  %1227 = vmatpush.bf16.msra.mxu3 %v1171_v21  ;;  %v93_v21 = vld [vmem:[%s1967_s0 + $0x270] sm:$0xff] }
  0x1f   :  { %1243 = vmatpush.bf16.msra.mxu2 %v1374_v22 }
  0x20   :  { %1235 = vmatpush.bf16.msra.mxu1 %v1379_v23 }
  0x21   :  { %612 = vmatmul.bf16.vlgmr.msra.gmra.mxu0 %v127_v33  ;;  %622 = vmatmul.bf16.vlgmr.msra.gmra.mxu3 %v141_v34  ;;  %v100_v33 = vld [vmem:[%s1967_s0 + $0x2a8] sm:$0xff]  ;;  %v107_v34 = vld [vmem:[%s1967_s0 + $0x2e0] sm:$0xff] }
  0x22   :  { %751 = vmatpush.bf16.msrb.mxu3 %v1202_v32  ;;  %653 = vmatpush.bf16.msrb.mxu0 %v1276_v2  ;;  %v80_v2 = vld [vmem:[%s1967_s0 + $0x208] sm:$0xff] }
  0x23   :  { %720 = vmatmul.bf16.vlgmr.msra.gmra.mxu2 %v143_v35  ;;  %671 = vmatmul.bf16.vlgmr.msra.gmra.mxu1 %v142_v36  ;;  %v157_v9 = vpack.c.bf16 %v80_v2, %v73_v0  ;;  %v108_v32 = vld [vmem:[%s1967_s0 + $0x2e8] sm:$0xff]  ;;  %v1209_v35 = vld [vmem:[%s1965_s1 + $0x130] sm:$0xff]  ;;  %v27_v0 = vld [vmem:[%s1967_s0 + $0x60] sm:$0xff] }
  0x24   :  { %905 = vmatpush.bf16.msrb.mxu2 %v1219_v37  ;;  %849 = vmatpush.bf16.msrb.mxu1 %v1218_v38  ;;  %v170_v38 = vpack.c.bf16 %v107_v34, %v100_v33 }
  0x26   :  { %654 = vmatpush.bf16.msrb.mxu0 %v1291_v5  ;;  %752 = vmatpush.bf16.msrb.mxu3 %v1201_v39  ;;  %v79_v5 = vld [vmem:[%s1967_s0 + $0x200] sm:$0xff]  ;;  %v1208_v39 = vld [vmem:[%s1965_s1 + $0x128] sm:$0xff] }
  0x28   :  { %850 = vmatpush.bf16.msrb.mxu1 %v1217_v40  ;;  %v1207_v40 = vld [vmem:[%s1965_s1 + $0x120] sm:$0xff] }
  0x2a   :  { %655 = vmatpush.bf16.msrb.mxu0 %v1306_v8  ;;  %753 = vmatpush.bf16.msrb.mxu3 %v1200_v41  ;;  %v128_v8 = vpack.c.bf16 %v23_v63, %v16_v62  ;;  %v1206_v41 = vld [vmem:[%s1965_s1 + $0x118] sm:$0xff]  ;;  %v28_v62 = vld [vmem:[%s1967_s0 + $0x68] sm:$0xff] }
  0x2b   :  { %v20_v63 = vld [vmem:[%s1967_s0 + $0x28] sm:$0xff] }
  0x2c   :  { %851 = vmatpush.bf16.msrb.mxu1 %v1216_v42  ;;  %v113_v42 = vld [vmem:[%s1967_s0 + $0x310] sm:$0xff] }
  0x2e   :  { %656 = vmatpush.bf16.msrb.mxu0 %v1321_v11  ;;  %754 = vmatpush.bf16.msrb.mxu3 %v1199_v43  ;;  %v156_v11 = vpack.c.bf16 %v79_v5, %v72_v3  ;;  %v120_v43 = vld [vmem:[%s1967_s0 + $0x348] sm:$0xff]  ;;  %v133_v5 = vpack.c.bf16 %v28_v62, %v21_v61 }
  0x2f   :  { %v176_v51 = vpack.c.bf16 %v120_v43, %v113_v42  ;;  %v68_v42 = vld [vmem:[%s1967_s0 + $0x1a8] sm:$0xff]  ;;  %v63_v43 = vld [vmem:[%s1967_s0 + $0x180] sm:$0xff] }
  0x30   :  { %852 = vmatpush.bf16.msrb.mxu1 %v1215_v52  ;;  %v136_v52 = vpack.c.bf16 %v38_v45, %v31_v44  ;;  %v70_v44 = vld [vmem:[%s1967_s0 + $0x1b8] sm:$0xff] }
  0x31   :  { %617 = vmatmul.bf16.gmra.mxu0 %v134_v53  ;;  %627 = vmatmul.bf16.gmra.mxu3 %v148_v54  ;;  %v178_v53 = vpack.c.bf16 %v122_v47, %v115_v46  ;;  %v177_v54 = vpack.c.bf16 %v121_v49, %v114_v48  ;;  %v62_v45 = vld [vmem:[%s1967_s0 + $0x178] sm:$0xff]  ;;  %v69_v46 = vld [vmem:[%s1967_s0 + $0x1b0] sm:$0xff] }
  0x32   :  { %657 = vmatpush.bf16.msrb.mxu0 %v1336_v14  ;;  %755 = vmatpush.bf16.msrb.mxu3 %v1198_v57  ;;  %v1196_v14 = vld [vmem:[%s1965_s1 + $0xc8] sm:$0xff]  ;;  %v18_v57 = vld [vmem:[%s1967_s0 + $0x18] sm:$0xff] }
  0x33   :  { %725 = vmatmul.bf16.gmra.mxu2 %v150_v55  ;;  %676 = vmatmul.bf16.gmra.mxu1 %v149_v56  ;;  %v1204_v55 = vld [vmem:[%s1965_s1 + $0x108] sm:$0xff]  ;;  %v1203_v56 = vld [vmem:[%s1965_s1 + $0x100] sm:$0xff] }
  0x34   :  { %853 = vmatpush.bf16.msrb.mxu1 %v1214_v58  ;;  %v25_v58 = vld [vmem:[%s1967_s0 + $0x50] sm:$0xff] }
  0x35   :  { %v130_v2 = vpack.c.bf16 %v25_v58, %v18_v57 }
  0x36   :  { %658 = vmatpush.bf16.msrb.mxu0 %v1351_v17  ;;  %756 = vmatpush.bf16.msrb.mxu3 %v1197_v59  ;;  %v30_v17 = vld [vmem:[%s1967_s0 + $0x78] sm:$0xff]  ;;  %v19_v59 = vld [vmem:[%s1967_s0 + $0x20] sm:$0xff] }
  0x37   :  { %v131_v3 = vpack.c.bf16 %v26_v60, %v19_v59 }
  0x38   :  { %854 = vmatpush.bf16.msrb.mxu1 %v1213_v12  ;;  %v40_v12 = vld [vmem:[%s1967_s0 + $0xc8] sm:$0xff] }
  0x3a   :  { %659 = vmatpush.bf16.msrb.mxu0 %v1366_v20  ;;  %757 = vmatpush.bf16.msrb.mxu3 %v1196_v14  ;;  %v86_v20 = vld [vmem:[%s1967_s0 + $0x238] sm:$0xff]  ;;  %v35_v14 = vld [vmem:[%s1967_s0 + $0xa0] sm:$0xff] }
  0x3b   :  { %v163_v26 = vpack.c.bf16 %v93_v21, %v86_v20  ;;  %v46_v21 = vld [vmem:[%s1967_s0 + $0xf8] sm:$0xff] }
  0x3e   :  { %660 = vmatpush.bf16.msrb.mxu0 %v1379_v23  ;;  %758 = vmatpush.bf16.msrb.mxu3 %v1195_v27  ;;  %v48_v27 = vld [vmem:[%s1967_s0 + $0x108] sm:$0xff] }
  0x41   :  { %632 = vmatmul.bf16.gmra.mxu3 %v155_v6  ;;  %661 = vmatmul.bf16.vlgmr.msrb.gmra.mxu0 %v128_v8  ;;  %v132_v6 = vpack.c.bf16 %v27_v0, %v20_v63  ;;  %v32_v8 = vld [vmem:[%s1967_s0 + $0x88] sm:$0xff] }
  0x42   :  { %702 = vmatpush.bf16.msra.mxu0 %v1271_v1  ;;  %v85_v1 = vld [vmem:[%s1967_s0 + $0x230] sm:$0xff] }
  0x43   :  { %730 = vmatmul.bf16.gmra.mxu2 %v157_v9  ;;  %681 = vmatmul.bf16.gmra.mxu1 %v156_v11  ;;  %v162_v23 = vpack.c.bf16 %v92_v15, %v85_v1  ;;  %v39_v9 = vld [vmem:[%s1967_s0 + $0xc0] sm:$0xff]  ;;  %v33_v11 = vld [vmem:[%s1967_s0 + $0x90] sm:$0xff]  ;;  %v42_v1 = vld [vmem:[%s1967_s0 + $0xd8] sm:$0xff] }
  0x44   :  { %v34_v15 = vld [vmem:[%s1967_s0 + $0x98] sm:$0xff] }
  0x46   :  { %703 = vmatpush.bf16.msra.mxu0 %v1286_v4  ;;  %v37_v4 = vld [vmem:[%s1967_s0 + $0xb0] sm:$0xff] }
  0x47   :  { %v135_v24 = vpack.c.bf16 %v37_v4, %v30_v17  ;;  %v41_v17 = vld [vmem:[%s1967_s0 + $0xd0] sm:$0xff]  ;;  %v137_v4 = vpack.c.bf16 %v39_v9, %v32_v8  ;;  %v84_v9 = vld [vmem:[%s1967_s0 + $0x228] sm:$0xff] }
  0x48   :  { %v139_v20 = vpack.c.bf16 %v41_v17, %v34_v15  ;;  %v77_v8 = vld [vmem:[%s1967_s0 + $0x1f0] sm:$0xff] }
  0x4a   :  { %704 = vmatpush.bf16.msra.mxu0 %v1301_v7  ;;  %v87_v7 = vld [vmem:[%s1967_s0 + $0x240] sm:$0xff] }
  0x4b   :  { %v164_v25 = vpack.c.bf16 %v94_v18, %v87_v7  ;;  %v138_v7 = vpack.c.bf16 %v40_v12, %v33_v11  ;;  %v140_v18 = vpack.c.bf16 %v42_v1, %v35_v14  ;;  %v76_v11 = vld [vmem:[%s1967_s0 + $0x1e8] sm:$0xff]  ;;  %v83_v12 = vld [vmem:[%s1967_s0 + $0x220] sm:$0xff] }
  0x4e   :  { %705 = vmatpush.bf16.msra.mxu0 %v1316_v10  ;;  %v1212_v10 = vld [vmem:[%s1965_s1 + $0x148] sm:$0xff] }
  0x4f   :  { %855 = vmatpush.bf16.msrb.mxu1 %v1212_v10  ;;  %v56_v10 = vld [vmem:[%s1967_s0 + $0x148] sm:$0xff] }
  0x51   :  { %637 = vmatmul.bf16.gmra.mxu3 %v162_v23  ;;  %666 = vmatmul.bf16.gmra.mxu0 %v135_v24  ;;  %v53_v23 = vld [vmem:[%s1967_s0 + $0x130] sm:$0xff]  ;;  %v47_v24 = vld [vmem:[%s1967_s0 + $0x100] sm:$0xff] }
  0x52   :  { %706 = vmatpush.bf16.msra.mxu0 %v1331_v13  ;;  %v1210_v13 = vld [vmem:[%s1965_s1 + $0x138] sm:$0xff] }
  0x53   :  { %735 = vmatmul.bf16.gmra.mxu2 %v164_v25  ;;  %686 = vmatmul.bf16.gmra.mxu1 %v163_v26  ;;  %v54_v25 = vld [vmem:[%s1967_s0 + $0x138] sm:$0xff]  ;;  %v49_v26 = vld [vmem:[%s1967_s0 + $0x110] sm:$0xff] }
  0x54   :  { %856 = vmatpush.bf16.msrb.mxu1 %v1211_v28  ;;  %v144_v28 = vpack.c.bf16 %v53_v23, %v46_v21 }
  0x56   :  { %707 = vmatpush.bf16.msra.mxu0 %v1346_v16  ;;  %v106_v16 = vld [vmem:[%s1967_s0 + $0x2d8] sm:$0xff] }
  0x57   :  { %v169_v36 = vpack.c.bf16 %v106_v16, %v99_v29  ;;  %v145_v29 = vpack.c.bf16 %v54_v25, %v47_v24 }
  0x5a   :  { %708 = vmatpush.bf16.msra.mxu0 %v1361_v19  ;;  %v17_v19 = vld [vmem:[%s1967_s0 + $0x10] sm:$0xff] }
  0x5b   :  { %v129_v37 = vpack.c.bf16 %v24_v30, %v17_v19  ;;  %v147_v19 = vpack.c.bf16 %v56_v10, %v49_v26 }
  0x5e   :  { %709 = vmatpush.bf16.msra.mxu0 %v1374_v22  ;;  %v171_v22 = vpack.c.bf16 %v108_v32, %v101_v31  ;;  %v1699_v32 = vld [vmem:[%s1966_s2] ss:$0 sm:$0xff] }
  0x61   :  { %642 = vmatmul.bf16.gmra.mxu3 %v169_v36  ;;  %710 = vmatmul.bf16.vlgmr.msra.gmra.mxu0 %v129_v37 }
  0x62   :  { %800 = vmatpush.bf16.msrb.mxu0 %v1210_v13  ;;  %v55_v13 = vld [vmem:[%s1967_s0 + $0x140] sm:$0xff] }
  0x63   :  { %740 = vmatmul.bf16.gmra.mxu2 %v171_v22  ;;  %691 = vmatmul.bf16.gmra.mxu1 %v170_v38  ;;  %v146_v30 = vpack.c.bf16 %v55_v13, %v48_v27 }
  0x66   :  { %801 = vmatpush.bf16.msrb.mxu0 %v1209_v35 }
  0x6a   :  { %802 = vmatpush.bf16.msrb.mxu0 %v1208_v39  ;;  %v60_v39 = vld [vmem:[%s1967_s0 + $0x168] sm:$0xff] }
  0x6e   :  { %803 = vmatpush.bf16.msrb.mxu0 %v1207_v40  ;;  %v67_v40 = vld [vmem:[%s1967_s0 + $0x1a0] sm:$0xff] }
  0x71   :  { %647 = vmatmul.bf16.gmra.mxu3 %v176_v51  ;;  %715 = vmatmul.bf16.gmra.mxu0 %v136_v52 }
  0x72   :  { %804 = vmatpush.bf16.msrb.mxu0 %v1206_v41  ;;  %v61_v41 = vld [vmem:[%s1967_s0 + $0x170] sm:$0xff] }
  0x73   :  { %745 = vmatmul.bf16.gmra.mxu2 %v178_v53  ;;  %696 = vmatmul.bf16.gmra.mxu1 %v177_v54  ;;  %v152_v51 = vpack.c.bf16 %v68_v42, %v61_v41  ;;  %v154_v53 = vpack.c.bf16 %v70_v44, %v63_v43  ;;  %v153_v54 = vpack.c.bf16 %v69_v46, %v62_v45 }
  0x76   :  { %805 = vmatpush.bf16.msrb.mxu0 %v1205_v50  ;;  %v151_v50 = vpack.c.bf16 %v67_v40, %v60_v39 }
  0x7a   :  { %806 = vmatpush.bf16.msrb.mxu0 %v1204_v55 }
  0x7e   :  { %807 = vmatpush.bf16.msrb.mxu0 %v1203_v56 }
  0x81   :  { %759 = vmatmul.bf16.vlgmr.msrb.gmra.mxu3 %v130_v2  ;;  %808 = vmatmul.bf16.vlgmr.msrb.gmra.mxu0 %v131_v3  ;;  %v74_v2 = vld [vmem:[%s1967_s0 + $0x1d8] sm:$0xff]  ;;  %v81_v3 = vld [vmem:[%s1967_s0 + $0x210] sm:$0xff] }
  0x82   :  { %v158_v17 = vpack.c.bf16 %v81_v3, %v74_v2  ;;  %v105_v2 = vld [vmem:[%s1967_s0 + $0x2d0] sm:$0xff]  ;;  %v112_v3 = vld [vmem:[%s1967_s0 + $0x308] sm:$0xff] }
  0x83   :  { %1163 = vmatmul.msk.bf16.vlgmr.msrb.gmra.mxu2 %vm579_vm0, %v133_v5  ;;  %857 = vmatmul.bf16.vlgmr.msrb.gmra.mxu1 %v132_v6  ;;  %v75_v5 = vld [vmem:[%s1967_s0 + $0x1e0] sm:$0xff]  ;;  %v82_v6 = vld [vmem:[%s1967_s0 + $0x218] sm:$0xff] }
  0x91   :  { %764 = vmatmul.bf16.gmra.mxu3 %v137_v4  ;;  %813 = vmatmul.bf16.gmra.mxu0 %v138_v7  ;;  %v159_v4 = vpack.c.bf16 %v82_v6, %v75_v5  ;;  %v104_v5 = vld [vmem:[%s1967_s0 + $0x2c8] sm:$0xff]  ;;  %v111_v6 = vld [vmem:[%s1967_s0 + $0x300] sm:$0xff] }
  0x93   :  { %1164 = vmatmul.msk.bf16.gmra.mxu2 %vm579_vm0, %v140_v18  ;;  %862 = vmatmul.bf16.gmra.mxu1 %v139_v20  ;;  %v161_v18 = vpack.c.bf16 %v84_v9, %v77_v8  ;;  %v160_v20 = vpack.c.bf16 %v83_v12, %v76_v11 }
  0x9e   :  { %v1694_v16 = vpop.f32.mrf.mxu0 }
  0xa0   :  { %v672_v31 = vpop.f32.mrf.mxu1 }
  0xa1   :  { %769 = vmatmul.bf16.gmra.mxu3 %v144_v28  ;;  %818 = vmatmul.bf16.gmra.mxu0 %v145_v29 }
  0xa3   :  { %1165 = vmatmul.msk.bf16.gmra.mxu2 %vm579_vm0, %v147_v19  ;;  %867 = vmatmul.bf16.gmra.mxu1 %v146_v30  ;;  %v88_v19 = vld [vmem:[%s1967_s0 + $0x248] sm:$0xff]  ;;  %v95_v30 = vld [vmem:[%s1967_s0 + $0x280] sm:$0xff] }
  0xa4   :  { %v623_v33 = vpop.f32.mrf.mxu3  ;;  %v165_v42 = vpack.c.bf16 %v95_v30, %v88_v19  ;;  %v116_v19 = vld [vmem:[%s1967_s0 + $0x328] sm:$0xff]  ;;  %v123_v30 = vld [vmem:[%s1967_s0 + $0x360] sm:$0xff] }
  0xa5   :  { %v624_v34 = vadd.f32 %v1699_v32, %v623_v33  ;;  %v96_v33 = vld [vmem:[%s1967_s0 + $0x288] sm:$0xff] }
  0xa6   :  { %v721_v35 = vpop.f32.mrf.mxu2  ;;  %v1703_v36 = vpop.f32.mrf.mxu0 }
  0xa7   :  { %v673_v37 = vadd.f32 %v672_v31, %v624_v34  ;;  %v89_v31 = vld [vmem:[%s1967_s0 + $0x250] sm:$0xff]  ;;  %v91_v34 = vld [vmem:[%s1967_s0 + $0x260] sm:$0xff] }
  0xa8   :  { %v674_v22 = vpop.f32.mrf.mxu1  ;;  %v166_v43 = vpack.c.bf16 %v96_v33, %v89_v31  ;;  %v117_v31 = vld [vmem:[%s1967_s0 + $0x330] sm:$0xff]  ;;  %v124_v33 = vld [vmem:[%s1967_s0 + $0x368] sm:$0xff] }
  0xa9   :  { %v1705_v38 = vadd.f32 %v721_v35, %v673_v37  ;;  %v98_v35 = vld [vmem:[%s1967_s0 + $0x298] sm:$0xff] }
  0xaa   :  { %v90_v37 = vld [vmem:[%s1967_s0 + $0x258] sm:$0xff]  ;;  %v168_v45 = vpack.c.bf16 %v98_v35, %v91_v34  ;;  %v119_v34 = vld [vmem:[%s1967_s0 + $0x340] sm:$0xff] }
  0xab   :  { %v126_v35 = vld [vmem:[%s1967_s0 + $0x378] sm:$0xff] }
  0xac   :  { %v625_v47 = vpop.f32.mrf.mxu3 }
  0xad   :  { %v626_v48 = vadd.f32 %v1699_v32, %v625_v47 }
  0xae   :  { %v723_v49 = vpop.f32.mrf.mxu2  ;;  %v1732_v52 = vpop.f32.mrf.mxu0 }
  0xaf   :  { %v675_v55 = vadd.f32 %v674_v22, %v626_v48  ;;  %v97_v22 = vld [vmem:[%s1967_s0 + $0x290] sm:$0xff] }
  0xb0   :  { %v677_v56 = vpop.f32.mrf.mxu1  ;;  %v167_v46 = vpack.c.bf16 %v97_v22, %v90_v37  ;;  %v118_v37 = vld [vmem:[%s1967_s0 + $0x338] sm:$0xff]  ;;  %v125_v22 = vld [vmem:[%s1967_s0 + $0x370] sm:$0xff] }
  0xb1   :  { %v1734_v57 = vadd.f32 %v723_v49, %v675_v55  ;;  %774 = vmatmul.bf16.gmra.mxu3 %v151_v50  ;;  %823 = vmatmul.bf16.gmra.mxu0 %v152_v51 }
  0xb3   :  { %1166 = vmatmul.msk.bf16.gmra.mxu2 %vm579_vm0, %v154_v53  ;;  %872 = vmatmul.bf16.gmra.mxu1 %v153_v54 }
  0xb4   :  { %v628_v58 = vpop.f32.mrf.mxu3 }
  0xb5   :  { %v629_v59 = vadd.f32 %v1699_v32, %v628_v58 }
  0xb6   :  { %v726_v60 = vpop.f32.mrf.mxu2  ;;  %v1738_v61 = vpop.f32.mrf.mxu0 }
  0xb7   :  { %v678_v62 = vadd.f32 %v677_v56, %v629_v59  ;;  %v102_v59 = vld [vmem:[%s1967_s0 + $0x2b8] sm:$0xff] }
  0xb8   :  { %v679_v63 = vpop.f32.mrf.mxu1 }
  0xb9   :  { %v1740_v0 = vadd.f32 %v726_v60, %v678_v62  ;;  %v109_v60 = vld [vmem:[%s1967_s0 + $0x2f0] sm:$0xff]  ;;  %v103_v62 = vld [vmem:[%s1967_s0 + $0x2c0] sm:$0xff] }
  0xba   :  { %v172_v12 = vpack.c.bf16 %v109_v60, %v102_v59 }
  0xbc   :  { %v630_v14 = vpop.f32.mrf.mxu3 }
  0xbd   :  { %v631_v1 = vadd.f32 %v1699_v32, %v630_v14 }
  0xbe   :  { %v728_v15 = vpop.f32.mrf.mxu2  ;;  %v1767_v7 = vpop.f32.mrf.mxu0 }
  0xbf   :  { %v680_v21 = vadd.f32 %v679_v63, %v631_v1  ;;  %v110_v63 = vld [vmem:[%s1967_s0 + $0x2f8] sm:$0xff] }
  0xc0   :  { %v682_v23 = vpop.f32.mrf.mxu1  ;;  %v173_v14 = vpack.c.bf16 %v110_v63, %v103_v62 }
  0xc1   :  { %v1769_v24 = vadd.f32 %v728_v15, %v680_v21  ;;  %779 = vmatmul.bf16.gmra.mxu3 %v158_v17  ;;  %828 = vmatmul.bf16.gmra.mxu0 %v159_v4  ;;  %v175_v15 = vpack.c.bf16 %v112_v3, %v105_v2  ;;  %v174_v17 = vpack.c.bf16 %v111_v6, %v104_v5 }
  0xc3   :  { %1167 = vmatmul.msk.bf16.gmra.mxu2 %vm579_vm0, %v161_v18  ;;  %877 = vmatmul.bf16.gmra.mxu1 %v160_v20 }
  0xc4   :  { %v633_v25 = vpop.f32.mrf.mxu3 }
  0xc5   :  { %v634_v26 = vadd.f32 %v1699_v32, %v633_v25 }
  0xc6   :  { %v731_v10 = vpop.f32.mrf.mxu2  ;;  %v1773_v27 = vpop.f32.mrf.mxu0 }
  0xc7   :  { %v683_v13 = vadd.f32 %v682_v23, %v634_v26 }
  0xc8   :  { %v684_v28 = vpop.f32.mrf.mxu1 }
  0xc9   :  { %v1775_v29 = vadd.f32 %v731_v10, %v683_v13 }
  0xcc   :  { %v635_v39 = vpop.f32.mrf.mxu3 }
  0xcd   :  { %v636_v40 = vadd.f32 %v1699_v32, %v635_v39 }
  0xce   :  { %v733_v41 = vpop.f32.mrf.mxu2  ;;  %v1802_v44 = vpop.f32.mrf.mxu0 }
  0xcf   :  { %v685_v47 = vadd.f32 %v684_v28, %v636_v40 }
  0xd0   :  { %v687_v48 = vpop.f32.mrf.mxu1 }
  0xd1   :  { %v1804_v49 = vadd.f32 %v733_v41, %v685_v47  ;;  %784 = vmatmul.bf16.gmra.mxu3 %v165_v42  ;;  %833 = vmatmul.bf16.gmra.mxu0 %v166_v43  ;;  %v179_v42 = vpack.c.bf16 %v123_v30, %v116_v19  ;;  %v180_v43 = vpack.c.bf16 %v124_v33, %v117_v31 }
  0xd2   :  { %v181_v47 = vpack.c.bf16 %v125_v22, %v118_v37 }
  0xd3   :  { %1168 = vmatmul.msk.bf16.gmra.mxu2 %vm579_vm0, %v168_v45  ;;  %882 = vmatmul.bf16.gmra.mxu1 %v167_v46  ;;  %v182_v46 = vpack.c.bf16 %v126_v35, %v119_v34  ;;  %v619_v34 = vadd.f32 %v1699_v32, %v1732_v52 }
  0xd4   :  { %v638_v50 = vpop.f32.mrf.mxu3 }
  0xd5   :  { %v639_v51 = vadd.f32 %v1699_v32, %v638_v50  ;;  %v668_v37 = vadd.f32 %v1802_v44, %v619_v34 }
  0xd6   :  { %v736_v53 = vpop.f32.mrf.mxu2  ;;  %v1808_v54 = vpop.f32.mrf.mxu0 }
  0xd7   :  { %v688_v55 = vadd.f32 %v687_v48, %v639_v51 }
  0xd8   :  { %v689_v56 = vpop.f32.mrf.mxu1 }
  0xd9   :  { %v1810_v58 = vadd.f32 %v736_v53, %v688_v55 }
  0xdc   :  { %v640_v8 = vpop.f32.mrf.mxu3 }
  0xdd   :  { %v641_v9 = vadd.f32 %v1699_v32, %v640_v8  ;;  %v614_v8 = vadd.f32 %v1699_v32, %v1694_v16 }
  0xde   :  { %v738_v11 = vpop.f32.mrf.mxu2  ;;  %v711_v1 = vpop.f32.mrf.mxu0 }
  0xdf   :  { %v690_v4 = vadd.f32 %v689_v56, %v641_v9 }
  0xe0   :  { %v692_v18 = vpop.f32.mrf.mxu1 }
  0xe1   :  { %v1837_v20 = vadd.f32 %v738_v11, %v690_v4  ;;  %789 = vmatmul.bf16.gmra.mxu3 %v172_v12  ;;  %838 = vmatmul.bf16.gmra.mxu0 %v173_v14  ;;  %v663_v12 = vadd.f32 %v1767_v7, %v614_v8 }
  0xe3   :  { %1169 = vmatmul.msk.bf16.gmra.mxu2 %vm579_vm0, %v175_v15  ;;  %887 = vmatmul.bf16.gmra.mxu1 %v174_v17  ;;  %v712_v15 = vadd.f32 %v711_v1, %v663_v12 }
  0xe4   :  { %v643_v21 = vpop.f32.mrf.mxu3 }
  0xe5   :  { %v644_v23 = vadd.f32 %v1699_v32, %v643_v21 }
  0xe6   :  { %v741_v25 = vpop.f32.mrf.mxu2  ;;  %v713_v26 = vpop.f32.mrf.mxu0 }
  0xe7   :  { %v693_v10 = vadd.f32 %v692_v18, %v644_v23  ;;  %v616_v23 = vadd.f32 %v1699_v32, %v1703_v36 }
  0xe8   :  { %v694_v13 = vpop.f32.mrf.mxu1 }
  0xe9   :  { %v1841_v28 = vadd.f32 %v741_v25, %v693_v10 }
  0xec   :  { %v645_v39 = vpop.f32.mrf.mxu3 }
  0xed   :  { %v646_v40 = vadd.f32 %v1699_v32, %v645_v39 }
  0xee   :  { %v743_v41 = vpop.f32.mrf.mxu2  ;;  %v716_v45 = vpop.f32.mrf.mxu0 }
  0xef   :  { %v695_v48 = vadd.f32 %v694_v13, %v646_v40  ;;  %v665_v13 = vadd.f32 %v1773_v27, %v616_v23  ;;  %v717_v22 = vadd.f32 %v716_v45, %v668_v37 }
  0xf0   :  { %v697_v50 = vpop.f32.mrf.mxu1 }
  0xf1   :  { %v1868_v51 = vadd.f32 %v743_v41, %v695_v48  ;;  %794 = vmatmul.bf16.gmra.mxu3 %v179_v42  ;;  %843 = vmatmul.bf16.gmra.mxu0 %v180_v43  ;;  %v714_v16 = vadd.f32 %v713_v26, %v665_v13  ;;  %v621_v43 = vadd.f32 %v1699_v32, %v1738_v61 }
  0xf3   :  { %1170 = vmatmul.msk.bf16.gmra.mxu2 %vm579_vm0, %v182_v46  ;;  %892 = vmatmul.bf16.gmra.mxu1 %v181_v47  ;;  %v670_v47 = vadd.f32 %v1808_v54, %v621_v43 }
  0xf4   :  { %v648_v53 = vpop.f32.mrf.mxu3 }
  0xf5   :  { %v649_v55 = vadd.f32 %v1699_v32, %v648_v53 }
  0xf6   :  { %v746_v56 = vpop.f32.mrf.mxu2  ;;  %v718_v59 = vpop.f32.mrf.mxu0 }
  0xf7   :  { %v698_v60 = vadd.f32 %v697_v50, %v649_v55  ;;  %v719_v48 = vadd.f32 %v718_v59, %v670_v47 }
  0xf8   :  { %v699_v62 = vpop.f32.mrf.mxu1 }
  0xf9   :  { %v1872_v63 = vadd.f32 %v746_v56, %v698_v60 }
  0xfc   :  { %v650_v2 = vpop.f32.mrf.mxu3 }
  0xfd   :  { %v651_v3 = vadd.f32 %v1699_v32, %v650_v2 }
  0xfe   :  { %v748_v5 = vpop.f32.mrf.mxu2  ;;  %v809_v6 = vpop.f32.mrf.mxu0 }
  0xff   :  { %v700_v9 = vadd.f32 %v699_v62, %v651_v3 }
 0x100   :  { %v858_v11 = vpop.f32.mrf.mxu1 }
 0x101   :  { %v1878_v14 = vadd.f32 %v748_v5, %v700_v9 }
 0x104   :  { %v760_v17 = vpop.f32.mrf.mxu3 }
 0x105   :  { %v761_v4 = vadd.f32 %v760_v17, %v712_v15 }
 0x106   :  { %v907_v18 = vpop.f32.mrf.mxu2  ;;  %v811_v21 = vpop.f32.mrf.mxu0 }
 0x107   :  { %v810_v25 = vadd.f32 %v809_v6, %v761_v4 }
 0x108   :  { %v860_v10 = vpop.f32.mrf.mxu1 }
 0x109   :  { %v859_v19 = vadd.f32 %v858_v11, %v810_v25 }
 0x10b   :  { %v908_v30 = vadd.f32 %v907_v18, %v859_v19 }
 0x10c   :  { %v762_v31 = vpop.f32.mrf.mxu3 }
 0x10d   :  { %947 = vst.msk [vmem:[%s1968_s3] sm:$0xff] %vm579_vm0, %v908_v30  ;;  %v763_v7 = vadd.f32 %v762_v31, %v714_v16 }
 0x10e   :  { %v909_v1 = vpop.f32.mrf.mxu2  ;;  %v814_v33 = vpop.f32.mrf.mxu0 }
 0x10f   :  { %v812_v36 = vadd.f32 %v811_v21, %v763_v7 }
 0x110   :  { %v863_v35 = vpop.f32.mrf.mxu1 }
 0x111   :  { %v861_v27 = vadd.f32 %v860_v10, %v812_v36 }
 0x113   :  { %v910_v26 = vadd.f32 %v909_v1, %v861_v27 }
 0x114   :  { %v765_v39 = vpop.f32.mrf.mxu3 }
 0x115   :  { %948 = vst.msk [vmem:[%s1968_s3 + $0x8] sm:$0xff] %vm579_vm0, %v910_v26  ;;  %v766_v40 = vadd.f32 %v765_v39, %v717_v22 }
 0x116   :  { %v912_v41 = vpop.f32.mrf.mxu2  ;;  %v816_v42 = vpop.f32.mrf.mxu0 }
 0x117   :  { %v815_v52 = vadd.f32 %v814_v33, %v766_v40 }
 0x118   :  { %v865_v46 = vpop.f32.mrf.mxu1 }
 0x119   :  { %v864_v44 = vadd.f32 %v863_v35, %v815_v52 }
 0x11b   :  { %v913_v45 = vadd.f32 %v912_v41, %v864_v44 }
 0x11c   :  { %v767_v50 = vpop.f32.mrf.mxu3 }
 0x11d   :  { %949 = vst.msk [vmem:[%s1968_s3 + $0x10] sm:$0xff] %vm579_vm0, %v913_v45  ;;  %v768_v53 = vadd.f32 %v767_v50, %v719_v48 }
 0x11e   :  { %v914_v55 = vpop.f32.mrf.mxu2  ;;  %v819_v56 = vpop.f32.mrf.mxu0 }
 0x11f   :  { %v817_v60 = vadd.f32 %v816_v42, %v768_v53 }
 0x120   :  { %v868_v62 = vpop.f32.mrf.mxu1 }
 0x121   :  { %v866_v2 = vadd.f32 %v865_v46, %v817_v60 }
 0x123   :  { %v915_v32 = vadd.f32 %v914_v55, %v866_v2 }
 0x124   :  { %v770_v61 = vpop.f32.mrf.mxu3 }
 0x125   :  { %950 = vst.msk [vmem:[%s1968_s3 + $0x18] sm:$0xff] %vm579_vm0, %v915_v32  ;;  %v771_v54 = vadd.f32 %v770_v61, %v1705_v38 }
 0x126   :  { %v917_v59 = vpop.f32.mrf.mxu2  ;;  %v821_v3 = vpop.f32.mrf.mxu0 }
 0x127   :  { %v820_v5 = vadd.f32 %v819_v56, %v771_v54 }
 0x128   :  { %v870_v6 = vpop.f32.mrf.mxu1 }
 0x129   :  { %v869_v8 = vadd.f32 %v868_v62, %v820_v5 }
 0x12b   :  { %v918_v9 = vadd.f32 %v917_v59, %v869_v8 }
 0x12c   :  { %v772_v11 = vpop.f32.mrf.mxu3 }
 0x12d   :  { %951 = vst.msk [vmem:[%s1968_s3 + $0x20] sm:$0xff] %vm579_vm0, %v918_v9  ;;  %v773_v12 = vadd.f32 %v772_v11, %v1734_v57 }
 0x12e   :  { %v919_v15 = vpop.f32.mrf.mxu2  ;;  %v824_v17 = vpop.f32.mrf.mxu0 }
 0x12f   :  { %v822_v4 = vadd.f32 %v821_v3, %v773_v12 }
 0x130   :  { %v873_v18 = vpop.f32.mrf.mxu1 }
 0x131   :  { %v871_v21 = vadd.f32 %v870_v6, %v822_v4 }
 0x133   :  { %v920_v38 = vadd.f32 %v919_v15, %v871_v21 }
 0x134   :  { %v775_v23 = vpop.f32.mrf.mxu3 }
 0x135   :  { %952 = vst.msk [vmem:[%s1968_s3 + $0x28] sm:$0xff] %vm579_vm0, %v920_v38  ;;  %v776_v25 = vadd.f32 %v775_v23, %v1740_v0 }
 0x136   :  { %v922_v10 = vpop.f32.mrf.mxu2  ;;  %v826_v13 = vpop.f32.mrf.mxu0 }
 0x137   :  { %v825_v19 = vadd.f32 %v824_v17, %v776_v25 }
 0x138   :  { %v875_v16 = vpop.f32.mrf.mxu1 }
 0x139   :  { %v874_v30 = vadd.f32 %v873_v18, %v825_v19 }
 0x13b   :  { %v923_v57 = vadd.f32 %v922_v10, %v874_v30 }
 0x13c   :  { %v777_v31 = vpop.f32.mrf.mxu3 }
 0x13d   :  { %953 = vst.msk [vmem:[%s1968_s3 + $0x30] sm:$0xff] %vm579_vm0, %v923_v57  ;;  %v778_v7 = vadd.f32 %v777_v31, %v1769_v24 }
 0x13e   :  { %v924_v1 = vpop.f32.mrf.mxu2  ;;  %v829_v33 = vpop.f32.mrf.mxu0 }
 0x13f   :  { %v827_v34 = vadd.f32 %v826_v13, %v778_v7 }
 0x140   :  { %v878_v36 = vpop.f32.mrf.mxu1 }
 0x141   :  { %v876_v35 = vadd.f32 %v875_v16, %v827_v34 }
 0x143   :  { %v925_v0 = vadd.f32 %v924_v1, %v876_v35 }
 0x144   :  { %v780_v37 = vpop.f32.mrf.mxu3 }
 0x145   :  { %954 = vst.msk [vmem:[%s1968_s3 + $0x38] sm:$0xff] %vm579_vm0, %v925_v0  ;;  %v781_v27 = vadd.f32 %v780_v37, %v1775_v29 }
 0x146   :  { %v927_v22 = vpop.f32.mrf.mxu2  ;;  %v831_v26 = vpop.f32.mrf.mxu0 }
 0x147   :  { %v830_v39 = vadd.f32 %v829_v33, %v781_v27 }
 0x148   :  { %v880_v40 = vpop.f32.mrf.mxu1 }
 0x149   :  { %v879_v41 = vadd.f32 %v878_v36, %v830_v39 }
 0x14b   :  { %v928_v24 = vadd.f32 %v927_v22, %v879_v41 }
 0x14c   :  { %v782_v42 = vpop.f32.mrf.mxu3 }
 0x14d   :  { %955 = vst.msk [vmem:[%s1968_s3 + $0x40] sm:$0xff] %vm579_vm0, %v928_v24  ;;  %v783_v43 = vadd.f32 %v782_v42, %v1804_v49 }
 0x14e   :  { %v929_v52 = vpop.f32.mrf.mxu2  ;;  %v834_v46 = vpop.f32.mrf.mxu0 }
 0x14f   :  { %v832_v47 = vadd.f32 %v831_v26, %v783_v43 }
 0x150   :  { %v883_v44 = vpop.f32.mrf.mxu1 }
 0x151   :  { %v881_v48 = vadd.f32 %v880_v40, %v832_v47 }
 0x153   :  { %v930_v29 = vadd.f32 %v929_v52, %v881_v48 }
 0x154   :  { %v785_v45 = vpop.f32.mrf.mxu3 }
 0x155   :  { %956 = vst.msk [vmem:[%s1968_s3 + $0x48] sm:$0xff] %vm579_vm0, %v930_v29  ;;  %v786_v50 = vadd.f32 %v785_v45, %v1810_v58 }
 0x156   :  { %v932_v53 = vpop.f32.mrf.mxu2  ;;  %v836_v55 = vpop.f32.mrf.mxu0 }
 0x157   :  { %v835_v56 = vadd.f32 %v834_v46, %v786_v50 }
 0x158   :  { %v885_v60 = vpop.f32.mrf.mxu1 }
 0x159   :  { %v884_v62 = vadd.f32 %v883_v44, %v835_v56 }
 0x15b   :  { %v933_v49 = vadd.f32 %v932_v53, %v884_v62 }
 0x15c   :  { %v787_v2 = vpop.f32.mrf.mxu3 }
 0x15d   :  { %957 = vst.msk [vmem:[%s1968_s3 + $0x50] sm:$0xff] %vm579_vm0, %v933_v49  ;;  %v788_v32 = vadd.f32 %v787_v2, %v1837_v20 }
 0x15e   :  { %v934_v61 = vpop.f32.mrf.mxu2  ;;  %v839_v59 = vpop.f32.mrf.mxu0 }
 0x15f   :  { %v837_v54 = vadd.f32 %v836_v55, %v788_v32 }
 0x160   :  { %v888_v5 = vpop.f32.mrf.mxu1 }
 0x161   :  { %v886_v3 = vadd.f32 %v885_v60, %v837_v54 }
 0x163   :  { %v935_v58 = vadd.f32 %v934_v61, %v886_v3 }
 0x164   :  { %v790_v6 = vpop.f32.mrf.mxu3 }
 0x165   :  { %958 = vst.msk [vmem:[%s1968_s3 + $0x58] sm:$0xff] %vm579_vm0, %v935_v58  ;;  %v791_v8 = vadd.f32 %v790_v6, %v1841_v28 }
 0x166   :  { %v937_v9 = vpop.f32.mrf.mxu2  ;;  %v841_v15 = vpop.f32.mrf.mxu0 }
 0x167   :  { %v840_v11 = vadd.f32 %v839_v59, %v791_v8 }
 0x168   :  { %v890_v20 = vpop.f32.mrf.mxu1 }
 0x169   :  { %v889_v12 = vadd.f32 %v888_v5, %v840_v11 }
 0x16b   :  { %v938_v17 = vadd.f32 %v937_v9, %v889_v12 }
 0x16c   :  { %v792_v4 = vpop.f32.mrf.mxu3 }
 0x16d   :  { %959 = vst.msk [vmem:[%s1968_s3 + $0x60] sm:$0xff] %vm579_vm0, %v938_v17  ;;  %v793_v18 = vadd.f32 %v792_v4, %v1868_v51 }
 0x16e   :  { %v939_v21 = vpop.f32.mrf.mxu2  ;;  %v844_v10 = vpop.f32.mrf.mxu0 }
 0x16f   :  { %v842_v38 = vadd.f32 %v841_v15, %v793_v18 }
 0x170   :  { %v893_v19 = vpop.f32.mrf.mxu1 }
 0x171   :  { %v891_v23 = vadd.f32 %v890_v20, %v842_v38 }
 0x173   :  { %v940_v25 = vadd.f32 %v939_v21, %v891_v23 }
 0x174   :  { %v795_v28 = vpop.f32.mrf.mxu3 }
 0x175   :  { %960 = vst.msk [vmem:[%s1968_s3 + $0x68] sm:$0xff] %vm579_vm0, %v940_v25  ;;  %v796_v13 = vadd.f32 %v795_v28, %v1872_v63 }
 0x176   :  { %v942_v30 = vpop.f32.mrf.mxu2  ;;  %v846_v1 = vpop.f32.mrf.mxu0 }
 0x177   :  { %v845_v16 = vadd.f32 %v844_v10, %v796_v13 }
 0x178   :  { %v895_v34 = vpop.f32.mrf.mxu1 }
 0x179   :  { %v894_v57 = vadd.f32 %v893_v19, %v845_v16 }
 0x17b   :  { %v943_v31 = vadd.f32 %v942_v30, %v894_v57 }
 0x17c   :  { %v797_v7 = vpop.f32.mrf.mxu3 }
 0x17d   :  { %961 = vst.msk [vmem:[%s1968_s3 + $0x70] sm:$0xff] %vm579_vm0, %v943_v31  ;;  %v798_v51 = vadd.f32 %v797_v7, %v1878_v14 }
 0x17e   :  { %v944_v35 = vpop.f32.mrf.mxu2 }
 0x17f   :  { %v847_v33 = vadd.f32 %v846_v1, %v798_v51 }
 0x181   :  { %v896_v36 = vadd.f32 %v895_v34, %v847_v33 }
 0x183   :  { %v945_v0 = vadd.f32 %v944_v35, %v896_v36 }
 0x185   :  { %962 = vst.msk [vmem:[%s1968_s3 + $0x78] sm:$0xff] %vm579_vm0, %v945_v0 }

// kernel: cell_stem0_forward.20
= control target key start
LH: loop header
LB: loop body
LE: loop exit
PB: predicated region body
PF: predicated region fallthrough
CT: control target
= control target key end

     0   :  { %vm213_vm0 = vcmask 1041408   ;;  %vm116_vm1 = vcmask 31744   ;;  %vm386_vm2 = vcmask 64512   ;;  %s1063_s1 = inlined_call_operand.vmem [shape: bf16[4,8], index: 1, kind: input, shape index: {}]   ;;  %s1064_s0 = inlined_call_operand.vmem [shape: f32[512,4], index: 0, kind: input, shape index: {}]   ;;  %s1065_s2 = inlined_call_operand.vmem [shape: f32[1,8], index: 2, kind: input, shape index: {}]   ;;  %s1066_s3 = inlined_call_operand.vmem [shape: f32[512,8], index: 3, kind: output, shape index: {}]  }
   0x1   :  { %v111_v0 = vld [vmem:[%s1063_s1] sm:$0x3]  ;;  %v16_v2 = vld [vmem:[%s1064_s0 + $0x8] sm:$0xff]  ;;  %v17_v14 = vld [vmem:[%s1064_s0 + $0x10] sm:$0xff] }
   0x2   :  { %v15_v1 = vld [vmem:[%s1064_s0] sm:$0xff]  ;;  %v215_v3 = vsel %vm213_vm0, %v111_v0, 0  ;;  %v32_v6 = vld [vmem:[%s1064_s0 + $0x88] sm:$0xff]  ;;  %v18_v15 = vld [vmem:[%s1064_s0 + $0x18] sm:$0xff] }
   0x3   :  { %v79_v4 = vpack.c.bf16 %v16_v2, %v15_v1  ;;  %v31_v5 = vld [vmem:[%s1064_s0 + $0x80] sm:$0xff]  ;;  %224 = vmatpush.bf16.msra.mxu0 %v215_v3  ;;  %487 = vmatpush.bf16.msra.mxu1 %v215_v3  ;;  %v48_v9 = vld [vmem:[%s1064_s0 + $0x108] sm:$0xff]  ;;  %v33_v16 = vld [vmem:[%s1064_s0 + $0x90] sm:$0xff]  ;;  %v80_v22 = vpack.c.bf16 %v18_v15, %v17_v14 }
   0x4   :  { %v47_v7 = vld [vmem:[%s1064_s0 + $0x100] sm:$0xff]  ;;  %v87_v8 = vpack.c.bf16 %v32_v6, %v31_v5  ;;  %v64_v11 = vld [vmem:[%s1064_s0 + $0x188] sm:$0xff]  ;;  %488 = vmatpush.bf16.msra.mxu2 %v215_v3  ;;  %489 = vmatpush.bf16.msra.mxu3 %v215_v3  ;;  %v34_v17 = vld [vmem:[%s1064_s0 + $0x98] sm:$0xff] }
   0x5   :  { %v63_v10 = vld [vmem:[%s1064_s0 + $0x180] sm:$0xff]  ;;  %v95_v12 = vpack.c.bf16 %v48_v9, %v47_v7  ;;  %v49_v18 = vld [vmem:[%s1064_s0 + $0x110] sm:$0xff]  ;;  %v50_v19 = vld [vmem:[%s1064_s0 + $0x118] sm:$0xff]  ;;  %v88_v23 = vpack.c.bf16 %v34_v17, %v33_v16 }
   0x6   :  { %v103_v13 = vpack.c.bf16 %v64_v11, %v63_v10  ;;  %455 = vmatmul.msk.bf16.vlgmr.msra.gmra.mxu0 %vm116_vm1, %v79_v4  ;;  %463 = vmatmul.msk.bf16.vlgmr.msra.gmra.mxu1 %vm116_vm1, %v87_v8  ;;  %v65_v20 = vld [vmem:[%s1064_s0 + $0x190] sm:$0xff]  ;;  %v66_v21 = vld [vmem:[%s1064_s0 + $0x198] sm:$0xff]  ;;  %v96_v24 = vpack.c.bf16 %v50_v19, %v49_v18  ;;  %v19_v26 = vld [vmem:[%s1064_s0 + $0x20] sm:$0xff] }
   0x7   :  { %471 = vmatmul.msk.bf16.vlgmr.msra.gmra.mxu2 %vm116_vm1, %v95_v12  ;;  %v104_v25 = vpack.c.bf16 %v66_v21, %v65_v20  ;;  %v20_v27 = vld [vmem:[%s1064_s0 + $0x28] sm:$0xff]  ;;  %v35_v28 = vld [vmem:[%s1064_s0 + $0xa0] sm:$0xff]  ;;  %v21_v38 = vld [vmem:[%s1064_s0 + $0x30] sm:$0xff] }
   0x8   :  { %479 = vmatmul.msk.bf16.vlgmr.msra.gmra.mxu3 %vm116_vm1, %v103_v13  ;;  %v36_v29 = vld [vmem:[%s1064_s0 + $0xa8] sm:$0xff]  ;;  %v51_v30 = vld [vmem:[%s1064_s0 + $0x120] sm:$0xff]  ;;  %v81_v34 = vpack.c.bf16 %v20_v27, %v19_v26  ;;  %v22_v39 = vld [vmem:[%s1064_s0 + $0x38] sm:$0xff] }
   0x9   :  { %v52_v31 = vld [vmem:[%s1064_s0 + $0x128] sm:$0xff]  ;;  %v67_v32 = vld [vmem:[%s1064_s0 + $0x1a0] sm:$0xff]  ;;  %v89_v35 = vpack.c.bf16 %v36_v29, %v35_v28  ;;  %v37_v40 = vld [vmem:[%s1064_s0 + $0xb0] sm:$0xff]  ;;  %v82_v46 = vpack.c.bf16 %v22_v39, %v21_v38 }
   0xa   :  { %v68_v33 = vld [vmem:[%s1064_s0 + $0x1a8] sm:$0xff]  ;;  %v97_v36 = vpack.c.bf16 %v52_v31, %v51_v30  ;;  %v38_v41 = vld [vmem:[%s1064_s0 + $0xb8] sm:$0xff]  ;;  %v53_v42 = vld [vmem:[%s1064_s0 + $0x130] sm:$0xff] }
   0xb   :  { %v105_v37 = vpack.c.bf16 %v68_v33, %v67_v32  ;;  %v54_v43 = vld [vmem:[%s1064_s0 + $0x138] sm:$0xff]  ;;  %v69_v44 = vld [vmem:[%s1064_s0 + $0x1b0] sm:$0xff]  ;;  %v90_v47 = vpack.c.bf16 %v38_v41, %v37_v40  ;;  %v23_v50 = vld [vmem:[%s1064_s0 + $0x40] sm:$0xff] }
   0xc   :  { %v70_v45 = vld [vmem:[%s1064_s0 + $0x1b8] sm:$0xff]  ;;  %v98_v48 = vpack.c.bf16 %v54_v43, %v53_v42  ;;  %v24_v51 = vld [vmem:[%s1064_s0 + $0x48] sm:$0xff]  ;;  %v39_v52 = vld [vmem:[%s1064_s0 + $0xc0] sm:$0xff] }
   0xd   :  { %v106_v49 = vpack.c.bf16 %v70_v45, %v69_v44  ;;  %v40_v53 = vld [vmem:[%s1064_s0 + $0xc8] sm:$0xff]  ;;  %v55_v54 = vld [vmem:[%s1064_s0 + $0x140] sm:$0xff]  ;;  %v83_v58 = vpack.c.bf16 %v24_v51, %v23_v50  ;;  %v25_v62 = vld [vmem:[%s1064_s0 + $0x50] sm:$0xff] }
   0xe   :  { %v56_v55 = vld [vmem:[%s1064_s0 + $0x148] sm:$0xff]  ;;  %v71_v56 = vld [vmem:[%s1064_s0 + $0x1c0] sm:$0xff]  ;;  %v91_v59 = vpack.c.bf16 %v40_v53, %v39_v52  ;;  %v26_v63 = vld [vmem:[%s1064_s0 + $0x58] sm:$0xff] }
   0xf   :  { %v72_v57 = vld [vmem:[%s1064_s0 + $0x1c8] sm:$0xff]  ;;  %v99_v60 = vpack.c.bf16 %v56_v55, %v55_v54  ;;  %v41_v0 = vld [vmem:[%s1064_s0 + $0xd0] sm:$0xff]  ;;  %v42_v1 = vld [vmem:[%s1064_s0 + $0xd8] sm:$0xff]  ;;  %v84_v6 = vpack.c.bf16 %v26_v63, %v25_v62 }
  0x10   :  { %v107_v61 = vpack.c.bf16 %v72_v57, %v71_v56  ;;  %v57_v2 = vld [vmem:[%s1064_s0 + $0x150] sm:$0xff]  ;;  %v58_v3 = vld [vmem:[%s1064_s0 + $0x158] sm:$0xff]  ;;  %v92_v7 = vpack.c.bf16 %v42_v1, %v41_v0  ;;  %v27_v10 = vld [vmem:[%s1064_s0 + $0x60] sm:$0xff] }
  0x11   :  { %v73_v4 = vld [vmem:[%s1064_s0 + $0x1d0] sm:$0xff]  ;;  %v74_v5 = vld [vmem:[%s1064_s0 + $0x1d8] sm:$0xff]  ;;  %v100_v8 = vpack.c.bf16 %v58_v3, %v57_v2  ;;  %v28_v11 = vld [vmem:[%s1064_s0 + $0x68] sm:$0xff] }
  0x12   :  { %v108_v9 = vpack.c.bf16 %v74_v5, %v73_v4  ;;  %v43_v12 = vld [vmem:[%s1064_s0 + $0xe0] sm:$0xff]  ;;  %v44_v13 = vld [vmem:[%s1064_s0 + $0xe8] sm:$0xff]  ;;  %v85_v18 = vpack.c.bf16 %v28_v11, %v27_v10  ;;  %v61_v26 = vld [vmem:[%s1064_s0 + $0x170] sm:$0xff] }
  0x13   :  { %v59_v14 = vld [vmem:[%s1064_s0 + $0x160] sm:$0xff]  ;;  %v60_v15 = vld [vmem:[%s1064_s0 + $0x168] sm:$0xff]  ;;  %v93_v19 = vpack.c.bf16 %v44_v13, %v43_v12  ;;  %v62_v27 = vld [vmem:[%s1064_s0 + $0x178] sm:$0xff] }
  0x14   :  { %v75_v16 = vld [vmem:[%s1064_s0 + $0x1e0] sm:$0xff]  ;;  %v76_v17 = vld [vmem:[%s1064_s0 + $0x1e8] sm:$0xff]  ;;  %v101_v20 = vpack.c.bf16 %v60_v15, %v59_v14  ;;  %v77_v28 = vld [vmem:[%s1064_s0 + $0x1f0] sm:$0xff]  ;;  %v102_v32 = vpack.c.bf16 %v62_v27, %v61_v26 }
  0x15   :  { %v109_v21 = vpack.c.bf16 %v76_v17, %v75_v16  ;;  %v78_v29 = vld [vmem:[%s1064_s0 + $0x1f8] sm:$0xff] }
  0x16   :  { %456 = vmatmul.msk.bf16.gmra.mxu0 %vm116_vm1, %v80_v22  ;;  %464 = vmatmul.msk.bf16.gmra.mxu1 %vm116_vm1, %v88_v23  ;;  %v29_v22 = vld [vmem:[%s1064_s0 + $0x70] sm:$0xff]  ;;  %v30_v23 = vld [vmem:[%s1064_s0 + $0x78] sm:$0xff]  ;;  %v110_v33 = vpack.c.bf16 %v78_v29, %v77_v28 }
  0x17   :  { %472 = vmatmul.msk.bf16.gmra.mxu2 %vm116_vm1, %v96_v24  ;;  %v45_v24 = vld [vmem:[%s1064_s0 + $0xf0] sm:$0xff]  ;;  %v86_v30 = vpack.c.bf16 %v30_v23, %v29_v22 }
  0x18   :  { %480 = vmatmul.msk.bf16.gmra.mxu3 %vm116_vm1, %v104_v25  ;;  %v46_v25 = vld [vmem:[%s1064_s0 + $0xf8] sm:$0xff] }
  0x19   :  { %v94_v31 = vpack.c.bf16 %v46_v25, %v45_v24 }
  0x26   :  { %457 = vmatmul.msk.bf16.gmra.mxu0 %vm116_vm1, %v81_v34  ;;  %465 = vmatmul.msk.bf16.gmra.mxu1 %vm116_vm1, %v89_v35  ;;  %v741_v34 = vld [vmem:[%s1065_s2] ss:$0 sm:$0xff] }
  0x27   :  { %473 = vmatmul.msk.bf16.gmra.mxu2 %vm116_vm1, %v97_v36 }
  0x28   :  { %481 = vmatmul.msk.bf16.gmra.mxu3 %vm116_vm1, %v105_v37 }
  0x36   :  { %458 = vmatmul.msk.bf16.gmra.mxu0 %vm116_vm1, %v82_v46  ;;  %466 = vmatmul.msk.bf16.gmra.mxu1 %vm116_vm1, %v90_v47 }
  0x37   :  { %474 = vmatmul.msk.bf16.gmra.mxu2 %vm116_vm1, %v98_v48 }
  0x38   :  { %482 = vmatmul.msk.bf16.gmra.mxu3 %vm116_vm1, %v106_v49 }
  0x46   :  { %459 = vmatmul.msk.bf16.gmra.mxu0 %vm116_vm1, %v83_v58  ;;  %467 = vmatmul.msk.bf16.gmra.mxu1 %vm116_vm1, %v91_v59 }
  0x47   :  { %475 = vmatmul.msk.bf16.gmra.mxu2 %vm116_vm1, %v99_v60 }
  0x48   :  { %483 = vmatmul.msk.bf16.gmra.mxu3 %vm116_vm1, %v107_v61 }
  0x56   :  { %460 = vmatmul.msk.bf16.gmra.mxu0 %vm116_vm1, %v84_v6  ;;  %468 = vmatmul.msk.bf16.gmra.mxu1 %vm116_vm1, %v92_v7 }
  0x57   :  { %476 = vmatmul.msk.bf16.gmra.mxu2 %vm116_vm1, %v100_v8 }
  0x58   :  { %484 = vmatmul.msk.bf16.gmra.mxu3 %vm116_vm1, %v108_v9 }
  0x66   :  { %461 = vmatmul.msk.bf16.gmra.mxu0 %vm116_vm1, %v85_v18  ;;  %469 = vmatmul.msk.bf16.gmra.mxu1 %vm116_vm1, %v93_v19 }
  0x67   :  { %477 = vmatmul.msk.bf16.gmra.mxu2 %vm116_vm1, %v101_v20 }
  0x68   :  { %485 = vmatmul.msk.bf16.gmra.mxu3 %vm116_vm1, %v109_v21 }
  0x76   :  { %462 = vmatmul.msk.bf16.gmra.mxu0 %vm116_vm1, %v86_v30  ;;  %470 = vmatmul.msk.bf16.gmra.mxu1 %vm116_vm1, %v94_v31 }
  0x77   :  { %478 = vmatmul.msk.bf16.gmra.mxu2 %vm116_vm1, %v102_v32 }
  0x78   :  { %486 = vmatmul.msk.bf16.gmra.mxu3 %vm116_vm1, %v110_v33 }
  0x83   :  { %v226_v35 = vpop.f32.mrf.mxu0  ;;  %v266_v36 = vpop.f32.mrf.mxu1 }
  0x84   :  { %v227_v37 = vadd.f32 %v741_v34, %v226_v35  ;;  %v267_v38 = vadd.f32 %v741_v34, %v266_v36 }
  0x86   :  { %387 = vst.msk [vmem:[%s1066_s3] sm:$0xff] %vm386_vm2, %v227_v37 }
  0x87   :  { %403 = vst.msk [vmem:[%s1066_s3 + $0x80] sm:$0xff] %vm386_vm2, %v267_v38 }
  0x8a   :  { %v306_v39 = vpop.f32.mrf.mxu2 }
  0x8b   :  { %v346_v40 = vpop.f32.mrf.mxu3  ;;  %v307_v41 = vadd.f32 %v741_v34, %v306_v39  ;;  %v228_v43 = vpop.f32.mrf.mxu0 }
  0x8c   :  { %v347_v42 = vadd.f32 %v741_v34, %v346_v40  ;;  %v268_v44 = vpop.f32.mrf.mxu1  ;;  %v229_v45 = vadd.f32 %v741_v34, %v228_v43 }
  0x8d   :  { %v269_v46 = vadd.f32 %v741_v34, %v268_v44  ;;  %419 = vst.msk [vmem:[%s1066_s3 + $0x100] sm:$0xff] %vm386_vm2, %v307_v41 }
  0x8e   :  { %435 = vst.msk [vmem:[%s1066_s3 + $0x180] sm:$0xff] %vm386_vm2, %v347_v42 }
  0x8f   :  { %388 = vst.msk [vmem:[%s1066_s3 + $0x8] sm:$0xff] %vm386_vm2, %v229_v45 }
  0x90   :  { %404 = vst.msk [vmem:[%s1066_s3 + $0x88] sm:$0xff] %vm386_vm2, %v269_v46 }
  0x92   :  { %v308_v47 = vpop.f32.mrf.mxu2 }
  0x93   :  { %v348_v48 = vpop.f32.mrf.mxu3  ;;  %v309_v49 = vadd.f32 %v741_v34, %v308_v47  ;;  %v231_v51 = vpop.f32.mrf.mxu0 }
  0x94   :  { %v349_v50 = vadd.f32 %v741_v34, %v348_v48  ;;  %v271_v52 = vpop.f32.mrf.mxu1  ;;  %v232_v53 = vadd.f32 %v741_v34, %v231_v51 }
  0x95   :  { %v272_v54 = vadd.f32 %v741_v34, %v271_v52  ;;  %420 = vst.msk [vmem:[%s1066_s3 + $0x108] sm:$0xff] %vm386_vm2, %v309_v49 }
  0x96   :  { %436 = vst.msk [vmem:[%s1066_s3 + $0x188] sm:$0xff] %vm386_vm2, %v349_v50 }
  0x97   :  { %389 = vst.msk [vmem:[%s1066_s3 + $0x10] sm:$0xff] %vm386_vm2, %v232_v53 }
  0x98   :  { %405 = vst.msk [vmem:[%s1066_s3 + $0x90] sm:$0xff] %vm386_vm2, %v272_v54 }
  0x9a   :  { %v311_v55 = vpop.f32.mrf.mxu2 }
  0x9b   :  { %v351_v56 = vpop.f32.mrf.mxu3  ;;  %v312_v57 = vadd.f32 %v741_v34, %v311_v55  ;;  %v233_v59 = vpop.f32.mrf.mxu0 }
  0x9c   :  { %v352_v58 = vadd.f32 %v741_v34, %v351_v56  ;;  %v273_v60 = vpop.f32.mrf.mxu1  ;;  %v234_v61 = vadd.f32 %v741_v34, %v233_v59 }
  0x9d   :  { %v274_v62 = vadd.f32 %v741_v34, %v273_v60  ;;  %421 = vst.msk [vmem:[%s1066_s3 + $0x110] sm:$0xff] %vm386_vm2, %v312_v57 }
  0x9e   :  { %437 = vst.msk [vmem:[%s1066_s3 + $0x190] sm:$0xff] %vm386_vm2, %v352_v58 }
  0x9f   :  { %390 = vst.msk [vmem:[%s1066_s3 + $0x18] sm:$0xff] %vm386_vm2, %v234_v61 }
  0xa0   :  { %406 = vst.msk [vmem:[%s1066_s3 + $0x98] sm:$0xff] %vm386_vm2, %v274_v62 }
  0xa2   :  { %v313_v63 = vpop.f32.mrf.mxu2 }
  0xa3   :  { %v353_v0 = vpop.f32.mrf.mxu3  ;;  %v314_v1 = vadd.f32 %v741_v34, %v313_v63  ;;  %v236_v3 = vpop.f32.mrf.mxu0 }
  0xa4   :  { %v354_v2 = vadd.f32 %v741_v34, %v353_v0  ;;  %v276_v4 = vpop.f32.mrf.mxu1  ;;  %v237_v5 = vadd.f32 %v741_v34, %v236_v3 }
  0xa5   :  { %v277_v6 = vadd.f32 %v741_v34, %v276_v4  ;;  %422 = vst.msk [vmem:[%s1066_s3 + $0x118] sm:$0xff] %vm386_vm2, %v314_v1 }
  0xa6   :  { %438 = vst.msk [vmem:[%s1066_s3 + $0x198] sm:$0xff] %vm386_vm2, %v354_v2 }
  0xa7   :  { %391 = vst.msk [vmem:[%s1066_s3 + $0x20] sm:$0xff] %vm386_vm2, %v237_v5 }
  0xa8   :  { %407 = vst.msk [vmem:[%s1066_s3 + $0xa0] sm:$0xff] %vm386_vm2, %v277_v6 }
  0xaa   :  { %v316_v7 = vpop.f32.mrf.mxu2 }
  0xab   :  { %v356_v8 = vpop.f32.mrf.mxu3  ;;  %v317_v9 = vadd.f32 %v741_v34, %v316_v7  ;;  %v238_v11 = vpop.f32.mrf.mxu0 }
  0xac   :  { %v357_v10 = vadd.f32 %v741_v34, %v356_v8  ;;  %v278_v12 = vpop.f32.mrf.mxu1  ;;  %v239_v13 = vadd.f32 %v741_v34, %v238_v11 }
  0xad   :  { %v279_v14 = vadd.f32 %v741_v34, %v278_v12  ;;  %423 = vst.msk [vmem:[%s1066_s3 + $0x120] sm:$0xff] %vm386_vm2, %v317_v9 }
  0xae   :  { %439 = vst.msk [vmem:[%s1066_s3 + $0x1a0] sm:$0xff] %vm386_vm2, %v357_v10 }
  0xaf   :  { %392 = vst.msk [vmem:[%s1066_s3 + $0x28] sm:$0xff] %vm386_vm2, %v239_v13 }
  0xb0   :  { %408 = vst.msk [vmem:[%s1066_s3 + $0xa8] sm:$0xff] %vm386_vm2, %v279_v14 }
  0xb2   :  { %v318_v15 = vpop.f32.mrf.mxu2 }
  0xb3   :  { %v358_v16 = vpop.f32.mrf.mxu3  ;;  %v319_v17 = vadd.f32 %v741_v34, %v318_v15  ;;  %v241_v19 = vpop.f32.mrf.mxu0 }
  0xb4   :  { %v359_v18 = vadd.f32 %v741_v34, %v358_v16  ;;  %v281_v20 = vpop.f32.mrf.mxu1  ;;  %v242_v21 = vadd.f32 %v741_v34, %v241_v19 }
  0xb5   :  { %v282_v22 = vadd.f32 %v741_v34, %v281_v20  ;;  %424 = vst.msk [vmem:[%s1066_s3 + $0x128] sm:$0xff] %vm386_vm2, %v319_v17 }
  0xb6   :  { %440 = vst.msk [vmem:[%s1066_s3 + $0x1a8] sm:$0xff] %vm386_vm2, %v359_v18 }
  0xb7   :  { %393 = vst.msk [vmem:[%s1066_s3 + $0x30] sm:$0xff] %vm386_vm2, %v242_v21 }
  0xb8   :  { %409 = vst.msk [vmem:[%s1066_s3 + $0xb0] sm:$0xff] %vm386_vm2, %v282_v22 }
  0xba   :  { %v321_v23 = vpop.f32.mrf.mxu2 }
  0xbb   :  { %v361_v24 = vpop.f32.mrf.mxu3  ;;  %v322_v25 = vadd.f32 %v741_v34, %v321_v23  ;;  %v243_v27 = vpop.f32.mrf.mxu0 }
  0xbc   :  { %v362_v26 = vadd.f32 %v741_v34, %v361_v24  ;;  %v283_v28 = vpop.f32.mrf.mxu1  ;;  %v244_v29 = vadd.f32 %v741_v34, %v243_v27 }
  0xbd   :  { %v284_v30 = vadd.f32 %v741_v34, %v283_v28  ;;  %425 = vst.msk [vmem:[%s1066_s3 + $0x130] sm:$0xff] %vm386_vm2, %v322_v25 }
  0xbe   :  { %441 = vst.msk [vmem:[%s1066_s3 + $0x1b0] sm:$0xff] %vm386_vm2, %v362_v26 }
  0xbf   :  { %394 = vst.msk [vmem:[%s1066_s3 + $0x38] sm:$0xff] %vm386_vm2, %v244_v29 }
  0xc0   :  { %410 = vst.msk [vmem:[%s1066_s3 + $0xb8] sm:$0xff] %vm386_vm2, %v284_v30 }
  0xc2   :  { %v323_v31 = vpop.f32.mrf.mxu2 }
  0xc3   :  { %v363_v32 = vpop.f32.mrf.mxu3  ;;  %v324_v33 = vadd.f32 %v741_v34, %v323_v31  ;;  %v246_v36 = vpop.f32.mrf.mxu0 }
  0xc4   :  { %v364_v35 = vadd.f32 %v741_v34, %v363_v32  ;;  %v286_v37 = vpop.f32.mrf.mxu1  ;;  %v247_v38 = vadd.f32 %v741_v34, %v246_v36 }
  0xc5   :  { %v287_v39 = vadd.f32 %v741_v34, %v286_v37  ;;  %426 = vst.msk [vmem:[%s1066_s3 + $0x138] sm:$0xff] %vm386_vm2, %v324_v33 }
  0xc6   :  { %442 = vst.msk [vmem:[%s1066_s3 + $0x1b8] sm:$0xff] %vm386_vm2, %v364_v35 }
  0xc7   :  { %395 = vst.msk [vmem:[%s1066_s3 + $0x40] sm:$0xff] %vm386_vm2, %v247_v38 }
  0xc8   :  { %411 = vst.msk [vmem:[%s1066_s3 + $0xc0] sm:$0xff] %vm386_vm2, %v287_v39 }
  0xca   :  { %v326_v40 = vpop.f32.mrf.mxu2 }
  0xcb   :  { %v366_v41 = vpop.f32.mrf.mxu3  ;;  %v327_v42 = vadd.f32 %v741_v34, %v326_v40  ;;  %v248_v44 = vpop.f32.mrf.mxu0 }
  0xcc   :  { %v367_v43 = vadd.f32 %v741_v34, %v366_v41  ;;  %v288_v45 = vpop.f32.mrf.mxu1  ;;  %v249_v46 = vadd.f32 %v741_v34, %v248_v44 }
  0xcd   :  { %v289_v47 = vadd.f32 %v741_v34, %v288_v45  ;;  %427 = vst.msk [vmem:[%s1066_s3 + $0x140] sm:$0xff] %vm386_vm2, %v327_v42 }
  0xce   :  { %443 = vst.msk [vmem:[%s1066_s3 + $0x1c0] sm:$0xff] %vm386_vm2, %v367_v43 }
  0xcf   :  { %396 = vst.msk [vmem:[%s1066_s3 + $0x48] sm:$0xff] %vm386_vm2, %v249_v46 }
  0xd0   :  { %412 = vst.msk [vmem:[%s1066_s3 + $0xc8] sm:$0xff] %vm386_vm2, %v289_v47 }
  0xd2   :  { %v328_v48 = vpop.f32.mrf.mxu2 }
  0xd3   :  { %v368_v49 = vpop.f32.mrf.mxu3  ;;  %v329_v50 = vadd.f32 %v741_v34, %v328_v48  ;;  %v251_v52 = vpop.f32.mrf.mxu0 }
  0xd4   :  { %v369_v51 = vadd.f32 %v741_v34, %v368_v49  ;;  %v291_v53 = vpop.f32.mrf.mxu1  ;;  %v252_v54 = vadd.f32 %v741_v34, %v251_v52 }
  0xd5   :  { %v292_v55 = vadd.f32 %v741_v34, %v291_v53  ;;  %428 = vst.msk [vmem:[%s1066_s3 + $0x148] sm:$0xff] %vm386_vm2, %v329_v50 }
  0xd6   :  { %444 = vst.msk [vmem:[%s1066_s3 + $0x1c8] sm:$0xff] %vm386_vm2, %v369_v51 }
  0xd7   :  { %397 = vst.msk [vmem:[%s1066_s3 + $0x50] sm:$0xff] %vm386_vm2, %v252_v54 }
  0xd8   :  { %413 = vst.msk [vmem:[%s1066_s3 + $0xd0] sm:$0xff] %vm386_vm2, %v292_v55 }
  0xda   :  { %v331_v56 = vpop.f32.mrf.mxu2 }
  0xdb   :  { %v371_v57 = vpop.f32.mrf.mxu3  ;;  %v332_v58 = vadd.f32 %v741_v34, %v331_v56  ;;  %v253_v60 = vpop.f32.mrf.mxu0 }
  0xdc   :  { %v372_v59 = vadd.f32 %v741_v34, %v371_v57  ;;  %v293_v61 = vpop.f32.mrf.mxu1  ;;  %v254_v62 = vadd.f32 %v741_v34, %v253_v60 }
  0xdd   :  { %v294_v63 = vadd.f32 %v741_v34, %v293_v61  ;;  %429 = vst.msk [vmem:[%s1066_s3 + $0x150] sm:$0xff] %vm386_vm2, %v332_v58 }
  0xde   :  { %445 = vst.msk [vmem:[%s1066_s3 + $0x1d0] sm:$0xff] %vm386_vm2, %v372_v59 }
  0xdf   :  { %398 = vst.msk [vmem:[%s1066_s3 + $0x58] sm:$0xff] %vm386_vm2, %v254_v62 }
  0xe0   :  { %414 = vst.msk [vmem:[%s1066_s3 + $0xd8] sm:$0xff] %vm386_vm2, %v294_v63 }
  0xe2   :  { %v333_v0 = vpop.f32.mrf.mxu2 }
  0xe3   :  { %v373_v1 = vpop.f32.mrf.mxu3  ;;  %v334_v2 = vadd.f32 %v741_v34, %v333_v0  ;;  %v256_v4 = vpop.f32.mrf.mxu0 }
  0xe4   :  { %v374_v3 = vadd.f32 %v741_v34, %v373_v1  ;;  %v296_v5 = vpop.f32.mrf.mxu1  ;;  %v257_v6 = vadd.f32 %v741_v34, %v256_v4 }
  0xe5   :  { %v297_v7 = vadd.f32 %v741_v34, %v296_v5  ;;  %430 = vst.msk [vmem:[%s1066_s3 + $0x158] sm:$0xff] %vm386_vm2, %v334_v2 }
  0xe6   :  { %446 = vst.msk [vmem:[%s1066_s3 + $0x1d8] sm:$0xff] %vm386_vm2, %v374_v3 }
  0xe7   :  { %399 = vst.msk [vmem:[%s1066_s3 + $0x60] sm:$0xff] %vm386_vm2, %v257_v6 }
  0xe8   :  { %415 = vst.msk [vmem:[%s1066_s3 + $0xe0] sm:$0xff] %vm386_vm2, %v297_v7 }
  0xea   :  { %v336_v8 = vpop.f32.mrf.mxu2 }
  0xeb   :  { %v376_v9 = vpop.f32.mrf.mxu3  ;;  %v337_v10 = vadd.f32 %v741_v34, %v336_v8  ;;  %v258_v12 = vpop.f32.mrf.mxu0 }
  0xec   :  { %v377_v11 = vadd.f32 %v741_v34, %v376_v9  ;;  %v298_v13 = vpop.f32.mrf.mxu1  ;;  %v259_v14 = vadd.f32 %v741_v34, %v258_v12 }
  0xed   :  { %v299_v15 = vadd.f32 %v741_v34, %v298_v13  ;;  %431 = vst.msk [vmem:[%s1066_s3 + $0x160] sm:$0xff] %vm386_vm2, %v337_v10 }
  0xee   :  { %447 = vst.msk [vmem:[%s1066_s3 + $0x1e0] sm:$0xff] %vm386_vm2, %v377_v11 }
  0xef   :  { %400 = vst.msk [vmem:[%s1066_s3 + $0x68] sm:$0xff] %vm386_vm2, %v259_v14 }
  0xf0   :  { %416 = vst.msk [vmem:[%s1066_s3 + $0xe8] sm:$0xff] %vm386_vm2, %v299_v15 }
  0xf2   :  { %v338_v16 = vpop.f32.mrf.mxu2 }
  0xf3   :  { %v378_v17 = vpop.f32.mrf.mxu3  ;;  %v339_v18 = vadd.f32 %v741_v34, %v338_v16  ;;  %v261_v20 = vpop.f32.mrf.mxu0 }
  0xf4   :  { %v379_v19 = vadd.f32 %v741_v34, %v378_v17  ;;  %v301_v21 = vpop.f32.mrf.mxu1  ;;  %v262_v22 = vadd.f32 %v741_v34, %v261_v20 }
  0xf5   :  { %v302_v23 = vadd.f32 %v741_v34, %v301_v21  ;;  %432 = vst.msk [vmem:[%s1066_s3 + $0x168] sm:$0xff] %vm386_vm2, %v339_v18 }
  0xf6   :  { %448 = vst.msk [vmem:[%s1066_s3 + $0x1e8] sm:$0xff] %vm386_vm2, %v379_v19 }
  0xf7   :  { %401 = vst.msk [vmem:[%s1066_s3 + $0x70] sm:$0xff] %vm386_vm2, %v262_v22 }
  0xf8   :  { %417 = vst.msk [vmem:[%s1066_s3 + $0xf0] sm:$0xff] %vm386_vm2, %v302_v23 }
  0xfa   :  { %v341_v24 = vpop.f32.mrf.mxu2 }
  0xfb   :  { %v381_v25 = vpop.f32.mrf.mxu3  ;;  %v342_v26 = vadd.f32 %v741_v34, %v341_v24  ;;  %v263_v28 = vpop.f32.mrf.mxu0 }
  0xfc   :  { %v382_v27 = vadd.f32 %v741_v34, %v381_v25  ;;  %v303_v29 = vpop.f32.mrf.mxu1  ;;  %v264_v30 = vadd.f32 %v741_v34, %v263_v28 }
  0xfd   :  { %v304_v31 = vadd.f32 %v741_v34, %v303_v29  ;;  %433 = vst.msk [vmem:[%s1066_s3 + $0x170] sm:$0xff] %vm386_vm2, %v342_v26 }
  0xfe   :  { %449 = vst.msk [vmem:[%s1066_s3 + $0x1f0] sm:$0xff] %vm386_vm2, %v382_v27 }
  0xff   :  { %402 = vst.msk [vmem:[%s1066_s3 + $0x78] sm:$0xff] %vm386_vm2, %v264_v30 }
 0x100   :  { %418 = vst.msk [vmem:[%s1066_s3 + $0xf8] sm:$0xff] %vm386_vm2, %v304_v31 }
 0x102   :  { %v343_v32 = vpop.f32.mrf.mxu2 }
 0x103   :  { %v383_v33 = vpop.f32.mrf.mxu3  ;;  %v344_v35 = vadd.f32 %v741_v34, %v343_v32 }
 0x104   :  { %v384_v36 = vadd.f32 %v741_v34, %v383_v33 }
 0x105   :  { %434 = vst.msk [vmem:[%s1066_s3 + $0x178] sm:$0xff] %vm386_vm2, %v344_v35 }
 0x106   :  { %450 = vst.msk [vmem:[%s1066_s3 + $0x1f8] sm:$0xff] %vm386_vm2, %v384_v36 }

// kernel: cell_stem0_forward.21
= control target key start
LH: loop header
LB: loop body
LE: loop exit
PB: predicated region body
PF: predicated region fallthrough
CT: control target
= control target key end

     0   :  { %s270_s10 = smov 120   ;;  %s271_s23 = smov 112   ;;  %vm88_vm0 = vcmask 1046528   ;;  %vm175_vm1 = vcmask 1045504   ;;  %vm44_vm2 = vcmask 982016   ;;  %vm73_vm3 = vcmask 916480   ;;  %s498_s0 = inlined_call_operand.vmem [shape: f32[2,18,144], index: 0, kind: input, shape index: {}]   ;;  %s499_s1 = inlined_call_operand.vmem [shape: f32[2,16,128], index: 1, kind: output, shape index: {}]  }
   0x1   :  { %v285_v0 = vld [vmem:[%s498_s0 + $0x10] sm:$0xff]  ;;  %v290_v1 = vld [vmem:[%s498_s0] sm:$0xff]  ;;  %v306_v3 = vld [vmem:[%s498_s0 + $0x18] sm:$0xff] }
   0x2   :  { %32 = vrot.lane.b32.xlu1 %v285_v0, %s270_s10  ;;  %28 = vrot.lane.b32.xlu0 %v290_v1, %s270_s10  ;;  %v299_v2 = vld [vmem:[%s498_s0 + $0x30] sm:$0xff]  ;;  %v9_v4 = vld [vmem:[%s498_s0 + $0x8] sm:$0xff]  ;;  %v89_v8 = vrot.slane %v290_v1, 1  ;;  %v90_v9 = vrot.slane %v285_v0, 1  ;;  %v110_v11 = vrot.slane %v306_v3, 1  ;;  %v195_v26 = vrot.slane %v306_v3, 2 }
   0x3   :  { %36 = vrot.lane.b32.xlu2 %v299_v2, %s270_s10  ;;  %v15_v5 = vld [vmem:[%s498_s0 + $0x38] sm:$0xff]  ;;  %v321_v6 = vld [vmem:[%s498_s0 + $0x48] sm:$0xff]  ;;  %v326_v7 = vld [vmem:[%s498_s0 + $0x40] sm:$0xff]  ;;  %v109_v10 = vrot.slane %v9_v4, 1  ;;  %v94_v18 = vrot.slane %v299_v2, 1  ;;  %v194_v25 = vrot.slane %v9_v4, 2 }
   0x4   :  { %v348_v12 = vsel %vm88_vm0, %v89_v8, %v90_v9  ;;  %v12_v13 = vld [vmem:[%s498_s0 + $0x20] sm:$0x3]  ;;  %v13_v14 = vld [vmem:[%s498_s0 + $0x28] sm:$0x3]  ;;  %v95_v19 = vrot.slane %v326_v7, 1  ;;  %v114_v27 = vrot.slane %v15_v5, 1 }
   0x5   :  { %v111_v15 = vsel %vm88_vm0, %v109_v10, %v110_v11  ;;  %v92_v16 = vrot.slane %v12_v13, 1  ;;  %v112_v17 = vrot.slane %v13_v14, 1  ;;  %v18_v22 = vld [vmem:[%s498_s0 + $0x50] sm:$0x3]  ;;  %v19_v24 = vld [vmem:[%s498_s0 + $0x58] sm:$0x3]  ;;  %v196_v31 = vsel %vm175_vm1, %v194_v25, %v195_v26 }
   0x6   :  { %v372_v23 = vsel %vm88_vm0, %v94_v18, %v95_v19  ;;  %v115_v28 = vrot.slane %v321_v6, 1  ;;  %v97_v29 = vrot.slane %v18_v22, 1  ;;  %v117_v30 = vrot.slane %v19_v24, 1 }
   0x7   :  { %v365_v20 = vsel %vm88_vm0, %v90_v9, %v92_v16  ;;  %v113_v21 = vsel %vm88_vm0, %v110_v11, %v112_v17  ;;  %v199_v35 = vrot.slane %v15_v5, 2  ;;  %v200_v36 = vrot.slane %v321_v6, 2 }
   0x8   :  { %v116_v32 = vsel %vm88_vm0, %v114_v27, %v115_v28  ;;  %v387_v33 = vsel %vm88_vm0, %v95_v19, %v97_v29  ;;  %v118_v34 = vsel %vm88_vm0, %v115_v28, %v117_v30  ;;  %v176_v38 = vrot.slane %v290_v1, 2 }
   0x9   :  { %v201_v37 = vsel %vm175_vm1, %v199_v35, %v200_v36  ;;  %v177_v39 = vrot.slane %v285_v0, 2  ;;  %v179_v41 = vrot.slane %v12_v13, 2  ;;  %v197_v42 = vrot.slane %v13_v14, 2 }
   0xa   :  { %34 = vrot.lane.b32.xlu1 %v306_v3, %s270_s10  ;;  %30 = vrot.lane.b32.xlu0 %v9_v4, %s270_s10  ;;  %v181_v45 = vrot.slane %v299_v2, 2  ;;  %v182_v46 = vrot.slane %v326_v7, 2  ;;  %v184_v47 = vrot.slane %v18_v22, 2  ;;  %v202_v51 = vrot.slane %v19_v24, 2 }
   0xb   :  { %38 = vrot.lane.b32.xlu2 %v15_v5, %s270_s10  ;;  %v408_v40 = vsel %vm175_vm1, %v176_v38, %v177_v39  ;;  %v416_v43 = vsel %vm175_vm1, %v177_v39, %v179_v41  ;;  %v198_v44 = vsel %vm175_vm1, %v195_v26, %v197_v42 }
   0xc   :  { %v426_v49 = vsel %vm175_vm1, %v181_v45, %v182_v46  ;;  %v429_v50 = vsel %vm175_vm1, %v182_v46, %v184_v47  ;;  %v203_v54 = vsel %vm175_vm1, %v200_v36, %v202_v51 }
  0x12   :  { %42 = vrot.lane.b32.xlu1 %v321_v6, %s270_s10  ;;  %40 = vrot.lane.b32.xlu0 %v326_v7, %s270_s10 }
  0x13   :  { %57 = vrot.lane.b32.xlu2 %v290_v1, %s271_s23 }
  0x1a   :  { %61 = vrot.lane.b32.xlu1 %v285_v0, %s271_s23  ;;  %59 = vrot.lane.b32.xlu0 %v9_v4, %s271_s23 }
  0x1b   :  { %63 = vrot.lane.b32.xlu2 %v306_v3, %s271_s23 }
  0x22   :  { %67 = vrot.lane.b32.xlu1 %v15_v5, %s271_s23  ;;  %65 = vrot.lane.b32.xlu0 %v299_v2, %s271_s23 }
  0x23   :  { %69 = vrot.lane.b32.xlu2 %v326_v7, %s271_s23 }
  0x2a   :  { %71 = vrot.lane.b32.xlu0 %v321_v6, %s271_s23  ;;  %119 = vrot.lane.b32.xlu1 %v348_v12, %s270_s10 }
  0x2b   :  { %121 = vrot.lane.b32.xlu2 %v111_v15, %s270_s10 }
  0x32   :  { %123 = vrot.lane.b32.xlu0 %v365_v20, %s270_s10  ;;  %125 = vrot.lane.b32.xlu1 %v113_v21, %s270_s10 }
  0x33   :  { %127 = vrot.lane.b32.xlu2 %v372_v23, %s270_s10 }
  0x3a   :  { %129 = vrot.lane.b32.xlu0 %v116_v32, %s270_s10  ;;  %131 = vrot.lane.b32.xlu1 %v387_v33, %s270_s10 }
  0x3b   :  { %133 = vrot.lane.b32.xlu2 %v118_v34, %s270_s10 }
  0x42   :  { %147 = vrot.lane.b32.xlu0 %v348_v12, %s271_s23  ;;  %149 = vrot.lane.b32.xlu1 %v111_v15, %s271_s23 }
  0x43   :  { %151 = vrot.lane.b32.xlu2 %v365_v20, %s271_s23 }
  0x4a   :  { %153 = vrot.lane.b32.xlu0 %v113_v21, %s271_s23  ;;  %155 = vrot.lane.b32.xlu1 %v372_v23, %s271_s23 }
  0x4b   :  { %157 = vrot.lane.b32.xlu2 %v116_v32, %s271_s23 }
  0x52   :  { %159 = vrot.lane.b32.xlu0 %v387_v33, %s271_s23  ;;  %161 = vrot.lane.b32.xlu1 %v118_v34, %s271_s23 }
  0x53   :  { %204 = vrot.lane.b32.xlu2 %v408_v40, %s270_s10 }
  0x5a   :  { %206 = vrot.lane.b32.xlu0 %v196_v31, %s270_s10  ;;  %208 = vrot.lane.b32.xlu1 %v416_v43, %s270_s10 }
  0x5b   :  { %210 = vrot.lane.b32.xlu2 %v198_v44, %s270_s10 }
  0x5d   :  { %v37_v48 = vpop.permute.xlu2 %36 }
  0x62   :  { %212 = vrot.lane.b32.xlu0 %v426_v49, %s270_s10  ;;  %214 = vrot.lane.b32.xlu1 %v201_v37, %s270_s10 }
  0x63   :  { %216 = vrot.lane.b32.xlu2 %v429_v50, %s270_s10 }
  0x65   :  { %v39_v52 = vpop.permute.xlu2 %38 }
  0x66   :  { %v47_v53 = vsel %vm44_vm2, %v37_v48, %v39_v52 }
  0x67   :  { %v55_v18 = vmax.f32 %v299_v2, %v47_v53 }
  0x6a   :  { %218 = vrot.lane.b32.xlu0 %v203_v54, %s270_s10  ;;  %232 = vrot.lane.b32.xlu1 %v408_v40, %s271_s23 }
  0x6b   :  { %234 = vrot.lane.b32.xlu2 %v196_v31, %s271_s23 }
  0x6d   :  { %v58_v55 = vpop.permute.xlu2 %57 }
  0x72   :  { %236 = vrot.lane.b32.xlu0 %v416_v43, %s271_s23  ;;  %238 = vrot.lane.b32.xlu1 %v198_v44, %s271_s23 }
  0x73   :  { %240 = vrot.lane.b32.xlu2 %v426_v49, %s271_s23 }
  0x74   :  { %v33_v56 = vpop.permute.xlu1 %32  ;;  %v29_v57 = vpop.permute.xlu0 %28 }
  0x75   :  { %v64_v58 = vpop.permute.xlu2 %63 }
  0x7a   :  { %242 = vrot.lane.b32.xlu0 %v201_v37, %s271_s23  ;;  %244 = vrot.lane.b32.xlu1 %v429_v50, %s271_s23 }
  0x7b   :  { %246 = vrot.lane.b32.xlu2 %v203_v54, %s271_s23 }
  0x7c   :  { %v35_v59 = vpop.permute.xlu1 %34  ;;  %v31_v60 = vpop.permute.xlu0 %30 }
  0x7d   :  { %v46_v61 = vsel %vm44_vm2, %v33_v56, %v35_v59  ;;  %v45_v62 = vsel %vm44_vm2, %v29_v57, %v31_v60  ;;  %v70_v63 = vpop.permute.xlu2 %69 }
  0x7e   :  { %v54_v8 = vmax.f32 %v285_v0, %v46_v61  ;;  %v53_v9 = vmax.f32 %v290_v1, %v45_v62 }
  0x84   :  { %v43_v3 = vpop.permute.xlu1 %42  ;;  %v41_v4 = vpop.permute.xlu0 %40 }
  0x85   :  { %v48_v5 = vsel %vm44_vm2, %v41_v4, %v43_v3  ;;  %v122_v6 = vpop.permute.xlu2 %121 }
  0x86   :  { %v56_v0 = vmax.f32 %v326_v7, %v48_v5 }
  0x8c   :  { %v62_v10 = vpop.permute.xlu1 %61  ;;  %v60_v11 = vpop.permute.xlu0 %59 }
  0x8d   :  { %v75_v13 = vsel %vm73_vm3, %v62_v10, %v64_v58  ;;  %v74_v14 = vsel %vm73_vm3, %v58_v55, %v60_v11  ;;  %v128_v17 = vpop.permute.xlu2 %127 }
  0x8e   :  { %v83_v15 = vmax.f32 %v54_v8, %v75_v13  ;;  %v82_v16 = vmax.f32 %v53_v9, %v74_v14 }
  0x90   :  { %v104_v61 = vmax.f32 %v83_v15, %v365_v20 }
  0x94   :  { %v68_v19 = vpop.permute.xlu1 %67  ;;  %v66_v21 = vpop.permute.xlu0 %65 }
  0x95   :  { %v76_v22 = vsel %vm73_vm3, %v66_v21, %v68_v19  ;;  %v134_v25 = vpop.permute.xlu2 %133 }
  0x96   :  { %v84_v24 = vmax.f32 %v55_v18, %v76_v22 }
  0x98   :  { %v105_v32 = vmax.f32 %v84_v24, %v372_v23  ;;  %v103_v23 = vmax.f32 %v82_v16, %v348_v12 }
  0x9c   :  { %v72_v1 = vpop.permute.xlu0 %71  ;;  %v120_v26 = vpop.permute.xlu1 %119 }
  0x9d   :  { %v77_v27 = vsel %vm73_vm3, %v70_v63, %v72_v1  ;;  %v152_v29 = vpop.permute.xlu2 %151  ;;  %v135_v52 = vsel %vm44_vm2, %v120_v26, %v122_v6 }
  0x9e   :  { %v85_v28 = vmax.f32 %v56_v0, %v77_v27  ;;  %v143_v54 = vmax.f32 %v103_v23, %v135_v52 }
  0xa4   :  { %v124_v30 = vpop.permute.xlu0 %123  ;;  %v126_v31 = vpop.permute.xlu1 %125 }
  0xa5   :  { %v158_v36 = vpop.permute.xlu2 %157  ;;  %v136_v59 = vsel %vm44_vm2, %v124_v30, %v126_v31 }
  0xa6   :  { %v144_v3 = vmax.f32 %v104_v61, %v136_v59 }
  0xac   :  { %v130_v34 = vpop.permute.xlu0 %129  ;;  %v132_v2 = vpop.permute.xlu1 %131 }
  0xad   :  { %v137_v35 = vsel %vm44_vm2, %v128_v17, %v130_v34  ;;  %v205_v41 = vpop.permute.xlu2 %204  ;;  %v138_v11 = vsel %vm44_vm2, %v132_v2, %v134_v25 }
  0xae   :  { %v145_v37 = vmax.f32 %v105_v32, %v137_v35 }
  0xb4   :  { %v148_v38 = vpop.permute.xlu0 %147  ;;  %v150_v39 = vpop.permute.xlu1 %149 }
  0xb5   :  { %v211_v44 = vpop.permute.xlu2 %210  ;;  %v163_v53 = vsel %vm73_vm3, %v148_v38, %v150_v39 }
  0xb6   :  { %v171_v57 = vmax.f32 %v143_v54, %v163_v53 }
  0xb8   :  { %v190_v62 = vmax.f32 %v171_v57, %v408_v40  ;;  %v106_v40 = vmax.f32 %v85_v28, %v387_v33 }
  0xba   :  { %v146_v16 = vmax.f32 %v106_v40, %v138_v11 }
  0xbc   :  { %v154_v7 = vpop.permute.xlu0 %153  ;;  %v156_v42 = vpop.permute.xlu1 %155 }
  0xbd   :  { %v217_v47 = vpop.permute.xlu2 %216  ;;  %v164_v63 = vsel %vm73_vm3, %v152_v29, %v154_v7  ;;  %v165_v14 = vsel %vm73_vm3, %v156_v42, %v158_v36 }
  0xbe   :  { %v172_v8 = vmax.f32 %v144_v3, %v164_v63  ;;  %v173_v22 = vmax.f32 %v145_v37, %v165_v14 }
  0xc0   :  { %v191_v13 = vmax.f32 %v172_v8, %v416_v43  ;;  %v192_v25 = vmax.f32 %v173_v22, %v426_v49 }
  0xc4   :  { %v160_v45 = vpop.permute.xlu0 %159  ;;  %v162_v46 = vpop.permute.xlu1 %161 }
  0xc5   :  { %v235_v58 = vpop.permute.xlu2 %234  ;;  %v166_v15 = vsel %vm73_vm3, %v160_v45, %v162_v46 }
  0xc6   :  { %v174_v24 = vmax.f32 %v146_v16, %v166_v15 }
  0xc8   :  { %v193_v1 = vmax.f32 %v174_v24, %v429_v50 }
  0xcc   :  { %v207_v48 = vpop.permute.xlu0 %206  ;;  %v209_v51 = vpop.permute.xlu1 %208 }
  0xcd   :  { %v220_v60 = vsel %vm44_vm2, %v205_v41, %v207_v48  ;;  %v241_v10 = vpop.permute.xlu2 %240  ;;  %v221_v20 = vsel %vm44_vm2, %v209_v51, %v211_v44 }
  0xce   :  { %v228_v4 = vmax.f32 %v190_v62, %v220_v60  ;;  %v229_v17 = vmax.f32 %v191_v13, %v221_v20 }
  0xd4   :  { %v213_v55 = vpop.permute.xlu0 %212  ;;  %v215_v56 = vpop.permute.xlu1 %214 }
  0xd5   :  { %v222_v33 = vsel %vm44_vm2, %v213_v55, %v215_v56  ;;  %v247_v26 = vpop.permute.xlu2 %246 }
  0xd6   :  { %v230_v27 = vmax.f32 %v192_v25, %v222_v33 }
  0xdc   :  { %v219_v12 = vpop.permute.xlu0 %218  ;;  %v233_v5 = vpop.permute.xlu1 %232 }
  0xdd   :  { %v248_v6 = vsel %vm73_vm3, %v233_v5, %v235_v58  ;;  %v223_v43 = vsel %vm44_vm2, %v217_v47, %v219_v12 }
  0xde   :  { %v256_v9 = vmax.f32 %v228_v4, %v248_v6  ;;  %v231_v28 = vmax.f32 %v193_v1, %v223_v43 }
  0xe0   :  { %260 = vst [vmem:[%s499_s1] sm:$0xff] %v256_v9 }
  0xe4   :  { %v237_v18 = vpop.permute.xlu0 %236  ;;  %v239_v19 = vpop.permute.xlu1 %238 }
  0xe5   :  { %v249_v21 = vsel %vm73_vm3, %v237_v18, %v239_v19 }
  0xe6   :  { %v257_v0 = vmax.f32 %v229_v17, %v249_v21 }
  0xe8   :  { %261 = vst [vmem:[%s499_s1 + $0x8] sm:$0xff] %v257_v0 }
  0xec   :  { %v243_v29 = vpop.permute.xlu0 %242  ;;  %v245_v30 = vpop.permute.xlu1 %244 }
  0xed   :  { %v250_v31 = vsel %vm73_vm3, %v241_v10, %v243_v29  ;;  %v251_v32 = vsel %vm73_vm3, %v245_v30, %v247_v26 }
  0xee   :  { %v258_v34 = vmax.f32 %v230_v27, %v250_v31  ;;  %v259_v2 = vmax.f32 %v231_v28, %v251_v32 }
  0xf0   :  { %262 = vst [vmem:[%s499_s1 + $0x10] sm:$0xff] %v258_v34 }
  0xf1   :  { %263 = vst [vmem:[%s499_s1 + $0x18] sm:$0xff] %v259_v2 }

// kernel: cell_stem0_forward.23
= control target key start
LH: loop header
LB: loop body
LE: loop exit
PB: predicated region body
PF: predicated region fallthrough
CT: control target
= control target key end

     0   :  { %vm192_vm0 = vcmask 1043456   ;;  %vm167_vm1 = vcmask 588800   ;;  %vm294_vm2 = vcmask 64512   ;;  %s645_s1 = inlined_call_operand.vmem [shape: bf16[200,8], index: 1, kind: input, shape index: {}]   ;;  %s646_s0 = inlined_call_operand.vmem [shape: f32[128,200], index: 0, kind: input, shape index: {}]   ;;  %s647_s2 = inlined_call_operand.vmem [shape: f32[1,8], index: 2, kind: input, shape index: {}]   ;;  %s648_s3 = inlined_call_operand.vmem [shape: f32[128,8], index: 3, kind: output, shape index: {}]  }
   0x1   :  { %v378_v0 = vld [vmem:[%s645_s1 + $0x38] sm:$0xff]  ;;  %v87_v1 = vld [vmem:[%s645_s1 + $0x60] sm:$0xf]  ;;  %v377_v3 = vld [vmem:[%s645_s1 + $0x30] sm:$0xff] }
   0x2   :  { %v141_v2 = vunpack.c.l.b16 %v87_v1  ;;  %196 = vmatpush.bf16.msra.mxu0 %v378_v0  ;;  %383 = vmatpush.bf16.msra.mxu2 %v378_v0  ;;  %v382_v6 = vld [vmem:[%s645_s1 + $0x58] sm:$0xff]  ;;  %v376_v7 = vld [vmem:[%s645_s1 + $0x28] sm:$0xff]  ;;  %v381_v8 = vld [vmem:[%s645_s1 + $0x50] sm:$0xff] }
   0x3   :  { %v375_v9 = vld [vmem:[%s645_s1 + $0x20] sm:$0xff]  ;;  %v380_v10 = vld [vmem:[%s645_s1 + $0x48] sm:$0xff]  ;;  %v374_v11 = vld [vmem:[%s645_s1 + $0x18] sm:$0xff] }
   0x4   :  { %v154_v4 = vpack.c.b16 %v141_v2, %v141_v2  ;;  %v379_v12 = vld [vmem:[%s645_s1 + $0x40] sm:$0xff]  ;;  %v373_v13 = vld [vmem:[%s645_s1 + $0x10] sm:$0xff]  ;;  %v16_v14 = vld [vmem:[%s646_s0 + $0x8] sm:$0xff] }
   0x5   :  { %v18_v15 = vld [vmem:[%s646_s0 + $0x18] sm:$0xff]  ;;  %v36_v16 = vld [vmem:[%s646_s0 + $0xa8] sm:$0xff]  ;;  %v371_v21 = vld [vmem:[%s645_s1] sm:$0xff] }
   0x6   :  { %v194_v5 = vsel %vm192_vm0, %v154_v4, 0  ;;  %197 = vmatpush.bf16.msra.mxu0 %v377_v3  ;;  %384 = vmatpush.bf16.msra.mxu2 %v377_v3  ;;  %v38_v17 = vld [vmem:[%s646_s0 + $0xb8] sm:$0xff]  ;;  %v48_v18 = vpack.c.bf16 %v18_v15, %v16_v14  ;;  %v372_v19 = vld [vmem:[%s645_s1 + $0x8] sm:$0xff]  ;;  %v15_v22 = vld [vmem:[%s646_s0] sm:$0xff] }
   0x7   :  { %248 = vmatpush.bf16.msra.mxu1 %v194_v5  ;;  %391 = vmatpush.bf16.msra.mxu3 %v194_v5  ;;  %v58_v20 = vpack.c.bf16 %v38_v17, %v36_v16  ;;  %v17_v23 = vld [vmem:[%s646_s0 + $0x10] sm:$0xff]  ;;  %v31_v24 = vld [vmem:[%s646_s0 + $0x80] sm:$0xff]  ;;  %v20_v28 = vld [vmem:[%s646_s0 + $0x28] sm:$0xff] }
   0x8   :  { %v33_v25 = vld [vmem:[%s646_s0 + $0x90] sm:$0xff]  ;;  %v47_v26 = vpack.c.bf16 %v17_v23, %v15_v22  ;;  %v22_v29 = vld [vmem:[%s646_s0 + $0x38] sm:$0xff]  ;;  %v40_v30 = vld [vmem:[%s646_s0 + $0xc8] sm:$0xff] }
   0x9   :  { %v55_v27 = vpack.c.bf16 %v33_v25, %v31_v24  ;;  %v42_v31 = vld [vmem:[%s646_s0 + $0xd8] sm:$0xff]  ;;  %v50_v32 = vpack.c.bf16 %v22_v29, %v20_v28  ;;  %v19_v34 = vld [vmem:[%s646_s0 + $0x20] sm:$0xff]  ;;  %v21_v35 = vld [vmem:[%s646_s0 + $0x30] sm:$0xff] }
   0xa   :  { %198 = vmatpush.bf16.msra.mxu0 %v376_v7  ;;  %385 = vmatpush.bf16.msra.mxu2 %v376_v7  ;;  %v60_v33 = vpack.c.bf16 %v42_v31, %v40_v30  ;;  %v35_v36 = vld [vmem:[%s646_s0 + $0xa0] sm:$0xff]  ;;  %v37_v37 = vld [vmem:[%s646_s0 + $0xb0] sm:$0xff]  ;;  %v49_v38 = vpack.c.bf16 %v21_v35, %v19_v34  ;;  %v24_v40 = vld [vmem:[%s646_s0 + $0x48] sm:$0xff] }
   0xb   :  { %249 = vmatpush.bf16.msra.mxu1 %v382_v6  ;;  %392 = vmatpush.bf16.msra.mxu3 %v382_v6  ;;  %v57_v39 = vpack.c.bf16 %v37_v37, %v35_v36  ;;  %v26_v41 = vld [vmem:[%s646_s0 + $0x58] sm:$0xff]  ;;  %v44_v42 = vld [vmem:[%s646_s0 + $0xe8] sm:$0xff]  ;;  %v23_v46 = vld [vmem:[%s646_s0 + $0x40] sm:$0xff] }
   0xc   :  { %v46_v43 = vld [vmem:[%s646_s0 + $0xf8] sm:$0xff]  ;;  %v52_v44 = vpack.c.bf16 %v26_v41, %v24_v40  ;;  %v25_v47 = vld [vmem:[%s646_s0 + $0x50] sm:$0xff]  ;;  %v39_v48 = vld [vmem:[%s646_s0 + $0xc0] sm:$0xff] }
   0xd   :  { %v62_v45 = vpack.c.bf16 %v46_v43, %v44_v42  ;;  %v41_v49 = vld [vmem:[%s646_s0 + $0xd0] sm:$0xff]  ;;  %v51_v50 = vpack.c.bf16 %v25_v47, %v23_v46  ;;  %v28_v52 = vld [vmem:[%s646_s0 + $0x68] sm:$0xff]  ;;  %v30_v53 = vld [vmem:[%s646_s0 + $0x78] sm:$0xff] }
   0xe   :  { %199 = vmatpush.bf16.msra.mxu0 %v375_v9  ;;  %386 = vmatpush.bf16.msra.mxu2 %v375_v9  ;;  %v59_v51 = vpack.c.bf16 %v41_v49, %v39_v48  ;;  %v54_v54 = vpack.c.bf16 %v30_v53, %v28_v52  ;;  %v27_v55 = vld [vmem:[%s646_s0 + $0x60] sm:$0xff]  ;;  %v29_v56 = vld [vmem:[%s646_s0 + $0x70] sm:$0xff]  ;;  %v32_v61 = vld [vmem:[%s646_s0 + $0x88] sm:$0xff] }
   0xf   :  { %250 = vmatpush.bf16.msra.mxu1 %v381_v8  ;;  %393 = vmatpush.bf16.msra.mxu3 %v381_v8  ;;  %v43_v57 = vld [vmem:[%s646_s0 + $0xe0] sm:$0xff]  ;;  %v45_v58 = vld [vmem:[%s646_s0 + $0xf0] sm:$0xff]  ;;  %v53_v59 = vpack.c.bf16 %v29_v56, %v27_v55  ;;  %v34_v62 = vld [vmem:[%s646_s0 + $0x98] sm:$0xff] }
  0x10   :  { %v61_v60 = vpack.c.bf16 %v45_v58, %v43_v57  ;;  %v56_v63 = vpack.c.bf16 %v34_v62, %v32_v61  ;;  %v563_v1 = vld [vmem:[%s647_s2] ss:$0 sm:$0xff] }
  0x12   :  { %200 = vmatpush.bf16.msra.mxu0 %v374_v11  ;;  %387 = vmatpush.bf16.msra.mxu2 %v374_v11 }
  0x13   :  { %251 = vmatpush.bf16.msra.mxu1 %v380_v10  ;;  %394 = vmatpush.bf16.msra.mxu3 %v380_v10 }
  0x16   :  { %201 = vmatpush.bf16.msra.mxu0 %v373_v13  ;;  %388 = vmatpush.bf16.msra.mxu2 %v373_v13 }
  0x17   :  { %252 = vmatpush.bf16.msra.mxu1 %v379_v12  ;;  %395 = vmatpush.bf16.msra.mxu3 %v379_v12 }
  0x1a   :  { %363 = vmatmul.msk.bf16.vlgmr.msra.gmra.mxu1 %vm167_vm1, %v48_v18  ;;  %202 = vmatpush.bf16.msra.mxu0 %v372_v19 }
  0x1b   :  { %368 = vmatmul.msk.bf16.vlgmr.msra.gmra.mxu3 %vm167_vm1, %v58_v20  ;;  %389 = vmatpush.bf16.msra.mxu2 %v372_v19 }
  0x1e   :  { %203 = vmatpush.bf16.msra.mxu0 %v371_v21 }
  0x1f   :  { %390 = vmatpush.bf16.msra.mxu2 %v371_v21 }
  0x21   :  { %204 = vmatmul.bf16.vlgmr.msra.gmra.mxu0 %v47_v26 }
  0x22   :  { %224 = vmatmul.bf16.vlgmr.msra.gmra.mxu2 %v55_v27 }
  0x2a   :  { %364 = vmatmul.msk.bf16.gmra.mxu1 %vm167_vm1, %v50_v32 }
  0x2b   :  { %369 = vmatmul.msk.bf16.gmra.mxu3 %vm167_vm1, %v60_v33 }
  0x31   :  { %209 = vmatmul.bf16.gmra.mxu0 %v49_v38 }
  0x32   :  { %229 = vmatmul.bf16.gmra.mxu2 %v57_v39 }
  0x3a   :  { %365 = vmatmul.msk.bf16.gmra.mxu1 %vm167_vm1, %v52_v44 }
  0x3b   :  { %370 = vmatmul.msk.bf16.gmra.mxu3 %vm167_vm1, %v62_v45 }
  0x41   :  { %214 = vmatmul.bf16.gmra.mxu0 %v51_v50 }
  0x42   :  { %234 = vmatmul.bf16.gmra.mxu2 %v59_v51 }
  0x4a   :  { %366 = vmatmul.msk.bf16.gmra.mxu1 %vm167_vm1, %v54_v54 }
  0x51   :  { %219 = vmatmul.bf16.gmra.mxu0 %v53_v59 }
  0x52   :  { %239 = vmatmul.bf16.gmra.mxu2 %v61_v60 }
  0x5a   :  { %367 = vmatmul.msk.bf16.gmra.mxu1 %vm167_vm1, %v56_v63 }
  0x97   :  { %v254_v0 = vpop.f32.mrf.mxu1 }
  0x9e   :  { %v205_v3 = vpop.f32.mrf.mxu0  ;;  %v279_v12 = vpop.f32.mrf.mxu3 }
  0x9f   :  { %v256_v2 = vpop.f32.mrf.mxu1  ;;  %v206_v4 = vadd.f32 %v563_v1, %v205_v3 }
  0xa1   :  { %v255_v5 = vadd.f32 %v254_v0, %v206_v4 }
  0xa3   :  { %295 = vst.msk [vmem:[%s648_s3] sm:$0xff] %vm294_vm2, %v255_v5 }
  0xa5   :  { %v225_v6 = vpop.f32.mrf.mxu2 }
  0xa6   :  { %v207_v8 = vpop.f32.mrf.mxu0  ;;  %v281_v22 = vpop.f32.mrf.mxu3  ;;  %v226_v48 = vadd.f32 %v563_v1, %v225_v6 }
  0xa7   :  { %v259_v7 = vpop.f32.mrf.mxu1  ;;  %v208_v9 = vadd.f32 %v563_v1, %v207_v8 }
  0xa9   :  { %v257_v10 = vadd.f32 %v256_v2, %v208_v9 }
  0xab   :  { %296 = vst.msk [vmem:[%s648_s3 + $0x8] sm:$0xff] %vm294_vm2, %v257_v10 }
  0xad   :  { %v227_v11 = vpop.f32.mrf.mxu2 }
  0xae   :  { %v210_v14 = vpop.f32.mrf.mxu0  ;;  %v284_v32 = vpop.f32.mrf.mxu3  ;;  %v228_v58 = vadd.f32 %v563_v1, %v227_v11 }
  0xaf   :  { %v261_v13 = vpop.f32.mrf.mxu1  ;;  %v211_v15 = vadd.f32 %v563_v1, %v210_v14 }
  0xb1   :  { %v260_v16 = vadd.f32 %v259_v7, %v211_v15 }
  0xb3   :  { %297 = vst.msk [vmem:[%s648_s3 + $0x10] sm:$0xff] %vm294_vm2, %v260_v16 }
  0xb5   :  { %v230_v17 = vpop.f32.mrf.mxu2 }
  0xb6   :  { %v231_v18 = vadd.f32 %v563_v1, %v230_v17  ;;  %v212_v20 = vpop.f32.mrf.mxu0  ;;  %v286_v40 = vpop.f32.mrf.mxu3 }
  0xb7   :  { %v264_v19 = vpop.f32.mrf.mxu1  ;;  %v213_v21 = vadd.f32 %v563_v1, %v212_v20 }
  0xb8   :  { %v280_v23 = vadd.f32 %v279_v12, %v231_v18 }
  0xb9   :  { %v262_v24 = vadd.f32 %v261_v13, %v213_v21 }
  0xba   :  { %305 = vst.msk [vmem:[%s648_s3 + $0x50] sm:$0xff] %vm294_vm2, %v280_v23 }
  0xbb   :  { %298 = vst.msk [vmem:[%s648_s3 + $0x18] sm:$0xff] %vm294_vm2, %v262_v24 }
  0xbd   :  { %v232_v25 = vpop.f32.mrf.mxu2 }
  0xbe   :  { %v233_v26 = vadd.f32 %v563_v1, %v232_v25  ;;  %v215_v28 = vpop.f32.mrf.mxu0  ;;  %v289_v49 = vpop.f32.mrf.mxu3 }
  0xbf   :  { %v266_v27 = vpop.f32.mrf.mxu1  ;;  %v216_v29 = vadd.f32 %v563_v1, %v215_v28 }
  0xc0   :  { %v282_v30 = vadd.f32 %v281_v22, %v233_v26 }
  0xc1   :  { %v265_v31 = vadd.f32 %v264_v19, %v216_v29 }
  0xc2   :  { %306 = vst.msk [vmem:[%s648_s3 + $0x58] sm:$0xff] %vm294_vm2, %v282_v30 }
  0xc3   :  { %299 = vst.msk [vmem:[%s648_s3 + $0x20] sm:$0xff] %vm294_vm2, %v265_v31 }
  0xc5   :  { %v235_v33 = vpop.f32.mrf.mxu2 }
  0xc6   :  { %v236_v34 = vadd.f32 %v563_v1, %v235_v33  ;;  %v217_v36 = vpop.f32.mrf.mxu0  ;;  %v291_v62 = vpop.f32.mrf.mxu3 }
  0xc7   :  { %v269_v35 = vpop.f32.mrf.mxu1  ;;  %v218_v37 = vadd.f32 %v563_v1, %v217_v36 }
  0xc8   :  { %v285_v38 = vadd.f32 %v284_v32, %v236_v34 }
  0xc9   :  { %v267_v39 = vadd.f32 %v266_v27, %v218_v37 }
  0xca   :  { %307 = vst.msk [vmem:[%s648_s3 + $0x60] sm:$0xff] %vm294_vm2, %v285_v38 }
  0xcb   :  { %300 = vst.msk [vmem:[%s648_s3 + $0x28] sm:$0xff] %vm294_vm2, %v267_v39 }
  0xcd   :  { %v237_v41 = vpop.f32.mrf.mxu2 }
  0xce   :  { %v238_v42 = vadd.f32 %v563_v1, %v237_v41  ;;  %v220_v44 = vpop.f32.mrf.mxu0 }
  0xcf   :  { %v271_v43 = vpop.f32.mrf.mxu1  ;;  %v221_v45 = vadd.f32 %v563_v1, %v220_v44 }
  0xd0   :  { %v287_v46 = vadd.f32 %v286_v40, %v238_v42 }
  0xd1   :  { %v270_v47 = vadd.f32 %v269_v35, %v221_v45 }
  0xd2   :  { %308 = vst.msk [vmem:[%s648_s3 + $0x68] sm:$0xff] %vm294_vm2, %v287_v46 }
  0xd3   :  { %301 = vst.msk [vmem:[%s648_s3 + $0x30] sm:$0xff] %vm294_vm2, %v270_v47 }
  0xd5   :  { %v240_v50 = vpop.f32.mrf.mxu2 }
  0xd6   :  { %v241_v51 = vadd.f32 %v563_v1, %v240_v50  ;;  %v222_v53 = vpop.f32.mrf.mxu0 }
  0xd7   :  { %v274_v52 = vpop.f32.mrf.mxu1  ;;  %v223_v55 = vadd.f32 %v563_v1, %v222_v53 }
  0xd8   :  { %v275_v54 = vadd.f32 %v274_v52, %v226_v48  ;;  %v290_v56 = vadd.f32 %v289_v49, %v241_v51 }
  0xd9   :  { %v272_v57 = vadd.f32 %v271_v43, %v223_v55 }
  0xda   :  { %303 = vst.msk [vmem:[%s648_s3 + $0x40] sm:$0xff] %vm294_vm2, %v275_v54 }
  0xdb   :  { %309 = vst.msk [vmem:[%s648_s3 + $0x70] sm:$0xff] %vm294_vm2, %v290_v56 }
  0xdc   :  { %302 = vst.msk [vmem:[%s648_s3 + $0x38] sm:$0xff] %vm294_vm2, %v272_v57 }
  0xdd   :  { %v242_v59 = vpop.f32.mrf.mxu2 }
  0xde   :  { %v243_v60 = vadd.f32 %v563_v1, %v242_v59 }
  0xdf   :  { %v276_v61 = vpop.f32.mrf.mxu1 }
  0xe0   :  { %v277_v63 = vadd.f32 %v276_v61, %v228_v58  ;;  %v292_v0 = vadd.f32 %v291_v62, %v243_v60 }
  0xe2   :  { %304 = vst.msk [vmem:[%s648_s3 + $0x48] sm:$0xff] %vm294_vm2, %v277_v63 }
  0xe3   :  { %310 = vst.msk [vmem:[%s648_s3 + $0x78] sm:$0xff] %vm294_vm2, %v292_v0 }

// kernel: cell_stem0_forward.24
= control target key start
LH: loop header
LB: loop body
LE: loop exit
PB: predicated region body
PF: predicated region fallthrough
CT: control target
= control target key end

     0   :  { %vm69_vm0 = vcmask 1043456   ;;  %vm44_vm1 = vcmask 64512   ;;  %s316_s1 = inlined_call_operand.vmem [shape: bf16[8,8], index: 1, kind: input, shape index: {}]   ;;  %s317_s0 = inlined_call_operand.vmem [shape: f32[128,8], index: 0, kind: input, shape index: {}]   ;;  %s318_s2 = inlined_call_operand.vmem [shape: f32[1,8], index: 2, kind: input, shape index: {}]   ;;  %s319_s3 = inlined_call_operand.vmem [shape: f32[128,8], index: 3, kind: output, shape index: {}]  }
   0x1   :  { %v39_v0 = vld [vmem:[%s316_s1] sm:$0xf]  ;;  %v16_v2 = vld [vmem:[%s317_s0 + $0x8] sm:$0xff]  ;;  %v17_v14 = vld [vmem:[%s317_s0 + $0x10] sm:$0xff] }
   0x2   :  { %v15_v1 = vld [vmem:[%s317_s0] sm:$0xff]  ;;  %v71_v3 = vsel %vm69_vm0, %v39_v0, 0  ;;  %v20_v6 = vld [vmem:[%s317_s0 + $0x28] sm:$0xff]  ;;  %v18_v15 = vld [vmem:[%s317_s0 + $0x18] sm:$0xff] }
   0x3   :  { %v31_v4 = vpack.c.bf16 %v16_v2, %v15_v1  ;;  %v19_v5 = vld [vmem:[%s317_s0 + $0x20] sm:$0xff]  ;;  %80 = vmatpush.bf16.msra.mxu0 %v71_v3  ;;  %166 = vmatpush.bf16.msra.mxu1 %v71_v3  ;;  %v24_v9 = vld [vmem:[%s317_s0 + $0x48] sm:$0xff]  ;;  %v21_v16 = vld [vmem:[%s317_s0 + $0x30] sm:$0xff]  ;;  %v32_v22 = vpack.c.bf16 %v18_v15, %v17_v14 }
   0x4   :  { %v23_v7 = vld [vmem:[%s317_s0 + $0x40] sm:$0xff]  ;;  %v33_v8 = vpack.c.bf16 %v20_v6, %v19_v5  ;;  %v28_v11 = vld [vmem:[%s317_s0 + $0x68] sm:$0xff]  ;;  %167 = vmatpush.bf16.msra.mxu2 %v71_v3  ;;  %168 = vmatpush.bf16.msra.mxu3 %v71_v3  ;;  %v22_v17 = vld [vmem:[%s317_s0 + $0x38] sm:$0xff] }
   0x5   :  { %v27_v10 = vld [vmem:[%s317_s0 + $0x60] sm:$0xff]  ;;  %v35_v12 = vpack.c.bf16 %v24_v9, %v23_v7  ;;  %v25_v18 = vld [vmem:[%s317_s0 + $0x50] sm:$0xff]  ;;  %v26_v19 = vld [vmem:[%s317_s0 + $0x58] sm:$0xff]  ;;  %v34_v23 = vpack.c.bf16 %v22_v17, %v21_v16 }
   0x6   :  { %v37_v13 = vpack.c.bf16 %v28_v11, %v27_v10  ;;  %158 = vmatmul.msk.bf16.vlgmr.msra.gmra.mxu0 %vm44_vm1, %v31_v4  ;;  %160 = vmatmul.msk.bf16.vlgmr.msra.gmra.mxu1 %vm44_vm1, %v33_v8  ;;  %v29_v20 = vld [vmem:[%s317_s0 + $0x70] sm:$0xff]  ;;  %v30_v21 = vld [vmem:[%s317_s0 + $0x78] sm:$0xff]  ;;  %v36_v24 = vpack.c.bf16 %v26_v19, %v25_v18  ;;  %v169_v26 = vld [vmem:[%s318_s2] ss:$0 sm:$0xff] }
   0x7   :  { %162 = vmatmul.msk.bf16.vlgmr.msra.gmra.mxu2 %vm44_vm1, %v35_v12  ;;  %v38_v25 = vpack.c.bf16 %v30_v21, %v29_v20 }
   0x8   :  { %164 = vmatmul.msk.bf16.vlgmr.msra.gmra.mxu3 %vm44_vm1, %v37_v13 }
  0x16   :  { %159 = vmatmul.msk.bf16.gmra.mxu0 %vm44_vm1, %v32_v22  ;;  %161 = vmatmul.msk.bf16.gmra.mxu1 %vm44_vm1, %v34_v23 }
  0x17   :  { %163 = vmatmul.msk.bf16.gmra.mxu2 %vm44_vm1, %v36_v24 }
  0x18   :  { %165 = vmatmul.msk.bf16.gmra.mxu3 %vm44_vm1, %v38_v25 }
  0x83   :  { %v82_v27 = vpop.f32.mrf.mxu0  ;;  %v92_v28 = vpop.f32.mrf.mxu1 }
  0x84   :  { %v83_v29 = vadd.f32 %v169_v26, %v82_v27  ;;  %v93_v30 = vadd.f32 %v169_v26, %v92_v28 }
  0x86   :  { %v122_v31 = vmax.f32 %v83_v29, 0.0  ;;  %v126_v32 = vmax.f32 %v93_v30, 0.0 }
  0x88   :  { %138 = vst.msk [vmem:[%s319_s3] sm:$0xff] %vm44_vm1, %v122_v31 }
  0x89   :  { %142 = vst.msk [vmem:[%s319_s3 + $0x20] sm:$0xff] %vm44_vm1, %v126_v32 }
  0x8a   :  { %v102_v33 = vpop.f32.mrf.mxu2 }
  0x8b   :  { %v112_v34 = vpop.f32.mrf.mxu3  ;;  %v103_v35 = vadd.f32 %v169_v26, %v102_v33  ;;  %v84_v37 = vpop.f32.mrf.mxu0 }
  0x8c   :  { %v113_v36 = vadd.f32 %v169_v26, %v112_v34  ;;  %v94_v38 = vpop.f32.mrf.mxu1  ;;  %v85_v39 = vadd.f32 %v169_v26, %v84_v37 }
  0x8d   :  { %v95_v40 = vadd.f32 %v169_v26, %v94_v38  ;;  %v130_v41 = vmax.f32 %v103_v35, 0.0 }
  0x8e   :  { %v134_v42 = vmax.f32 %v113_v36, 0.0  ;;  %v123_v43 = vmax.f32 %v85_v39, 0.0 }
  0x8f   :  { %v127_v44 = vmax.f32 %v95_v40, 0.0  ;;  %146 = vst.msk [vmem:[%s319_s3 + $0x40] sm:$0xff] %vm44_vm1, %v130_v41 }
  0x90   :  { %150 = vst.msk [vmem:[%s319_s3 + $0x60] sm:$0xff] %vm44_vm1, %v134_v42 }
  0x91   :  { %139 = vst.msk [vmem:[%s319_s3 + $0x8] sm:$0xff] %vm44_vm1, %v123_v43 }
  0x92   :  { %143 = vst.msk [vmem:[%s319_s3 + $0x28] sm:$0xff] %vm44_vm1, %v127_v44  ;;  %v104_v45 = vpop.f32.mrf.mxu2 }
  0x93   :  { %v114_v46 = vpop.f32.mrf.mxu3  ;;  %v105_v47 = vadd.f32 %v169_v26, %v104_v45  ;;  %v87_v49 = vpop.f32.mrf.mxu0 }
  0x94   :  { %v115_v48 = vadd.f32 %v169_v26, %v114_v46  ;;  %v97_v50 = vpop.f32.mrf.mxu1  ;;  %v88_v51 = vadd.f32 %v169_v26, %v87_v49 }
  0x95   :  { %v98_v52 = vadd.f32 %v169_v26, %v97_v50  ;;  %v131_v53 = vmax.f32 %v105_v47, 0.0 }
  0x96   :  { %v135_v54 = vmax.f32 %v115_v48, 0.0  ;;  %v124_v55 = vmax.f32 %v88_v51, 0.0 }
  0x97   :  { %v128_v56 = vmax.f32 %v98_v52, 0.0  ;;  %147 = vst.msk [vmem:[%s319_s3 + $0x48] sm:$0xff] %vm44_vm1, %v131_v53 }
  0x98   :  { %151 = vst.msk [vmem:[%s319_s3 + $0x68] sm:$0xff] %vm44_vm1, %v135_v54 }
  0x99   :  { %140 = vst.msk [vmem:[%s319_s3 + $0x10] sm:$0xff] %vm44_vm1, %v124_v55 }
  0x9a   :  { %144 = vst.msk [vmem:[%s319_s3 + $0x30] sm:$0xff] %vm44_vm1, %v128_v56  ;;  %v107_v57 = vpop.f32.mrf.mxu2 }
  0x9b   :  { %v117_v58 = vpop.f32.mrf.mxu3  ;;  %v108_v59 = vadd.f32 %v169_v26, %v107_v57  ;;  %v89_v61 = vpop.f32.mrf.mxu0 }
  0x9c   :  { %v118_v60 = vadd.f32 %v169_v26, %v117_v58  ;;  %v99_v62 = vpop.f32.mrf.mxu1  ;;  %v90_v63 = vadd.f32 %v169_v26, %v89_v61 }
  0x9d   :  { %v100_v0 = vadd.f32 %v169_v26, %v99_v62  ;;  %v132_v1 = vmax.f32 %v108_v59, 0.0 }
  0x9e   :  { %v136_v2 = vmax.f32 %v118_v60, 0.0  ;;  %v125_v3 = vmax.f32 %v90_v63, 0.0 }
  0x9f   :  { %v129_v4 = vmax.f32 %v100_v0, 0.0  ;;  %148 = vst.msk [vmem:[%s319_s3 + $0x50] sm:$0xff] %vm44_vm1, %v132_v1 }
  0xa0   :  { %152 = vst.msk [vmem:[%s319_s3 + $0x70] sm:$0xff] %vm44_vm1, %v136_v2 }
  0xa1   :  { %141 = vst.msk [vmem:[%s319_s3 + $0x18] sm:$0xff] %vm44_vm1, %v125_v3 }
  0xa2   :  { %145 = vst.msk [vmem:[%s319_s3 + $0x38] sm:$0xff] %vm44_vm1, %v129_v4  ;;  %v109_v5 = vpop.f32.mrf.mxu2 }
  0xa3   :  { %v119_v6 = vpop.f32.mrf.mxu3  ;;  %v110_v7 = vadd.f32 %v169_v26, %v109_v5 }
  0xa4   :  { %v120_v8 = vadd.f32 %v169_v26, %v119_v6 }
  0xa5   :  { %v133_v9 = vmax.f32 %v110_v7, 0.0 }
  0xa6   :  { %v137_v10 = vmax.f32 %v120_v8, 0.0 }
  0xa7   :  { %149 = vst.msk [vmem:[%s319_s3 + $0x58] sm:$0xff] %vm44_vm1, %v133_v9 }
  0xa8   :  { %153 = vst.msk [vmem:[%s319_s3 + $0x78] sm:$0xff] %vm44_vm1, %v137_v10 }

// kernel: cell_stem0_forward.26
= control target key start
LH: loop header
LB: loop body
LE: loop exit
PB: predicated region body
PF: predicated region fallthrough
CT: control target
= control target key end

     0   :  { %vm69_vm0 = vcmask 1043456   ;;  %vm44_vm1 = vcmask 64512   ;;  %s300_s1 = inlined_call_operand.vmem [shape: bf16[8,8], index: 1, kind: input, shape index: {}]   ;;  %s301_s0 = inlined_call_operand.vmem [shape: f32[128,8], index: 0, kind: input, shape index: {}]   ;;  %s302_s2 = inlined_call_operand.vmem [shape: f32[1,8], index: 2, kind: input, shape index: {}]   ;;  %s303_s3 = inlined_call_operand.vmem [shape: f32[128,8], index: 3, kind: output, shape index: {}]  }
   0x1   :  { %v39_v0 = vld [vmem:[%s300_s1] sm:$0xf]  ;;  %v16_v2 = vld [vmem:[%s301_s0 + $0x8] sm:$0xff]  ;;  %v17_v14 = vld [vmem:[%s301_s0 + $0x10] sm:$0xff] }
   0x2   :  { %v15_v1 = vld [vmem:[%s301_s0] sm:$0xff]  ;;  %v71_v3 = vsel %vm69_vm0, %v39_v0, 0  ;;  %v20_v6 = vld [vmem:[%s301_s0 + $0x28] sm:$0xff]  ;;  %v18_v15 = vld [vmem:[%s301_s0 + $0x18] sm:$0xff] }
   0x3   :  { %v31_v4 = vpack.c.bf16 %v16_v2, %v15_v1  ;;  %v19_v5 = vld [vmem:[%s301_s0 + $0x20] sm:$0xff]  ;;  %80 = vmatpush.bf16.msra.mxu0 %v71_v3  ;;  %150 = vmatpush.bf16.msra.mxu1 %v71_v3  ;;  %v24_v9 = vld [vmem:[%s301_s0 + $0x48] sm:$0xff]  ;;  %v21_v16 = vld [vmem:[%s301_s0 + $0x30] sm:$0xff]  ;;  %v32_v22 = vpack.c.bf16 %v18_v15, %v17_v14 }
   0x4   :  { %v23_v7 = vld [vmem:[%s301_s0 + $0x40] sm:$0xff]  ;;  %v33_v8 = vpack.c.bf16 %v20_v6, %v19_v5  ;;  %v28_v11 = vld [vmem:[%s301_s0 + $0x68] sm:$0xff]  ;;  %151 = vmatpush.bf16.msra.mxu2 %v71_v3  ;;  %152 = vmatpush.bf16.msra.mxu3 %v71_v3  ;;  %v22_v17 = vld [vmem:[%s301_s0 + $0x38] sm:$0xff] }
   0x5   :  { %v27_v10 = vld [vmem:[%s301_s0 + $0x60] sm:$0xff]  ;;  %v35_v12 = vpack.c.bf16 %v24_v9, %v23_v7  ;;  %v25_v18 = vld [vmem:[%s301_s0 + $0x50] sm:$0xff]  ;;  %v26_v19 = vld [vmem:[%s301_s0 + $0x58] sm:$0xff]  ;;  %v34_v23 = vpack.c.bf16 %v22_v17, %v21_v16 }
   0x6   :  { %v37_v13 = vpack.c.bf16 %v28_v11, %v27_v10  ;;  %142 = vmatmul.msk.bf16.vlgmr.msra.gmra.mxu0 %vm44_vm1, %v31_v4  ;;  %144 = vmatmul.msk.bf16.vlgmr.msra.gmra.mxu1 %vm44_vm1, %v33_v8  ;;  %v29_v20 = vld [vmem:[%s301_s0 + $0x70] sm:$0xff]  ;;  %v30_v21 = vld [vmem:[%s301_s0 + $0x78] sm:$0xff]  ;;  %v36_v24 = vpack.c.bf16 %v26_v19, %v25_v18  ;;  %v153_v26 = vld [vmem:[%s302_s2] ss:$0 sm:$0xff] }
   0x7   :  { %146 = vmatmul.msk.bf16.vlgmr.msra.gmra.mxu2 %vm44_vm1, %v35_v12  ;;  %v38_v25 = vpack.c.bf16 %v30_v21, %v29_v20 }
   0x8   :  { %148 = vmatmul.msk.bf16.vlgmr.msra.gmra.mxu3 %vm44_vm1, %v37_v13 }
  0x16   :  { %143 = vmatmul.msk.bf16.gmra.mxu0 %vm44_vm1, %v32_v22  ;;  %145 = vmatmul.msk.bf16.gmra.mxu1 %vm44_vm1, %v34_v23 }
  0x17   :  { %147 = vmatmul.msk.bf16.gmra.mxu2 %vm44_vm1, %v36_v24 }
  0x18   :  { %149 = vmatmul.msk.bf16.gmra.mxu3 %vm44_vm1, %v38_v25 }
  0x83   :  { %v82_v27 = vpop.f32.mrf.mxu0  ;;  %v92_v28 = vpop.f32.mrf.mxu1 }
  0x84   :  { %v83_v29 = vadd.f32 %v153_v26, %v82_v27  ;;  %v93_v30 = vadd.f32 %v153_v26, %v92_v28 }
  0x86   :  { %122 = vst.msk [vmem:[%s303_s3] sm:$0xff] %vm44_vm1, %v83_v29 }
  0x87   :  { %126 = vst.msk [vmem:[%s303_s3 + $0x20] sm:$0xff] %vm44_vm1, %v93_v30 }
  0x8a   :  { %v102_v31 = vpop.f32.mrf.mxu2 }
  0x8b   :  { %v112_v32 = vpop.f32.mrf.mxu3  ;;  %v103_v33 = vadd.f32 %v153_v26, %v102_v31  ;;  %v84_v35 = vpop.f32.mrf.mxu0 }
  0x8c   :  { %v113_v34 = vadd.f32 %v153_v26, %v112_v32  ;;  %v94_v36 = vpop.f32.mrf.mxu1  ;;  %v85_v37 = vadd.f32 %v153_v26, %v84_v35 }
  0x8d   :  { %v95_v38 = vadd.f32 %v153_v26, %v94_v36  ;;  %130 = vst.msk [vmem:[%s303_s3 + $0x40] sm:$0xff] %vm44_vm1, %v103_v33 }
  0x8e   :  { %134 = vst.msk [vmem:[%s303_s3 + $0x60] sm:$0xff] %vm44_vm1, %v113_v34 }
  0x8f   :  { %123 = vst.msk [vmem:[%s303_s3 + $0x8] sm:$0xff] %vm44_vm1, %v85_v37 }
  0x90   :  { %127 = vst.msk [vmem:[%s303_s3 + $0x28] sm:$0xff] %vm44_vm1, %v95_v38 }
  0x92   :  { %v104_v39 = vpop.f32.mrf.mxu2 }
  0x93   :  { %v114_v40 = vpop.f32.mrf.mxu3  ;;  %v105_v41 = vadd.f32 %v153_v26, %v104_v39  ;;  %v87_v43 = vpop.f32.mrf.mxu0 }
  0x94   :  { %v115_v42 = vadd.f32 %v153_v26, %v114_v40  ;;  %v97_v44 = vpop.f32.mrf.mxu1  ;;  %v88_v45 = vadd.f32 %v153_v26, %v87_v43 }
  0x95   :  { %v98_v46 = vadd.f32 %v153_v26, %v97_v44  ;;  %131 = vst.msk [vmem:[%s303_s3 + $0x48] sm:$0xff] %vm44_vm1, %v105_v41 }
  0x96   :  { %135 = vst.msk [vmem:[%s303_s3 + $0x68] sm:$0xff] %vm44_vm1, %v115_v42 }
  0x97   :  { %124 = vst.msk [vmem:[%s303_s3 + $0x10] sm:$0xff] %vm44_vm1, %v88_v45 }
  0x98   :  { %128 = vst.msk [vmem:[%s303_s3 + $0x30] sm:$0xff] %vm44_vm1, %v98_v46 }
  0x9a   :  { %v107_v47 = vpop.f32.mrf.mxu2 }
  0x9b   :  { %v117_v48 = vpop.f32.mrf.mxu3  ;;  %v108_v49 = vadd.f32 %v153_v26, %v107_v47  ;;  %v89_v51 = vpop.f32.mrf.mxu0 }
  0x9c   :  { %v118_v50 = vadd.f32 %v153_v26, %v117_v48  ;;  %v99_v52 = vpop.f32.mrf.mxu1  ;;  %v90_v53 = vadd.f32 %v153_v26, %v89_v51 }
  0x9d   :  { %v100_v54 = vadd.f32 %v153_v26, %v99_v52  ;;  %132 = vst.msk [vmem:[%s303_s3 + $0x50] sm:$0xff] %vm44_vm1, %v108_v49 }
  0x9e   :  { %136 = vst.msk [vmem:[%s303_s3 + $0x70] sm:$0xff] %vm44_vm1, %v118_v50 }
  0x9f   :  { %125 = vst.msk [vmem:[%s303_s3 + $0x18] sm:$0xff] %vm44_vm1, %v90_v53 }
  0xa0   :  { %129 = vst.msk [vmem:[%s303_s3 + $0x38] sm:$0xff] %vm44_vm1, %v100_v54 }
  0xa2   :  { %v109_v55 = vpop.f32.mrf.mxu2 }
  0xa3   :  { %v119_v56 = vpop.f32.mrf.mxu3  ;;  %v110_v57 = vadd.f32 %v153_v26, %v109_v55 }
  0xa4   :  { %v120_v58 = vadd.f32 %v153_v26, %v119_v56 }
  0xa5   :  { %133 = vst.msk [vmem:[%s303_s3 + $0x58] sm:$0xff] %vm44_vm1, %v110_v57 }
  0xa6   :  { %137 = vst.msk [vmem:[%s303_s3 + $0x78] sm:$0xff] %vm44_vm1, %v120_v58 }

// kernel: cell_stem0_forward.30
= control target key start
LH: loop header
LB: loop body
LE: loop exit
PB: predicated region body
PF: predicated region fallthrough
CT: control target
= control target key end

     0   :  { %vm54_vm0 = vcmask 130048   ;;  %s414_s1 = inlined_call_operand.vmem [shape: bf16[16,16], index: 1, kind: input, shape index: {}]   ;;  %s415_s0 = inlined_call_operand.vmem [shape: f32[128,16], index: 0, kind: input, shape index: {}]   ;;  %s416_s2 = inlined_call_operand.vmem [shape: f32[1,16], index: 2, kind: input, shape index: {}]   ;;  %s417_s3 = inlined_call_operand.vmem [shape: f32[128,16], index: 3, kind: input, shape index: {}]   ;;  %s418_s4 = inlined_call_operand.vmem [shape: f32[128,16], index: 4, kind: output, shape index: {}]  }
   0x1   :  { %v192_v0 = vld [vmem:[%s414_s1] sm:$0xff]  ;;  %v19_v2 = vld [vmem:[%s415_s0 + $0x8] sm:$0xff]  ;;  %v20_v13 = vld [vmem:[%s415_s0 + $0x10] sm:$0xff] }
   0x2   :  { %v18_v1 = vld [vmem:[%s415_s0] sm:$0xff]  ;;  %v23_v5 = vld [vmem:[%s415_s0 + $0x28] sm:$0xff]  ;;  %86 = vmatpush.bf16.msra.mxu0 %v192_v0  ;;  %193 = vmatpush.bf16.msra.mxu1 %v192_v0  ;;  %v21_v14 = vld [vmem:[%s415_s0 + $0x18] sm:$0xff] }
   0x3   :  { %v34_v3 = vpack.c.bf16 %v19_v2, %v18_v1  ;;  %v22_v4 = vld [vmem:[%s415_s0 + $0x20] sm:$0xff]  ;;  %v27_v8 = vld [vmem:[%s415_s0 + $0x48] sm:$0xff]  ;;  %194 = vmatpush.bf16.msra.mxu2 %v192_v0  ;;  %195 = vmatpush.bf16.msra.mxu3 %v192_v0  ;;  %v24_v15 = vld [vmem:[%s415_s0 + $0x30] sm:$0xff]  ;;  %v35_v21 = vpack.c.bf16 %v21_v14, %v20_v13 }
   0x4   :  { %v26_v6 = vld [vmem:[%s415_s0 + $0x40] sm:$0xff]  ;;  %v36_v7 = vpack.c.bf16 %v23_v5, %v22_v4  ;;  %v31_v10 = vld [vmem:[%s415_s0 + $0x68] sm:$0xff]  ;;  %v25_v16 = vld [vmem:[%s415_s0 + $0x38] sm:$0xff] }
   0x5   :  { %v30_v9 = vld [vmem:[%s415_s0 + $0x60] sm:$0xff]  ;;  %v38_v11 = vpack.c.bf16 %v27_v8, %v26_v6  ;;  %184 = vmatmul.msk.bf16.vlgmr.msra.gmra.mxu0 %vm54_vm0, %v34_v3  ;;  %v28_v17 = vld [vmem:[%s415_s0 + $0x50] sm:$0xff]  ;;  %v29_v18 = vld [vmem:[%s415_s0 + $0x58] sm:$0xff]  ;;  %v37_v22 = vpack.c.bf16 %v25_v16, %v24_v15 }
   0x6   :  { %v40_v12 = vpack.c.bf16 %v31_v10, %v30_v9  ;;  %186 = vmatmul.msk.bf16.vlgmr.msra.gmra.mxu1 %vm54_vm0, %v36_v7  ;;  %v32_v19 = vld [vmem:[%s415_s0 + $0x70] sm:$0xff]  ;;  %v33_v20 = vld [vmem:[%s415_s0 + $0x78] sm:$0xff]  ;;  %v39_v23 = vpack.c.bf16 %v29_v18, %v28_v17  ;;  %v284_v25 = vld [vmem:[%s416_s2] ss:$0 sm:$0xff] }
   0x7   :  { %188 = vmatmul.msk.bf16.vlgmr.msra.gmra.mxu2 %vm54_vm0, %v38_v11  ;;  %v41_v24 = vpack.c.bf16 %v33_v20, %v32_v19  ;;  %v128_v27 = vld [vmem:[%s417_s3] sm:$0xff]  ;;  %v129_v41 = vld [vmem:[%s417_s3 + $0x8] sm:$0xff]  ;;  %v130_v57 = vld [vmem:[%s417_s3 + $0x10] sm:$0xff] }
   0x8   :  { %190 = vmatmul.msk.bf16.vlgmr.msra.gmra.mxu3 %vm54_vm0, %v40_v12  ;;  %v132_v29 = vld [vmem:[%s417_s3 + $0x20] sm:$0xff]  ;;  %v133_v43 = vld [vmem:[%s417_s3 + $0x28] sm:$0xff]  ;;  %v134_v59 = vld [vmem:[%s417_s3 + $0x30] sm:$0xff] }
   0x9   :  { %v136_v35 = vld [vmem:[%s417_s3 + $0x40] sm:$0xff]  ;;  %v137_v51 = vld [vmem:[%s417_s3 + $0x48] sm:$0xff]  ;;  %v138_v3 = vld [vmem:[%s417_s3 + $0x50] sm:$0xff] }
   0xa   :  { %v140_v37 = vld [vmem:[%s417_s3 + $0x60] sm:$0xff]  ;;  %v141_v53 = vld [vmem:[%s417_s3 + $0x68] sm:$0xff]  ;;  %v142_v5 = vld [vmem:[%s417_s3 + $0x70] sm:$0xff] }
   0xb   :  { %v131_v9 = vld [vmem:[%s417_s3 + $0x18] sm:$0xff] }
   0xc   :  { %v135_v11 = vld [vmem:[%s417_s3 + $0x38] sm:$0xff] }
   0xd   :  { %v139_v19 = vld [vmem:[%s417_s3 + $0x58] sm:$0xff] }
  0x15   :  { %185 = vmatmul.msk.bf16.gmra.mxu0 %vm54_vm0, %v35_v21  ;;  %v143_v21 = vld [vmem:[%s417_s3 + $0x78] sm:$0xff] }
  0x16   :  { %187 = vmatmul.msk.bf16.gmra.mxu1 %vm54_vm0, %v37_v22 }
  0x17   :  { %189 = vmatmul.msk.bf16.gmra.mxu2 %vm54_vm0, %v39_v23 }
  0x18   :  { %191 = vmatmul.msk.bf16.gmra.mxu3 %vm54_vm0, %v41_v24 }
  0x82   :  { %v88_v26 = vpop.f32.mrf.mxu0 }
  0x83   :  { %v98_v28 = vpop.f32.mrf.mxu1  ;;  %v89_v30 = vadd.f32 %v284_v25, %v88_v26 }
  0x84   :  { %v99_v31 = vadd.f32 %v284_v25, %v98_v28 }
  0x85   :  { %v144_v32 = vadd.f32 %v128_v27, %v89_v30 }
  0x86   :  { %v148_v33 = vadd.f32 %v132_v29, %v99_v31 }
  0x87   :  { %160 = vst.msk [vmem:[%s418_s4] sm:$0xff] %vm54_vm0, %v144_v32 }
  0x88   :  { %164 = vst.msk [vmem:[%s418_s4 + $0x20] sm:$0xff] %vm54_vm0, %v148_v33 }
  0x8a   :  { %v108_v34 = vpop.f32.mrf.mxu2  ;;  %v90_v40 = vpop.f32.mrf.mxu0 }
  0x8b   :  { %v118_v36 = vpop.f32.mrf.mxu3  ;;  %v109_v38 = vadd.f32 %v284_v25, %v108_v34  ;;  %v100_v42 = vpop.f32.mrf.mxu1  ;;  %v91_v44 = vadd.f32 %v284_v25, %v90_v40 }
  0x8c   :  { %v119_v39 = vadd.f32 %v284_v25, %v118_v36  ;;  %v101_v45 = vadd.f32 %v284_v25, %v100_v42 }
  0x8d   :  { %v152_v46 = vadd.f32 %v136_v35, %v109_v38  ;;  %v145_v48 = vadd.f32 %v129_v41, %v91_v44 }
  0x8e   :  { %v156_v47 = vadd.f32 %v140_v37, %v119_v39  ;;  %v149_v49 = vadd.f32 %v133_v43, %v101_v45 }
  0x8f   :  { %168 = vst.msk [vmem:[%s418_s4 + $0x40] sm:$0xff] %vm54_vm0, %v152_v46 }
  0x90   :  { %172 = vst.msk [vmem:[%s418_s4 + $0x60] sm:$0xff] %vm54_vm0, %v156_v47 }
  0x91   :  { %161 = vst.msk [vmem:[%s418_s4 + $0x8] sm:$0xff] %vm54_vm0, %v145_v48 }
  0x92   :  { %165 = vst.msk [vmem:[%s418_s4 + $0x28] sm:$0xff] %vm54_vm0, %v149_v49  ;;  %v110_v50 = vpop.f32.mrf.mxu2  ;;  %v93_v56 = vpop.f32.mrf.mxu0 }
  0x93   :  { %v120_v52 = vpop.f32.mrf.mxu3  ;;  %v111_v54 = vadd.f32 %v284_v25, %v110_v50  ;;  %v103_v58 = vpop.f32.mrf.mxu1  ;;  %v94_v60 = vadd.f32 %v284_v25, %v93_v56 }
  0x94   :  { %v121_v55 = vadd.f32 %v284_v25, %v120_v52  ;;  %v104_v61 = vadd.f32 %v284_v25, %v103_v58 }
  0x95   :  { %v153_v62 = vadd.f32 %v137_v51, %v111_v54  ;;  %v146_v0 = vadd.f32 %v130_v57, %v94_v60 }
  0x96   :  { %v157_v63 = vadd.f32 %v141_v53, %v121_v55  ;;  %v150_v1 = vadd.f32 %v134_v59, %v104_v61 }
  0x97   :  { %169 = vst.msk [vmem:[%s418_s4 + $0x48] sm:$0xff] %vm54_vm0, %v153_v62 }
  0x98   :  { %173 = vst.msk [vmem:[%s418_s4 + $0x68] sm:$0xff] %vm54_vm0, %v157_v63 }
  0x99   :  { %162 = vst.msk [vmem:[%s418_s4 + $0x10] sm:$0xff] %vm54_vm0, %v146_v0 }
  0x9a   :  { %166 = vst.msk [vmem:[%s418_s4 + $0x30] sm:$0xff] %vm54_vm0, %v150_v1  ;;  %v113_v2 = vpop.f32.mrf.mxu2  ;;  %v95_v8 = vpop.f32.mrf.mxu0 }
  0x9b   :  { %v123_v4 = vpop.f32.mrf.mxu3  ;;  %v114_v6 = vadd.f32 %v284_v25, %v113_v2  ;;  %v105_v10 = vpop.f32.mrf.mxu1  ;;  %v96_v12 = vadd.f32 %v284_v25, %v95_v8 }
  0x9c   :  { %v124_v7 = vadd.f32 %v284_v25, %v123_v4  ;;  %v106_v13 = vadd.f32 %v284_v25, %v105_v10 }
  0x9d   :  { %v154_v14 = vadd.f32 %v138_v3, %v114_v6  ;;  %v147_v16 = vadd.f32 %v131_v9, %v96_v12 }
  0x9e   :  { %v158_v15 = vadd.f32 %v142_v5, %v124_v7  ;;  %v151_v17 = vadd.f32 %v135_v11, %v106_v13 }
  0x9f   :  { %170 = vst.msk [vmem:[%s418_s4 + $0x50] sm:$0xff] %vm54_vm0, %v154_v14 }
  0xa0   :  { %174 = vst.msk [vmem:[%s418_s4 + $0x70] sm:$0xff] %vm54_vm0, %v158_v15 }
  0xa1   :  { %163 = vst.msk [vmem:[%s418_s4 + $0x18] sm:$0xff] %vm54_vm0, %v147_v16 }
  0xa2   :  { %167 = vst.msk [vmem:[%s418_s4 + $0x38] sm:$0xff] %vm54_vm0, %v151_v17  ;;  %v115_v18 = vpop.f32.mrf.mxu2 }
  0xa3   :  { %v125_v20 = vpop.f32.mrf.mxu3  ;;  %v116_v22 = vadd.f32 %v284_v25, %v115_v18 }
  0xa4   :  { %v126_v23 = vadd.f32 %v284_v25, %v125_v20 }
  0xa5   :  { %v155_v24 = vadd.f32 %v139_v19, %v116_v22 }
  0xa6   :  { %v159_v26 = vadd.f32 %v143_v21, %v126_v23 }
  0xa7   :  { %171 = vst.msk [vmem:[%s418_s4 + $0x58] sm:$0xff] %vm54_vm0, %v155_v24 }
  0xa8   :  { %175 = vst.msk [vmem:[%s418_s4 + $0x78] sm:$0xff] %vm54_vm0, %v159_v26 }

// kernel: cell_stem0_forward.39
= control target key start
LH: loop header
LB: loop body
LE: loop exit
PB: predicated region body
PF: predicated region fallthrough
CT: control target
= control target key end

     0   :  { %vm72_vm0 = vcmask 1043456   ;;  %vm47_vm1 = vcmask 64512   ;;  %s406_s1 = inlined_call_operand.vmem [shape: bf16[8,8], index: 1, kind: input, shape index: {}]   ;;  %s407_s0 = inlined_call_operand.vmem [shape: f32[128,8], index: 0, kind: input, shape index: {}]   ;;  %s408_s2 = inlined_call_operand.vmem [shape: f32[1,8], index: 2, kind: input, shape index: {}]   ;;  %s409_s3 = inlined_call_operand.vmem [shape: f32[128,8], index: 3, kind: input, shape index: {}]   ;;  %s410_s4 = inlined_call_operand.vmem [shape: f32[128,8], index: 4, kind: output, shape index: {}]  }
   0x1   :  { %v42_v0 = vld [vmem:[%s406_s1] sm:$0xf]  ;;  %v19_v2 = vld [vmem:[%s407_s0 + $0x8] sm:$0xff]  ;;  %v20_v14 = vld [vmem:[%s407_s0 + $0x10] sm:$0xff] }
   0x2   :  { %v18_v1 = vld [vmem:[%s407_s0] sm:$0xff]  ;;  %v74_v3 = vsel %vm72_vm0, %v42_v0, 0  ;;  %v23_v6 = vld [vmem:[%s407_s0 + $0x28] sm:$0xff]  ;;  %v21_v15 = vld [vmem:[%s407_s0 + $0x18] sm:$0xff] }
   0x3   :  { %v34_v4 = vpack.c.bf16 %v19_v2, %v18_v1  ;;  %v22_v5 = vld [vmem:[%s407_s0 + $0x20] sm:$0xff]  ;;  %83 = vmatpush.bf16.msra.mxu0 %v74_v3  ;;  %185 = vmatpush.bf16.msra.mxu1 %v74_v3  ;;  %v27_v9 = vld [vmem:[%s407_s0 + $0x48] sm:$0xff]  ;;  %v24_v16 = vld [vmem:[%s407_s0 + $0x30] sm:$0xff]  ;;  %v35_v22 = vpack.c.bf16 %v21_v15, %v20_v14 }
   0x4   :  { %v26_v7 = vld [vmem:[%s407_s0 + $0x40] sm:$0xff]  ;;  %v36_v8 = vpack.c.bf16 %v23_v6, %v22_v5  ;;  %v31_v11 = vld [vmem:[%s407_s0 + $0x68] sm:$0xff]  ;;  %186 = vmatpush.bf16.msra.mxu2 %v74_v3  ;;  %187 = vmatpush.bf16.msra.mxu3 %v74_v3  ;;  %v25_v17 = vld [vmem:[%s407_s0 + $0x38] sm:$0xff] }
   0x5   :  { %v30_v10 = vld [vmem:[%s407_s0 + $0x60] sm:$0xff]  ;;  %v38_v12 = vpack.c.bf16 %v27_v9, %v26_v7  ;;  %v28_v18 = vld [vmem:[%s407_s0 + $0x50] sm:$0xff]  ;;  %v29_v19 = vld [vmem:[%s407_s0 + $0x58] sm:$0xff]  ;;  %v37_v23 = vpack.c.bf16 %v25_v17, %v24_v16 }
   0x6   :  { %v40_v13 = vpack.c.bf16 %v31_v11, %v30_v10  ;;  %177 = vmatmul.msk.bf16.vlgmr.msra.gmra.mxu0 %vm47_vm1, %v34_v4  ;;  %179 = vmatmul.msk.bf16.vlgmr.msra.gmra.mxu1 %vm47_vm1, %v36_v8  ;;  %v32_v20 = vld [vmem:[%s407_s0 + $0x70] sm:$0xff]  ;;  %v33_v21 = vld [vmem:[%s407_s0 + $0x78] sm:$0xff]  ;;  %v39_v24 = vpack.c.bf16 %v29_v19, %v28_v18  ;;  %v276_v26 = vld [vmem:[%s408_s2] ss:$0 sm:$0xff] }
   0x7   :  { %181 = vmatmul.msk.bf16.vlgmr.msra.gmra.mxu2 %vm47_vm1, %v38_v12  ;;  %v41_v25 = vpack.c.bf16 %v33_v21, %v32_v20  ;;  %v125_v28 = vld [vmem:[%s409_s3] sm:$0xff]  ;;  %v126_v42 = vld [vmem:[%s409_s3 + $0x8] sm:$0xff]  ;;  %v127_v58 = vld [vmem:[%s409_s3 + $0x10] sm:$0xff] }
   0x8   :  { %183 = vmatmul.msk.bf16.vlgmr.msra.gmra.mxu3 %vm47_vm1, %v40_v13  ;;  %v129_v30 = vld [vmem:[%s409_s3 + $0x20] sm:$0xff]  ;;  %v130_v44 = vld [vmem:[%s409_s3 + $0x28] sm:$0xff]  ;;  %v131_v60 = vld [vmem:[%s409_s3 + $0x30] sm:$0xff] }
   0x9   :  { %v133_v36 = vld [vmem:[%s409_s3 + $0x40] sm:$0xff]  ;;  %v134_v52 = vld [vmem:[%s409_s3 + $0x48] sm:$0xff]  ;;  %v135_v4 = vld [vmem:[%s409_s3 + $0x50] sm:$0xff] }
   0xa   :  { %v137_v38 = vld [vmem:[%s409_s3 + $0x60] sm:$0xff]  ;;  %v138_v54 = vld [vmem:[%s409_s3 + $0x68] sm:$0xff]  ;;  %v139_v6 = vld [vmem:[%s409_s3 + $0x70] sm:$0xff] }
   0xb   :  { %v128_v10 = vld [vmem:[%s409_s3 + $0x18] sm:$0xff] }
   0xc   :  { %v132_v12 = vld [vmem:[%s409_s3 + $0x38] sm:$0xff] }
   0xd   :  { %v136_v20 = vld [vmem:[%s409_s3 + $0x58] sm:$0xff] }
  0x16   :  { %178 = vmatmul.msk.bf16.gmra.mxu0 %vm47_vm1, %v35_v22  ;;  %180 = vmatmul.msk.bf16.gmra.mxu1 %vm47_vm1, %v37_v23  ;;  %v140_v22 = vld [vmem:[%s409_s3 + $0x78] sm:$0xff] }
  0x17   :  { %182 = vmatmul.msk.bf16.gmra.mxu2 %vm47_vm1, %v39_v24 }
  0x18   :  { %184 = vmatmul.msk.bf16.gmra.mxu3 %vm47_vm1, %v41_v25 }
  0x83   :  { %v85_v27 = vpop.f32.mrf.mxu0  ;;  %v95_v29 = vpop.f32.mrf.mxu1 }
  0x84   :  { %v86_v31 = vadd.f32 %v276_v26, %v85_v27  ;;  %v96_v32 = vadd.f32 %v276_v26, %v95_v29 }
  0x86   :  { %v141_v33 = vadd.f32 %v125_v28, %v86_v31  ;;  %v145_v34 = vadd.f32 %v129_v30, %v96_v32 }
  0x88   :  { %157 = vst.msk [vmem:[%s410_s4] sm:$0xff] %vm47_vm1, %v141_v33 }
  0x89   :  { %161 = vst.msk [vmem:[%s410_s4 + $0x20] sm:$0xff] %vm47_vm1, %v145_v34 }
  0x8a   :  { %v105_v35 = vpop.f32.mrf.mxu2 }
  0x8b   :  { %v115_v37 = vpop.f32.mrf.mxu3  ;;  %v106_v39 = vadd.f32 %v276_v26, %v105_v35  ;;  %v87_v41 = vpop.f32.mrf.mxu0 }
  0x8c   :  { %v116_v40 = vadd.f32 %v276_v26, %v115_v37  ;;  %v97_v43 = vpop.f32.mrf.mxu1  ;;  %v88_v45 = vadd.f32 %v276_v26, %v87_v41 }
  0x8d   :  { %v98_v46 = vadd.f32 %v276_v26, %v97_v43  ;;  %v149_v47 = vadd.f32 %v133_v36, %v106_v39 }
  0x8e   :  { %v153_v48 = vadd.f32 %v137_v38, %v116_v40  ;;  %v142_v49 = vadd.f32 %v126_v42, %v88_v45 }
  0x8f   :  { %v146_v50 = vadd.f32 %v130_v44, %v98_v46  ;;  %165 = vst.msk [vmem:[%s410_s4 + $0x40] sm:$0xff] %vm47_vm1, %v149_v47 }
  0x90   :  { %169 = vst.msk [vmem:[%s410_s4 + $0x60] sm:$0xff] %vm47_vm1, %v153_v48 }
  0x91   :  { %158 = vst.msk [vmem:[%s410_s4 + $0x8] sm:$0xff] %vm47_vm1, %v142_v49 }
  0x92   :  { %162 = vst.msk [vmem:[%s410_s4 + $0x28] sm:$0xff] %vm47_vm1, %v146_v50  ;;  %v107_v51 = vpop.f32.mrf.mxu2 }
  0x93   :  { %v117_v53 = vpop.f32.mrf.mxu3  ;;  %v108_v55 = vadd.f32 %v276_v26, %v107_v51  ;;  %v90_v57 = vpop.f32.mrf.mxu0 }
  0x94   :  { %v118_v56 = vadd.f32 %v276_v26, %v117_v53  ;;  %v100_v59 = vpop.f32.mrf.mxu1  ;;  %v91_v61 = vadd.f32 %v276_v26, %v90_v57 }
  0x95   :  { %v101_v62 = vadd.f32 %v276_v26, %v100_v59  ;;  %v150_v63 = vadd.f32 %v134_v52, %v108_v55 }
  0x96   :  { %v154_v0 = vadd.f32 %v138_v54, %v118_v56  ;;  %v143_v1 = vadd.f32 %v127_v58, %v91_v61 }
  0x97   :  { %v147_v2 = vadd.f32 %v131_v60, %v101_v62  ;;  %166 = vst.msk [vmem:[%s410_s4 + $0x48] sm:$0xff] %vm47_vm1, %v150_v63 }
  0x98   :  { %170 = vst.msk [vmem:[%s410_s4 + $0x68] sm:$0xff] %vm47_vm1, %v154_v0 }
  0x99   :  { %159 = vst.msk [vmem:[%s410_s4 + $0x10] sm:$0xff] %vm47_vm1, %v143_v1 }
  0x9a   :  { %163 = vst.msk [vmem:[%s410_s4 + $0x30] sm:$0xff] %vm47_vm1, %v147_v2  ;;  %v110_v3 = vpop.f32.mrf.mxu2 }
  0x9b   :  { %v120_v5 = vpop.f32.mrf.mxu3  ;;  %v111_v7 = vadd.f32 %v276_v26, %v110_v3  ;;  %v92_v9 = vpop.f32.mrf.mxu0 }
  0x9c   :  { %v121_v8 = vadd.f32 %v276_v26, %v120_v5  ;;  %v102_v11 = vpop.f32.mrf.mxu1  ;;  %v93_v13 = vadd.f32 %v276_v26, %v92_v9 }
  0x9d   :  { %v103_v14 = vadd.f32 %v276_v26, %v102_v11  ;;  %v151_v15 = vadd.f32 %v135_v4, %v111_v7 }
  0x9e   :  { %v155_v16 = vadd.f32 %v139_v6, %v121_v8  ;;  %v144_v17 = vadd.f32 %v128_v10, %v93_v13 }
  0x9f   :  { %v148_v18 = vadd.f32 %v132_v12, %v103_v14  ;;  %167 = vst.msk [vmem:[%s410_s4 + $0x50] sm:$0xff] %vm47_vm1, %v151_v15 }
  0xa0   :  { %171 = vst.msk [vmem:[%s410_s4 + $0x70] sm:$0xff] %vm47_vm1, %v155_v16 }
  0xa1   :  { %160 = vst.msk [vmem:[%s410_s4 + $0x18] sm:$0xff] %vm47_vm1, %v144_v17 }
  0xa2   :  { %164 = vst.msk [vmem:[%s410_s4 + $0x38] sm:$0xff] %vm47_vm1, %v148_v18  ;;  %v112_v19 = vpop.f32.mrf.mxu2 }
  0xa3   :  { %v122_v21 = vpop.f32.mrf.mxu3  ;;  %v113_v23 = vadd.f32 %v276_v26, %v112_v19 }
  0xa4   :  { %v123_v24 = vadd.f32 %v276_v26, %v122_v21 }
  0xa5   :  { %v152_v25 = vadd.f32 %v136_v20, %v113_v23 }
  0xa6   :  { %v156_v27 = vadd.f32 %v140_v22, %v123_v24 }
  0xa7   :  { %168 = vst.msk [vmem:[%s410_s4 + $0x58] sm:$0xff] %vm47_vm1, %v152_v25 }
  0xa8   :  { %172 = vst.msk [vmem:[%s410_s4 + $0x78] sm:$0xff] %vm47_vm1, %v156_v27 }

// kernel: cell_stem0_forward.36
= control target key start
LH: loop header
LB: loop body
LE: loop exit
PB: predicated region body
PF: predicated region fallthrough
CT: control target
= control target key end

     0   :  { %vm104_vm0 = vcmask 1043456   ;;  %vm79_vm1 = vcmask 588800   ;;  %vm157_vm2 = vcmask 64512   ;;  %s380_s1 = inlined_call_operand.vmem [shape: bf16[72,8], index: 1, kind: input, shape index: {}]   ;;  %s381_s2 = inlined_call_operand.vmem [shape: f32[1,8], index: 2, kind: input, shape index: {}]   ;;  %s382_s0 = inlined_call_operand.vmem [shape: f32[128,72], index: 0, kind: input, shape index: {}]   ;;  %s383_s3 = inlined_call_operand.vmem [shape: f32[128,8], index: 3, kind: output, shape index: {}]  }
   0x1   :  { %v47_v0 = vld [vmem:[%s380_s1 + $0x20] sm:$0xf]  ;;  %v205_v4 = vld [vmem:[%s380_s1 + $0x18] sm:$0xff]  ;;  %v204_v5 = vld [vmem:[%s380_s1 + $0x10] sm:$0xff] }
   0x2   :  { %v69_v1 = vunpack.c.l.b16 %v47_v0  ;;  %v203_v6 = vld [vmem:[%s380_s1 + $0x8] sm:$0xff]  ;;  %v202_v7 = vld [vmem:[%s380_s1] sm:$0xff]  ;;  %v17_v20 = vld [vmem:[%s382_s0 + $0x10] sm:$0xff] }
   0x3   :  { %v15_v8 = vld [vmem:[%s382_s0] sm:$0xff]  ;;  %v16_v9 = vld [vmem:[%s382_s0 + $0x8] sm:$0xff]  ;;  %v18_v21 = vld [vmem:[%s382_s0 + $0x18] sm:$0xff] }
   0x4   :  { %v74_v2 = vpack.c.b16 %v69_v1, %v69_v1  ;;  %v19_v10 = vld [vmem:[%s382_s0 + $0x20] sm:$0xff]  ;;  %v20_v11 = vld [vmem:[%s382_s0 + $0x28] sm:$0xff]  ;;  %v31_v16 = vpack.c.bf16 %v16_v9, %v15_v8  ;;  %v21_v22 = vld [vmem:[%s382_s0 + $0x30] sm:$0xff]  ;;  %v32_v28 = vpack.c.bf16 %v18_v21, %v17_v20 }
   0x5   :  { %v23_v12 = vld [vmem:[%s382_s0 + $0x40] sm:$0xff]  ;;  %v24_v13 = vld [vmem:[%s382_s0 + $0x48] sm:$0xff]  ;;  %v33_v17 = vpack.c.bf16 %v20_v11, %v19_v10  ;;  %v22_v23 = vld [vmem:[%s382_s0 + $0x38] sm:$0xff] }
   0x6   :  { %v106_v3 = vsel %vm104_vm0, %v74_v2, 0  ;;  %v27_v14 = vld [vmem:[%s382_s0 + $0x60] sm:$0xff]  ;;  %v28_v15 = vld [vmem:[%s382_s0 + $0x68] sm:$0xff]  ;;  %v35_v18 = vpack.c.bf16 %v24_v13, %v23_v12  ;;  %v25_v24 = vld [vmem:[%s382_s0 + $0x50] sm:$0xff]  ;;  %v34_v29 = vpack.c.bf16 %v22_v23, %v21_v22 }
   0x7   :  { %111 = vmatpush.bf16.msra.mxu0 %v106_v3  ;;  %206 = vmatpush.bf16.msra.mxu1 %v106_v3  ;;  %v37_v19 = vpack.c.bf16 %v28_v15, %v27_v14  ;;  %v26_v25 = vld [vmem:[%s382_s0 + $0x58] sm:$0xff]  ;;  %v29_v26 = vld [vmem:[%s382_s0 + $0x70] sm:$0xff]  ;;  %v221_v32 = vld [vmem:[%s381_s2] ss:$0 sm:$0xff] }
   0x8   :  { %207 = vmatpush.bf16.msra.mxu2 %v106_v3  ;;  %208 = vmatpush.bf16.msra.mxu3 %v106_v3  ;;  %v30_v27 = vld [vmem:[%s382_s0 + $0x78] sm:$0xff]  ;;  %v36_v30 = vpack.c.bf16 %v26_v25, %v25_v24 }
   0x9   :  { %v38_v31 = vpack.c.bf16 %v30_v27, %v29_v26 }
   0xb   :  { %112 = vmatpush.bf16.msra.mxu0 %v205_v4  ;;  %209 = vmatpush.bf16.msra.mxu1 %v205_v4 }
   0xc   :  { %210 = vmatpush.bf16.msra.mxu2 %v205_v4  ;;  %211 = vmatpush.bf16.msra.mxu3 %v205_v4 }
   0xf   :  { %113 = vmatpush.bf16.msra.mxu0 %v204_v5  ;;  %212 = vmatpush.bf16.msra.mxu1 %v204_v5 }
  0x10   :  { %213 = vmatpush.bf16.msra.mxu2 %v204_v5  ;;  %214 = vmatpush.bf16.msra.mxu3 %v204_v5 }
  0x13   :  { %114 = vmatpush.bf16.msra.mxu0 %v203_v6  ;;  %215 = vmatpush.bf16.msra.mxu1 %v203_v6 }
  0x14   :  { %216 = vmatpush.bf16.msra.mxu2 %v203_v6  ;;  %217 = vmatpush.bf16.msra.mxu3 %v203_v6 }
  0x17   :  { %115 = vmatpush.bf16.msra.mxu0 %v202_v7  ;;  %218 = vmatpush.bf16.msra.mxu1 %v202_v7 }
  0x18   :  { %219 = vmatpush.bf16.msra.mxu2 %v202_v7  ;;  %220 = vmatpush.bf16.msra.mxu3 %v202_v7 }
  0x1a   :  { %194 = vmatmul.msk.bf16.vlgmr.msra.gmra.mxu0 %vm79_vm1, %v31_v16  ;;  %196 = vmatmul.msk.bf16.vlgmr.msra.gmra.mxu1 %vm79_vm1, %v33_v17 }
  0x1b   :  { %198 = vmatmul.msk.bf16.vlgmr.msra.gmra.mxu2 %vm79_vm1, %v35_v18  ;;  %200 = vmatmul.msk.bf16.vlgmr.msra.gmra.mxu3 %vm79_vm1, %v37_v19 }
  0x2a   :  { %195 = vmatmul.msk.bf16.gmra.mxu0 %vm79_vm1, %v32_v28  ;;  %197 = vmatmul.msk.bf16.gmra.mxu1 %vm79_vm1, %v34_v29 }
  0x2b   :  { %199 = vmatmul.msk.bf16.gmra.mxu2 %vm79_vm1, %v36_v30  ;;  %201 = vmatmul.msk.bf16.gmra.mxu3 %vm79_vm1, %v38_v31 }
  0x97   :  { %v117_v33 = vpop.f32.mrf.mxu0  ;;  %v127_v34 = vpop.f32.mrf.mxu1 }
  0x98   :  { %v118_v35 = vadd.f32 %v221_v32, %v117_v33  ;;  %v128_v36 = vadd.f32 %v221_v32, %v127_v34 }
  0x9a   :  { %158 = vst.msk [vmem:[%s383_s3] sm:$0xff] %vm157_vm2, %v118_v35 }
  0x9b   :  { %162 = vst.msk [vmem:[%s383_s3 + $0x20] sm:$0xff] %vm157_vm2, %v128_v36 }
  0x9e   :  { %v137_v37 = vpop.f32.mrf.mxu2  ;;  %v147_v38 = vpop.f32.mrf.mxu3 }
  0x9f   :  { %v138_v39 = vadd.f32 %v221_v32, %v137_v37  ;;  %v148_v40 = vadd.f32 %v221_v32, %v147_v38  ;;  %v119_v41 = vpop.f32.mrf.mxu0  ;;  %v129_v42 = vpop.f32.mrf.mxu1 }
  0xa0   :  { %v120_v43 = vadd.f32 %v221_v32, %v119_v41  ;;  %v130_v44 = vadd.f32 %v221_v32, %v129_v42 }
  0xa1   :  { %166 = vst.msk [vmem:[%s383_s3 + $0x40] sm:$0xff] %vm157_vm2, %v138_v39 }
  0xa2   :  { %170 = vst.msk [vmem:[%s383_s3 + $0x60] sm:$0xff] %vm157_vm2, %v148_v40 }
  0xa3   :  { %159 = vst.msk [vmem:[%s383_s3 + $0x8] sm:$0xff] %vm157_vm2, %v120_v43 }
  0xa4   :  { %163 = vst.msk [vmem:[%s383_s3 + $0x28] sm:$0xff] %vm157_vm2, %v130_v44 }
  0xa6   :  { %v139_v45 = vpop.f32.mrf.mxu2  ;;  %v149_v46 = vpop.f32.mrf.mxu3 }
  0xa7   :  { %v140_v47 = vadd.f32 %v221_v32, %v139_v45  ;;  %v150_v48 = vadd.f32 %v221_v32, %v149_v46  ;;  %v122_v49 = vpop.f32.mrf.mxu0  ;;  %v132_v50 = vpop.f32.mrf.mxu1 }
  0xa8   :  { %v123_v51 = vadd.f32 %v221_v32, %v122_v49  ;;  %v133_v52 = vadd.f32 %v221_v32, %v132_v50 }
  0xa9   :  { %167 = vst.msk [vmem:[%s383_s3 + $0x48] sm:$0xff] %vm157_vm2, %v140_v47 }
  0xaa   :  { %171 = vst.msk [vmem:[%s383_s3 + $0x68] sm:$0xff] %vm157_vm2, %v150_v48 }
  0xab   :  { %160 = vst.msk [vmem:[%s383_s3 + $0x10] sm:$0xff] %vm157_vm2, %v123_v51 }
  0xac   :  { %164 = vst.msk [vmem:[%s383_s3 + $0x30] sm:$0xff] %vm157_vm2, %v133_v52 }
  0xae   :  { %v142_v53 = vpop.f32.mrf.mxu2  ;;  %v152_v54 = vpop.f32.mrf.mxu3 }
  0xaf   :  { %v143_v55 = vadd.f32 %v221_v32, %v142_v53  ;;  %v153_v56 = vadd.f32 %v221_v32, %v152_v54  ;;  %v124_v57 = vpop.f32.mrf.mxu0  ;;  %v134_v58 = vpop.f32.mrf.mxu1 }
  0xb0   :  { %v125_v59 = vadd.f32 %v221_v32, %v124_v57  ;;  %v135_v60 = vadd.f32 %v221_v32, %v134_v58 }
  0xb1   :  { %168 = vst.msk [vmem:[%s383_s3 + $0x50] sm:$0xff] %vm157_vm2, %v143_v55 }
  0xb2   :  { %172 = vst.msk [vmem:[%s383_s3 + $0x70] sm:$0xff] %vm157_vm2, %v153_v56 }
  0xb3   :  { %161 = vst.msk [vmem:[%s383_s3 + $0x18] sm:$0xff] %vm157_vm2, %v125_v59 }
  0xb4   :  { %165 = vst.msk [vmem:[%s383_s3 + $0x38] sm:$0xff] %vm157_vm2, %v135_v60 }
  0xb6   :  { %v144_v61 = vpop.f32.mrf.mxu2  ;;  %v154_v62 = vpop.f32.mrf.mxu3 }
  0xb7   :  { %v145_v63 = vadd.f32 %v221_v32, %v144_v61  ;;  %v155_v0 = vadd.f32 %v221_v32, %v154_v62 }
  0xb9   :  { %169 = vst.msk [vmem:[%s383_s3 + $0x58] sm:$0xff] %vm157_vm2, %v145_v63 }
  0xba   :  { %173 = vst.msk [vmem:[%s383_s3 + $0x78] sm:$0xff] %vm157_vm2, %v155_v0 }

// kernel: cell_stem0_forward.35
= control target key start
LH: loop header
LB: loop body
LE: loop exit
PB: predicated region body
PF: predicated region fallthrough
CT: control target
= control target key end

     0   :  { %s108_s14 = smov 112   ;;  %s109_s15 = smov 120   ;;  %vm38_vm0 = vcmask 1046528   ;;  %vm65_vm1 = vcmask 1045504   ;;  %vm99_vm2 = vcmask 523264   ;;  %s163_s0 = inlined_call_operand.vmem [shape: f32[2,10,80], index: 0, kind: input, shape index: {}]   ;;  %s164_s1 = inlined_call_operand.vmem [shape: f32[1,8,64], index: 1, kind: input, shape index: {}]   ;;  %s165_s2 = inlined_call_operand.vmem [shape: f32[2,8,64], index: 2, kind: input, shape index: {}]   ;;  %s166_s3 = inlined_call_operand.vmem [shape: f32[2,8,64], index: 3, kind: output, shape index: {}]  }
   0x1   :  { %v14_v0 = vld [vmem:[%s163_s0] sm:$0xff]  ;;  %v15_v1 = vld [vmem:[%s163_s0 + $0x8] sm:$0x3]  ;;  %v17_v5 = vld [vmem:[%s163_s0 + $0x18] sm:$0x3] }
   0x2   :  { %28 = vrot.lane.b32.xlu1 %v14_v0, %s108_s14  ;;  %20 = vrot.lane.b32.xlu0 %v14_v0, %s109_s15  ;;  %v39_v2 = vrot.slane %v14_v0, 1  ;;  %v40_v3 = vrot.slane %v15_v1, 1  ;;  %v16_v6 = vld [vmem:[%s163_s0 + $0x10] sm:$0xff]  ;;  %v43_v8 = vrot.slane %v17_v5, 1  ;;  %v66_v10 = vrot.slane %v14_v0, 2  ;;  %v92_v39 = vld [vmem:[%s164_s1] sm:$0xff] }
   0x3   :  { %v42_v7 = vrot.slane %v16_v6, 1  ;;  %v67_v11 = vrot.slane %v15_v1, 2  ;;  %v69_v12 = vrot.slane %v16_v6, 2  ;;  %v70_v13 = vrot.slane %v17_v5, 2  ;;  %v95_v44 = vld [vmem:[%s165_s2] sm:$0xff]  ;;  %v96_v47 = vld [vmem:[%s165_s2 + $0x8] sm:$0xff] }
   0x4   :  { %v41_v4 = vsel %vm38_vm0, %v39_v2, %v40_v3 }
   0x5   :  { %49 = vrot.lane.b32.xlu2 %v41_v4, %s109_s15  ;;  %v44_v9 = vsel %vm38_vm0, %v42_v7, %v43_v8  ;;  %v68_v14 = vsel %vm65_vm1, %v66_v10, %v67_v11  ;;  %v71_v15 = vsel %vm65_vm1, %v69_v12, %v70_v13 }
   0xa   :  { %30 = vrot.lane.b32.xlu1 %v16_v6, %s108_s14  ;;  %22 = vrot.lane.b32.xlu0 %v16_v6, %s109_s15 }
   0xd   :  { %51 = vrot.lane.b32.xlu2 %v44_v9, %s109_s15 }
  0x12   :  { %59 = vrot.lane.b32.xlu1 %v44_v9, %s108_s14  ;;  %57 = vrot.lane.b32.xlu0 %v41_v4, %s108_s14 }
  0x15   :  { %76 = vrot.lane.b32.xlu2 %v68_v14, %s109_s15 }
  0x1a   :  { %84 = vrot.lane.b32.xlu1 %v68_v14, %s108_s14  ;;  %78 = vrot.lane.b32.xlu0 %v71_v15, %s109_s15 }
  0x1d   :  { %86 = vrot.lane.b32.xlu2 %v71_v15, %s108_s14 }
  0x5f   :  { %v50_v16 = vpop.permute.xlu2 %49 }
  0x67   :  { %v52_v20 = vpop.permute.xlu2 %51 }
  0x6f   :  { %v77_v28 = vpop.permute.xlu2 %76 }
  0x74   :  { %v29_v17 = vpop.permute.xlu1 %28  ;;  %v21_v18 = vpop.permute.xlu0 %20 }
  0x75   :  { %v26_v19 = vadd.f32 %v21_v18, %v14_v0 }
  0x77   :  { %v34_v21 = vadd.f32 %v29_v17, %v26_v19  ;;  %v87_v38 = vpop.permute.xlu2 %86 }
  0x79   :  { %v47_v25 = vadd.f32 %v41_v4, %v34_v21 }
  0x7b   :  { %v55_v29 = vadd.f32 %v50_v16, %v47_v25 }
  0x7c   :  { %v31_v22 = vpop.permute.xlu1 %30  ;;  %v23_v23 = vpop.permute.xlu0 %22 }
  0x7d   :  { %v27_v24 = vadd.f32 %v23_v23, %v16_v6 }
  0x7f   :  { %v35_v26 = vadd.f32 %v31_v22, %v27_v24 }
  0x81   :  { %v48_v27 = vadd.f32 %v44_v9, %v35_v26 }
  0x83   :  { %v56_v30 = vadd.f32 %v52_v20, %v48_v27 }
  0x84   :  { %v60_v31 = vpop.permute.xlu1 %59  ;;  %v58_v32 = vpop.permute.xlu0 %57 }
  0x85   :  { %v63_v33 = vadd.f32 %v58_v32, %v55_v29  ;;  %v64_v34 = vadd.f32 %v60_v31, %v56_v30 }
  0x87   :  { %v74_v35 = vadd.f32 %v68_v14, %v63_v33  ;;  %v75_v37 = vadd.f32 %v71_v15, %v64_v34 }
  0x89   :  { %v82_v36 = vadd.f32 %v77_v28, %v74_v35 }
  0x8c   :  { %v85_v40 = vpop.permute.xlu1 %84  ;;  %v79_v41 = vpop.permute.xlu0 %78 }
  0x8d   :  { %v90_v42 = vadd.f32 %v85_v40, %v82_v36  ;;  %v83_v43 = vadd.f32 %v79_v41, %v75_v37 }
  0x8f   :  { %v93_v45 = vmul.f32 %v92_v39, %v90_v42  ;;  %v91_v46 = vadd.f32 %v87_v38, %v83_v43 }
  0x91   :  { %v97_v48 = vadd.f32 %v95_v44, %v93_v45  ;;  %v94_v49 = vmul.f32 %v92_v39, %v91_v46 }
  0x93   :  { %100 = vst.msk [vmem:[%s166_s3] sm:$0xff] %vm99_vm2, %v97_v48  ;;  %v98_v50 = vadd.f32 %v96_v47, %v94_v49 }
  0x95   :  { %101 = vst.msk [vmem:[%s166_s3 + $0x8] sm:$0xff] %vm99_vm2, %v98_v50 }

// kernel: cell_stem0_forward.31
= control target key start
LH: loop header
LB: loop body
LE: loop exit
PB: predicated region body
PF: predicated region fallthrough
CT: control target
= control target key end

     0   :  { %vm120_vm0 = vcmask 1041408   ;;  %vm95_vm1 = vcmask 818176   ;;  %vm173_vm2 = vcmask 31744   ;;  %s418_s1 = inlined_call_operand.vmem [shape: bf16[100,4], index: 1, kind: input, shape index: {}]   ;;  %s419_s2 = inlined_call_operand.vmem [shape: f32[1,4], index: 2, kind: input, shape index: {}]   ;;  %s420_s0 = inlined_call_operand.vmem [shape: f32[128,100], index: 0, kind: input, shape index: {}]   ;;  %s421_s3 = inlined_call_operand.vmem [shape: f32[128,4], index: 3, kind: output, shape index: {}]  }
   0x1   :  { %v51_v0 = vld [vmem:[%s418_s1 + $0x30] sm:$0x3]  ;;  %v231_v4 = vld [vmem:[%s418_s1 + $0x28] sm:$0xff]  ;;  %v230_v5 = vld [vmem:[%s418_s1 + $0x20] sm:$0xff] }
   0x2   :  { %v81_v1 = vunpack.c.l.b16 %v51_v0  ;;  %v229_v6 = vld [vmem:[%s418_s1 + $0x18] sm:$0xff]  ;;  %v228_v7 = vld [vmem:[%s418_s1 + $0x10] sm:$0xff]  ;;  %v227_v8 = vld [vmem:[%s418_s1 + $0x8] sm:$0xff] }
   0x3   :  { %v226_v9 = vld [vmem:[%s418_s1] sm:$0xff]  ;;  %v16_v11 = vld [vmem:[%s420_s0 + $0x8] sm:$0xff]  ;;  %v17_v22 = vld [vmem:[%s420_s0 + $0x10] sm:$0xff] }
   0x4   :  { %v88_v2 = vpack.c.b16 %v81_v1, %v81_v1  ;;  %v15_v10 = vld [vmem:[%s420_s0] sm:$0xff]  ;;  %v20_v13 = vld [vmem:[%s420_s0 + $0x28] sm:$0xff]  ;;  %v18_v23 = vld [vmem:[%s420_s0 + $0x18] sm:$0xff] }
   0x5   :  { %v19_v12 = vld [vmem:[%s420_s0 + $0x20] sm:$0xff]  ;;  %v24_v15 = vld [vmem:[%s420_s0 + $0x48] sm:$0xff]  ;;  %v31_v18 = vpack.c.bf16 %v16_v11, %v15_v10  ;;  %v21_v24 = vld [vmem:[%s420_s0 + $0x30] sm:$0xff]  ;;  %v32_v30 = vpack.c.bf16 %v18_v23, %v17_v22 }
   0x6   :  { %v122_v3 = vsel %vm120_vm0, %v88_v2, 0  ;;  %v23_v14 = vld [vmem:[%s420_s0 + $0x40] sm:$0xff]  ;;  %v28_v17 = vld [vmem:[%s420_s0 + $0x68] sm:$0xff]  ;;  %v33_v19 = vpack.c.bf16 %v20_v13, %v19_v12  ;;  %v22_v25 = vld [vmem:[%s420_s0 + $0x38] sm:$0xff] }
   0x7   :  { %125 = vmatpush.bf16.msra.mxu0 %v122_v3  ;;  %232 = vmatpush.bf16.msra.mxu1 %v122_v3  ;;  %v27_v16 = vld [vmem:[%s420_s0 + $0x60] sm:$0xff]  ;;  %v35_v20 = vpack.c.bf16 %v24_v15, %v23_v14  ;;  %v25_v26 = vld [vmem:[%s420_s0 + $0x50] sm:$0xff]  ;;  %v26_v27 = vld [vmem:[%s420_s0 + $0x58] sm:$0xff]  ;;  %v34_v31 = vpack.c.bf16 %v22_v25, %v21_v24 }
   0x8   :  { %233 = vmatpush.bf16.msra.mxu2 %v122_v3  ;;  %234 = vmatpush.bf16.msra.mxu3 %v122_v3  ;;  %v37_v21 = vpack.c.bf16 %v28_v17, %v27_v16  ;;  %v29_v28 = vld [vmem:[%s420_s0 + $0x70] sm:$0xff]  ;;  %v30_v29 = vld [vmem:[%s420_s0 + $0x78] sm:$0xff]  ;;  %v36_v32 = vpack.c.bf16 %v26_v27, %v25_v26  ;;  %v253_v34 = vld [vmem:[%s419_s2] ss:$0 sm:$0xff] }
   0x9   :  { %v38_v33 = vpack.c.bf16 %v30_v29, %v29_v28 }
   0xb   :  { %126 = vmatpush.bf16.msra.mxu0 %v231_v4  ;;  %235 = vmatpush.bf16.msra.mxu1 %v231_v4 }
   0xc   :  { %236 = vmatpush.bf16.msra.mxu2 %v231_v4  ;;  %237 = vmatpush.bf16.msra.mxu3 %v231_v4 }
   0xf   :  { %127 = vmatpush.bf16.msra.mxu0 %v230_v5  ;;  %238 = vmatpush.bf16.msra.mxu1 %v230_v5 }
  0x10   :  { %239 = vmatpush.bf16.msra.mxu2 %v230_v5  ;;  %240 = vmatpush.bf16.msra.mxu3 %v230_v5 }
  0x13   :  { %128 = vmatpush.bf16.msra.mxu0 %v229_v6  ;;  %241 = vmatpush.bf16.msra.mxu1 %v229_v6 }
  0x14   :  { %242 = vmatpush.bf16.msra.mxu2 %v229_v6  ;;  %243 = vmatpush.bf16.msra.mxu3 %v229_v6 }
  0x17   :  { %129 = vmatpush.bf16.msra.mxu0 %v228_v7  ;;  %244 = vmatpush.bf16.msra.mxu1 %v228_v7 }
  0x18   :  { %245 = vmatpush.bf16.msra.mxu2 %v228_v7  ;;  %246 = vmatpush.bf16.msra.mxu3 %v228_v7 }
  0x1b   :  { %130 = vmatpush.bf16.msra.mxu0 %v227_v8  ;;  %247 = vmatpush.bf16.msra.mxu1 %v227_v8 }
  0x1c   :  { %248 = vmatpush.bf16.msra.mxu2 %v227_v8  ;;  %249 = vmatpush.bf16.msra.mxu3 %v227_v8 }
  0x1f   :  { %131 = vmatpush.bf16.msra.mxu0 %v226_v9  ;;  %250 = vmatpush.bf16.msra.mxu1 %v226_v9 }
  0x20   :  { %251 = vmatpush.bf16.msra.mxu2 %v226_v9  ;;  %252 = vmatpush.bf16.msra.mxu3 %v226_v9 }
  0x22   :  { %218 = vmatmul.msk.bf16.vlgmr.msra.gmra.mxu0 %vm95_vm1, %v31_v18  ;;  %220 = vmatmul.msk.bf16.vlgmr.msra.gmra.mxu1 %vm95_vm1, %v33_v19 }
  0x23   :  { %222 = vmatmul.msk.bf16.vlgmr.msra.gmra.mxu2 %vm95_vm1, %v35_v20  ;;  %224 = vmatmul.msk.bf16.vlgmr.msra.gmra.mxu3 %vm95_vm1, %v37_v21 }
  0x32   :  { %219 = vmatmul.msk.bf16.gmra.mxu0 %vm95_vm1, %v32_v30  ;;  %221 = vmatmul.msk.bf16.gmra.mxu1 %vm95_vm1, %v34_v31 }
  0x33   :  { %223 = vmatmul.msk.bf16.gmra.mxu2 %vm95_vm1, %v36_v32  ;;  %225 = vmatmul.msk.bf16.gmra.mxu3 %vm95_vm1, %v38_v33 }
  0x9f   :  { %v133_v35 = vpop.f32.mrf.mxu0  ;;  %v143_v36 = vpop.f32.mrf.mxu1 }
  0xa0   :  { %v134_v37 = vadd.f32 %v253_v34, %v133_v35  ;;  %v144_v38 = vadd.f32 %v253_v34, %v143_v36 }
  0xa2   :  { %174 = vst.msk [vmem:[%s421_s3] sm:$0xff] %vm173_vm2, %v134_v37 }
  0xa3   :  { %178 = vst.msk [vmem:[%s421_s3 + $0x20] sm:$0xff] %vm173_vm2, %v144_v38 }
  0xa6   :  { %v153_v39 = vpop.f32.mrf.mxu2  ;;  %v163_v40 = vpop.f32.mrf.mxu3 }
  0xa7   :  { %v154_v41 = vadd.f32 %v253_v34, %v153_v39  ;;  %v164_v42 = vadd.f32 %v253_v34, %v163_v40  ;;  %v135_v43 = vpop.f32.mrf.mxu0  ;;  %v145_v44 = vpop.f32.mrf.mxu1 }
  0xa8   :  { %v136_v45 = vadd.f32 %v253_v34, %v135_v43  ;;  %v146_v46 = vadd.f32 %v253_v34, %v145_v44 }
  0xa9   :  { %182 = vst.msk [vmem:[%s421_s3 + $0x40] sm:$0xff] %vm173_vm2, %v154_v41 }
  0xaa   :  { %186 = vst.msk [vmem:[%s421_s3 + $0x60] sm:$0xff] %vm173_vm2, %v164_v42 }
  0xab   :  { %175 = vst.msk [vmem:[%s421_s3 + $0x8] sm:$0xff] %vm173_vm2, %v136_v45 }
  0xac   :  { %179 = vst.msk [vmem:[%s421_s3 + $0x28] sm:$0xff] %vm173_vm2, %v146_v46 }
  0xae   :  { %v155_v47 = vpop.f32.mrf.mxu2  ;;  %v165_v48 = vpop.f32.mrf.mxu3 }
  0xaf   :  { %v156_v49 = vadd.f32 %v253_v34, %v155_v47  ;;  %v166_v50 = vadd.f32 %v253_v34, %v165_v48  ;;  %v138_v51 = vpop.f32.mrf.mxu0  ;;  %v148_v52 = vpop.f32.mrf.mxu1 }
  0xb0   :  { %v139_v53 = vadd.f32 %v253_v34, %v138_v51  ;;  %v149_v54 = vadd.f32 %v253_v34, %v148_v52 }
  0xb1   :  { %183 = vst.msk [vmem:[%s421_s3 + $0x48] sm:$0xff] %vm173_vm2, %v156_v49 }
  0xb2   :  { %187 = vst.msk [vmem:[%s421_s3 + $0x68] sm:$0xff] %vm173_vm2, %v166_v50 }
  0xb3   :  { %176 = vst.msk [vmem:[%s421_s3 + $0x10] sm:$0xff] %vm173_vm2, %v139_v53 }
  0xb4   :  { %180 = vst.msk [vmem:[%s421_s3 + $0x30] sm:$0xff] %vm173_vm2, %v149_v54 }
  0xb6   :  { %v158_v55 = vpop.f32.mrf.mxu2  ;;  %v168_v56 = vpop.f32.mrf.mxu3 }
  0xb7   :  { %v159_v57 = vadd.f32 %v253_v34, %v158_v55  ;;  %v169_v58 = vadd.f32 %v253_v34, %v168_v56  ;;  %v140_v59 = vpop.f32.mrf.mxu0  ;;  %v150_v60 = vpop.f32.mrf.mxu1 }
  0xb8   :  { %v141_v61 = vadd.f32 %v253_v34, %v140_v59  ;;  %v151_v62 = vadd.f32 %v253_v34, %v150_v60 }
  0xb9   :  { %184 = vst.msk [vmem:[%s421_s3 + $0x50] sm:$0xff] %vm173_vm2, %v159_v57 }
  0xba   :  { %188 = vst.msk [vmem:[%s421_s3 + $0x70] sm:$0xff] %vm173_vm2, %v169_v58 }
  0xbb   :  { %177 = vst.msk [vmem:[%s421_s3 + $0x18] sm:$0xff] %vm173_vm2, %v141_v61 }
  0xbc   :  { %181 = vst.msk [vmem:[%s421_s3 + $0x38] sm:$0xff] %vm173_vm2, %v151_v62 }
  0xbe   :  { %v160_v63 = vpop.f32.mrf.mxu2  ;;  %v170_v0 = vpop.f32.mrf.mxu3 }
  0xbf   :  { %v161_v1 = vadd.f32 %v253_v34, %v160_v63  ;;  %v171_v2 = vadd.f32 %v253_v34, %v170_v0 }
  0xc1   :  { %185 = vst.msk [vmem:[%s421_s3 + $0x58] sm:$0xff] %vm173_vm2, %v161_v1 }
  0xc2   :  { %189 = vst.msk [vmem:[%s421_s3 + $0x78] sm:$0xff] %vm173_vm2, %v171_v2 }

// kernel: cell_stem0_forward.32
= control target key start
LH: loop header
LB: loop body
LE: loop exit
PB: predicated region body
PF: predicated region fallthrough
CT: control target
= control target key end

     0   :  { %vm69_vm0 = vcmask 1041408   ;;  %vm44_vm1 = vcmask 31744   ;;  %vm138_vm2 = vcmask 64512   ;;  %s317_s1 = inlined_call_operand.vmem [shape: bf16[4,8], index: 1, kind: input, shape index: {}]   ;;  %s318_s0 = inlined_call_operand.vmem [shape: f32[128,4], index: 0, kind: input, shape index: {}]   ;;  %s319_s2 = inlined_call_operand.vmem [shape: f32[1,8], index: 2, kind: input, shape index: {}]   ;;  %s320_s3 = inlined_call_operand.vmem [shape: f32[128,8], index: 3, kind: output, shape index: {}]  }
   0x1   :  { %v39_v0 = vld [vmem:[%s317_s1] sm:$0x3]  ;;  %v16_v2 = vld [vmem:[%s318_s0 + $0x8] sm:$0xff]  ;;  %v17_v14 = vld [vmem:[%s318_s0 + $0x10] sm:$0xff] }
   0x2   :  { %v15_v1 = vld [vmem:[%s318_s0] sm:$0xff]  ;;  %v71_v3 = vsel %vm69_vm0, %v39_v0, 0  ;;  %v20_v6 = vld [vmem:[%s318_s0 + $0x28] sm:$0xff]  ;;  %v18_v15 = vld [vmem:[%s318_s0 + $0x18] sm:$0xff] }
   0x3   :  { %v31_v4 = vpack.c.bf16 %v16_v2, %v15_v1  ;;  %v19_v5 = vld [vmem:[%s318_s0 + $0x20] sm:$0xff]  ;;  %80 = vmatpush.bf16.msra.mxu0 %v71_v3  ;;  %167 = vmatpush.bf16.msra.mxu1 %v71_v3  ;;  %v24_v9 = vld [vmem:[%s318_s0 + $0x48] sm:$0xff]  ;;  %v21_v16 = vld [vmem:[%s318_s0 + $0x30] sm:$0xff]  ;;  %v32_v22 = vpack.c.bf16 %v18_v15, %v17_v14 }
   0x4   :  { %v23_v7 = vld [vmem:[%s318_s0 + $0x40] sm:$0xff]  ;;  %v33_v8 = vpack.c.bf16 %v20_v6, %v19_v5  ;;  %v28_v11 = vld [vmem:[%s318_s0 + $0x68] sm:$0xff]  ;;  %168 = vmatpush.bf16.msra.mxu2 %v71_v3  ;;  %169 = vmatpush.bf16.msra.mxu3 %v71_v3  ;;  %v22_v17 = vld [vmem:[%s318_s0 + $0x38] sm:$0xff] }
   0x5   :  { %v27_v10 = vld [vmem:[%s318_s0 + $0x60] sm:$0xff]  ;;  %v35_v12 = vpack.c.bf16 %v24_v9, %v23_v7  ;;  %v25_v18 = vld [vmem:[%s318_s0 + $0x50] sm:$0xff]  ;;  %v26_v19 = vld [vmem:[%s318_s0 + $0x58] sm:$0xff]  ;;  %v34_v23 = vpack.c.bf16 %v22_v17, %v21_v16 }
   0x6   :  { %v37_v13 = vpack.c.bf16 %v28_v11, %v27_v10  ;;  %159 = vmatmul.msk.bf16.vlgmr.msra.gmra.mxu0 %vm44_vm1, %v31_v4  ;;  %161 = vmatmul.msk.bf16.vlgmr.msra.gmra.mxu1 %vm44_vm1, %v33_v8  ;;  %v29_v20 = vld [vmem:[%s318_s0 + $0x70] sm:$0xff]  ;;  %v30_v21 = vld [vmem:[%s318_s0 + $0x78] sm:$0xff]  ;;  %v36_v24 = vpack.c.bf16 %v26_v19, %v25_v18  ;;  %v170_v26 = vld [vmem:[%s319_s2] ss:$0 sm:$0xff] }
   0x7   :  { %163 = vmatmul.msk.bf16.vlgmr.msra.gmra.mxu2 %vm44_vm1, %v35_v12  ;;  %v38_v25 = vpack.c.bf16 %v30_v21, %v29_v20 }
   0x8   :  { %165 = vmatmul.msk.bf16.vlgmr.msra.gmra.mxu3 %vm44_vm1, %v37_v13 }
  0x16   :  { %160 = vmatmul.msk.bf16.gmra.mxu0 %vm44_vm1, %v32_v22  ;;  %162 = vmatmul.msk.bf16.gmra.mxu1 %vm44_vm1, %v34_v23 }
  0x17   :  { %164 = vmatmul.msk.bf16.gmra.mxu2 %vm44_vm1, %v36_v24 }
  0x18   :  { %166 = vmatmul.msk.bf16.gmra.mxu3 %vm44_vm1, %v38_v25 }
  0x83   :  { %v82_v27 = vpop.f32.mrf.mxu0  ;;  %v92_v28 = vpop.f32.mrf.mxu1 }
  0x84   :  { %v83_v29 = vadd.f32 %v170_v26, %v82_v27  ;;  %v93_v30 = vadd.f32 %v170_v26, %v92_v28 }
  0x86   :  { %v122_v31 = vmax.f32 %v83_v29, 0.0  ;;  %v126_v32 = vmax.f32 %v93_v30, 0.0 }
  0x88   :  { %139 = vst.msk [vmem:[%s320_s3] sm:$0xff] %vm138_vm2, %v122_v31 }
  0x89   :  { %143 = vst.msk [vmem:[%s320_s3 + $0x20] sm:$0xff] %vm138_vm2, %v126_v32 }
  0x8a   :  { %v102_v33 = vpop.f32.mrf.mxu2 }
  0x8b   :  { %v112_v34 = vpop.f32.mrf.mxu3  ;;  %v103_v35 = vadd.f32 %v170_v26, %v102_v33  ;;  %v84_v37 = vpop.f32.mrf.mxu0 }
  0x8c   :  { %v113_v36 = vadd.f32 %v170_v26, %v112_v34  ;;  %v94_v38 = vpop.f32.mrf.mxu1  ;;  %v85_v39 = vadd.f32 %v170_v26, %v84_v37 }
  0x8d   :  { %v95_v40 = vadd.f32 %v170_v26, %v94_v38  ;;  %v130_v41 = vmax.f32 %v103_v35, 0.0 }
  0x8e   :  { %v134_v42 = vmax.f32 %v113_v36, 0.0  ;;  %v123_v43 = vmax.f32 %v85_v39, 0.0 }
  0x8f   :  { %v127_v44 = vmax.f32 %v95_v40, 0.0  ;;  %147 = vst.msk [vmem:[%s320_s3 + $0x40] sm:$0xff] %vm138_vm2, %v130_v41 }
  0x90   :  { %151 = vst.msk [vmem:[%s320_s3 + $0x60] sm:$0xff] %vm138_vm2, %v134_v42 }
  0x91   :  { %140 = vst.msk [vmem:[%s320_s3 + $0x8] sm:$0xff] %vm138_vm2, %v123_v43 }
  0x92   :  { %144 = vst.msk [vmem:[%s320_s3 + $0x28] sm:$0xff] %vm138_vm2, %v127_v44  ;;  %v104_v45 = vpop.f32.mrf.mxu2 }
  0x93   :  { %v114_v46 = vpop.f32.mrf.mxu3  ;;  %v105_v47 = vadd.f32 %v170_v26, %v104_v45  ;;  %v87_v49 = vpop.f32.mrf.mxu0 }
  0x94   :  { %v115_v48 = vadd.f32 %v170_v26, %v114_v46  ;;  %v97_v50 = vpop.f32.mrf.mxu1  ;;  %v88_v51 = vadd.f32 %v170_v26, %v87_v49 }
  0x95   :  { %v98_v52 = vadd.f32 %v170_v26, %v97_v50  ;;  %v131_v53 = vmax.f32 %v105_v47, 0.0 }
  0x96   :  { %v135_v54 = vmax.f32 %v115_v48, 0.0  ;;  %v124_v55 = vmax.f32 %v88_v51, 0.0 }
  0x97   :  { %v128_v56 = vmax.f32 %v98_v52, 0.0  ;;  %148 = vst.msk [vmem:[%s320_s3 + $0x48] sm:$0xff] %vm138_vm2, %v131_v53 }
  0x98   :  { %152 = vst.msk [vmem:[%s320_s3 + $0x68] sm:$0xff] %vm138_vm2, %v135_v54 }
  0x99   :  { %141 = vst.msk [vmem:[%s320_s3 + $0x10] sm:$0xff] %vm138_vm2, %v124_v55 }
  0x9a   :  { %145 = vst.msk [vmem:[%s320_s3 + $0x30] sm:$0xff] %vm138_vm2, %v128_v56  ;;  %v107_v57 = vpop.f32.mrf.mxu2 }
  0x9b   :  { %v117_v58 = vpop.f32.mrf.mxu3  ;;  %v108_v59 = vadd.f32 %v170_v26, %v107_v57  ;;  %v89_v61 = vpop.f32.mrf.mxu0 }
  0x9c   :  { %v118_v60 = vadd.f32 %v170_v26, %v117_v58  ;;  %v99_v62 = vpop.f32.mrf.mxu1  ;;  %v90_v63 = vadd.f32 %v170_v26, %v89_v61 }
  0x9d   :  { %v100_v0 = vadd.f32 %v170_v26, %v99_v62  ;;  %v132_v1 = vmax.f32 %v108_v59, 0.0 }
  0x9e   :  { %v136_v2 = vmax.f32 %v118_v60, 0.0  ;;  %v125_v3 = vmax.f32 %v90_v63, 0.0 }
  0x9f   :  { %v129_v4 = vmax.f32 %v100_v0, 0.0  ;;  %149 = vst.msk [vmem:[%s320_s3 + $0x50] sm:$0xff] %vm138_vm2, %v132_v1 }
  0xa0   :  { %153 = vst.msk [vmem:[%s320_s3 + $0x70] sm:$0xff] %vm138_vm2, %v136_v2 }
  0xa1   :  { %142 = vst.msk [vmem:[%s320_s3 + $0x18] sm:$0xff] %vm138_vm2, %v125_v3 }
  0xa2   :  { %146 = vst.msk [vmem:[%s320_s3 + $0x38] sm:$0xff] %vm138_vm2, %v129_v4  ;;  %v109_v5 = vpop.f32.mrf.mxu2 }
  0xa3   :  { %v119_v6 = vpop.f32.mrf.mxu3  ;;  %v110_v7 = vadd.f32 %v170_v26, %v109_v5 }
  0xa4   :  { %v120_v8 = vadd.f32 %v170_v26, %v119_v6 }
  0xa5   :  { %v133_v9 = vmax.f32 %v110_v7, 0.0 }
  0xa6   :  { %v137_v10 = vmax.f32 %v120_v8, 0.0 }
  0xa7   :  { %150 = vst.msk [vmem:[%s320_s3 + $0x58] sm:$0xff] %vm138_vm2, %v133_v9 }
  0xa8   :  { %154 = vst.msk [vmem:[%s320_s3 + $0x78] sm:$0xff] %vm138_vm2, %v137_v10 }

// kernel: cell_stem0_forward.22
= control target key start
LH: loop header
LB: loop body
LE: loop exit
PB: predicated region body
PF: predicated region fallthrough
CT: control target
= control target key end

     0   :  { %s279_s13 = smov 120   ;;  %s280_s26 = smov 112   ;;  %vm91_vm0 = vcmask 1046528   ;;  %vm178_vm1 = vcmask 1045504   ;;  %vm47_vm2 = vcmask 982016   ;;  %vm76_vm3 = vcmask 916480   ;;  %s518_s0 = inlined_call_operand.vmem [shape: f32[2,18,144], index: 0, kind: input, shape index: {}]   ;;  %s519_s1 = inlined_call_operand.vmem [shape: f32[1,16,128], index: 1, kind: input, shape index: {}]   ;;  %s520_s2 = inlined_call_operand.vmem [shape: f32[2,16,128], index: 2, kind: output, shape index: {}]  }
   0x1   :  { %v299_v0 = vld [vmem:[%s518_s0 + $0x10] sm:$0xff]  ;;  %v304_v1 = vld [vmem:[%s518_s0] sm:$0xff]  ;;  %v320_v3 = vld [vmem:[%s518_s0 + $0x18] sm:$0xff] }
   0x2   :  { %35 = vrot.lane.b32.xlu1 %v299_v0, %s279_s13  ;;  %31 = vrot.lane.b32.xlu0 %v304_v1, %s279_s13  ;;  %v313_v2 = vld [vmem:[%s518_s0 + $0x30] sm:$0xff]  ;;  %v12_v4 = vld [vmem:[%s518_s0 + $0x8] sm:$0xff]  ;;  %v92_v8 = vrot.slane %v304_v1, 1  ;;  %v93_v9 = vrot.slane %v299_v0, 1  ;;  %v113_v11 = vrot.slane %v320_v3, 1  ;;  %v198_v26 = vrot.slane %v320_v3, 2 }
   0x3   :  { %39 = vrot.lane.b32.xlu2 %v313_v2, %s279_s13  ;;  %v18_v5 = vld [vmem:[%s518_s0 + $0x38] sm:$0xff]  ;;  %v335_v6 = vld [vmem:[%s518_s0 + $0x48] sm:$0xff]  ;;  %v340_v7 = vld [vmem:[%s518_s0 + $0x40] sm:$0xff]  ;;  %v112_v10 = vrot.slane %v12_v4, 1  ;;  %v97_v18 = vrot.slane %v313_v2, 1  ;;  %v197_v25 = vrot.slane %v12_v4, 2 }
   0x4   :  { %v362_v12 = vsel %vm91_vm0, %v92_v8, %v93_v9  ;;  %v15_v13 = vld [vmem:[%s518_s0 + $0x20] sm:$0x3]  ;;  %v16_v14 = vld [vmem:[%s518_s0 + $0x28] sm:$0x3]  ;;  %v98_v19 = vrot.slane %v340_v7, 1  ;;  %v117_v27 = vrot.slane %v18_v5, 1 }
   0x5   :  { %v114_v15 = vsel %vm91_vm0, %v112_v10, %v113_v11  ;;  %v95_v16 = vrot.slane %v15_v13, 1  ;;  %v115_v17 = vrot.slane %v16_v14, 1  ;;  %v21_v22 = vld [vmem:[%s518_s0 + $0x50] sm:$0x3]  ;;  %v22_v24 = vld [vmem:[%s518_s0 + $0x58] sm:$0x3]  ;;  %v199_v31 = vsel %vm178_vm1, %v197_v25, %v198_v26 }
   0x6   :  { %v386_v23 = vsel %vm91_vm0, %v97_v18, %v98_v19  ;;  %v118_v28 = vrot.slane %v335_v6, 1  ;;  %v100_v29 = vrot.slane %v21_v22, 1  ;;  %v120_v30 = vrot.slane %v22_v24, 1 }
   0x7   :  { %v379_v20 = vsel %vm91_vm0, %v93_v9, %v95_v16  ;;  %v116_v21 = vsel %vm91_vm0, %v113_v11, %v115_v17  ;;  %v202_v35 = vrot.slane %v18_v5, 2  ;;  %v203_v36 = vrot.slane %v335_v6, 2 }
   0x8   :  { %v119_v32 = vsel %vm91_vm0, %v117_v27, %v118_v28  ;;  %v401_v33 = vsel %vm91_vm0, %v98_v19, %v100_v29  ;;  %v121_v34 = vsel %vm91_vm0, %v118_v28, %v120_v30  ;;  %v179_v38 = vrot.slane %v304_v1, 2 }
   0x9   :  { %v204_v37 = vsel %vm178_vm1, %v202_v35, %v203_v36  ;;  %v180_v39 = vrot.slane %v299_v0, 2  ;;  %v182_v41 = vrot.slane %v15_v13, 2  ;;  %v200_v42 = vrot.slane %v16_v14, 2 }
   0xa   :  { %37 = vrot.lane.b32.xlu1 %v320_v3, %s279_s13  ;;  %33 = vrot.lane.b32.xlu0 %v12_v4, %s279_s13  ;;  %v184_v45 = vrot.slane %v313_v2, 2  ;;  %v185_v46 = vrot.slane %v340_v7, 2  ;;  %v187_v47 = vrot.slane %v21_v22, 2  ;;  %v205_v51 = vrot.slane %v22_v24, 2 }
   0xb   :  { %41 = vrot.lane.b32.xlu2 %v18_v5, %s279_s13  ;;  %v422_v40 = vsel %vm178_vm1, %v179_v38, %v180_v39  ;;  %v430_v43 = vsel %vm178_vm1, %v180_v39, %v182_v41  ;;  %v201_v44 = vsel %vm178_vm1, %v198_v26, %v200_v42 }
   0xc   :  { %v440_v49 = vsel %vm178_vm1, %v184_v45, %v185_v46  ;;  %v443_v50 = vsel %vm178_vm1, %v185_v46, %v187_v47  ;;  %v206_v54 = vsel %vm178_vm1, %v203_v36, %v205_v51 }
  0x12   :  { %45 = vrot.lane.b32.xlu1 %v335_v6, %s279_s13  ;;  %43 = vrot.lane.b32.xlu0 %v340_v7, %s279_s13 }
  0x13   :  { %60 = vrot.lane.b32.xlu2 %v304_v1, %s280_s26 }
  0x1a   :  { %64 = vrot.lane.b32.xlu1 %v299_v0, %s280_s26  ;;  %62 = vrot.lane.b32.xlu0 %v12_v4, %s280_s26 }
  0x1b   :  { %66 = vrot.lane.b32.xlu2 %v320_v3, %s280_s26 }
  0x22   :  { %70 = vrot.lane.b32.xlu1 %v18_v5, %s280_s26  ;;  %68 = vrot.lane.b32.xlu0 %v313_v2, %s280_s26 }
  0x23   :  { %72 = vrot.lane.b32.xlu2 %v340_v7, %s280_s26 }
  0x2a   :  { %74 = vrot.lane.b32.xlu0 %v335_v6, %s280_s26  ;;  %122 = vrot.lane.b32.xlu1 %v362_v12, %s279_s13 }
  0x2b   :  { %124 = vrot.lane.b32.xlu2 %v114_v15, %s279_s13 }
  0x32   :  { %126 = vrot.lane.b32.xlu0 %v379_v20, %s279_s13  ;;  %128 = vrot.lane.b32.xlu1 %v116_v21, %s279_s13 }
  0x33   :  { %130 = vrot.lane.b32.xlu2 %v386_v23, %s279_s13 }
  0x3a   :  { %132 = vrot.lane.b32.xlu0 %v119_v32, %s279_s13  ;;  %134 = vrot.lane.b32.xlu1 %v401_v33, %s279_s13 }
  0x3b   :  { %136 = vrot.lane.b32.xlu2 %v121_v34, %s279_s13 }
  0x42   :  { %150 = vrot.lane.b32.xlu0 %v362_v12, %s280_s26  ;;  %152 = vrot.lane.b32.xlu1 %v114_v15, %s280_s26 }
  0x43   :  { %154 = vrot.lane.b32.xlu2 %v379_v20, %s280_s26 }
  0x4a   :  { %156 = vrot.lane.b32.xlu0 %v116_v21, %s280_s26  ;;  %158 = vrot.lane.b32.xlu1 %v386_v23, %s280_s26 }
  0x4b   :  { %160 = vrot.lane.b32.xlu2 %v119_v32, %s280_s26 }
  0x52   :  { %162 = vrot.lane.b32.xlu0 %v401_v33, %s280_s26  ;;  %164 = vrot.lane.b32.xlu1 %v121_v34, %s280_s26 }
  0x53   :  { %207 = vrot.lane.b32.xlu2 %v422_v40, %s279_s13 }
  0x5a   :  { %209 = vrot.lane.b32.xlu0 %v199_v31, %s279_s13  ;;  %211 = vrot.lane.b32.xlu1 %v430_v43, %s279_s13 }
  0x5b   :  { %213 = vrot.lane.b32.xlu2 %v201_v44, %s279_s13 }
  0x5d   :  { %v40_v48 = vpop.permute.xlu2 %39 }
  0x62   :  { %215 = vrot.lane.b32.xlu0 %v440_v49, %s279_s13  ;;  %217 = vrot.lane.b32.xlu1 %v204_v37, %s279_s13 }
  0x63   :  { %219 = vrot.lane.b32.xlu2 %v443_v50, %s279_s13 }
  0x65   :  { %v42_v52 = vpop.permute.xlu2 %41 }
  0x66   :  { %v50_v53 = vsel %vm47_vm2, %v40_v48, %v42_v52 }
  0x67   :  { %v58_v18 = vadd.f32 %v50_v53, %v313_v2 }
  0x6a   :  { %221 = vrot.lane.b32.xlu0 %v206_v54, %s279_s13  ;;  %235 = vrot.lane.b32.xlu1 %v422_v40, %s280_s26 }
  0x6b   :  { %237 = vrot.lane.b32.xlu2 %v199_v31, %s280_s26 }
  0x6d   :  { %v61_v55 = vpop.permute.xlu2 %60 }
  0x72   :  { %239 = vrot.lane.b32.xlu0 %v430_v43, %s280_s26  ;;  %241 = vrot.lane.b32.xlu1 %v201_v44, %s280_s26 }
  0x73   :  { %243 = vrot.lane.b32.xlu2 %v440_v49, %s280_s26 }
  0x74   :  { %v36_v56 = vpop.permute.xlu1 %35  ;;  %v32_v57 = vpop.permute.xlu0 %31 }
  0x75   :  { %v67_v58 = vpop.permute.xlu2 %66 }
  0x7a   :  { %245 = vrot.lane.b32.xlu0 %v204_v37, %s280_s26  ;;  %247 = vrot.lane.b32.xlu1 %v443_v50, %s280_s26 }
  0x7b   :  { %249 = vrot.lane.b32.xlu2 %v206_v54, %s280_s26 }
  0x7c   :  { %v38_v59 = vpop.permute.xlu1 %37  ;;  %v34_v60 = vpop.permute.xlu0 %33 }
  0x7d   :  { %v49_v61 = vsel %vm47_vm2, %v36_v56, %v38_v59  ;;  %v48_v62 = vsel %vm47_vm2, %v32_v57, %v34_v60  ;;  %v73_v63 = vpop.permute.xlu2 %72 }
  0x7e   :  { %v57_v8 = vadd.f32 %v49_v61, %v299_v0  ;;  %v56_v9 = vadd.f32 %v48_v62, %v304_v1 }
  0x84   :  { %v46_v3 = vpop.permute.xlu1 %45  ;;  %v44_v4 = vpop.permute.xlu0 %43 }
  0x85   :  { %v51_v5 = vsel %vm47_vm2, %v44_v4, %v46_v3  ;;  %v125_v6 = vpop.permute.xlu2 %124 }
  0x86   :  { %v59_v0 = vadd.f32 %v51_v5, %v340_v7 }
  0x8c   :  { %v65_v10 = vpop.permute.xlu1 %64  ;;  %v63_v11 = vpop.permute.xlu0 %62 }
  0x8d   :  { %v78_v13 = vsel %vm76_vm3, %v65_v10, %v67_v58  ;;  %v77_v14 = vsel %vm76_vm3, %v61_v55, %v63_v11  ;;  %v131_v17 = vpop.permute.xlu2 %130 }
  0x8e   :  { %v86_v15 = vadd.f32 %v78_v13, %v57_v8  ;;  %v85_v16 = vadd.f32 %v77_v14, %v56_v9 }
  0x90   :  { %v107_v61 = vadd.f32 %v379_v20, %v86_v15 }
  0x94   :  { %v71_v19 = vpop.permute.xlu1 %70  ;;  %v69_v21 = vpop.permute.xlu0 %68 }
  0x95   :  { %v79_v22 = vsel %vm76_vm3, %v69_v21, %v71_v19  ;;  %v137_v25 = vpop.permute.xlu2 %136 }
  0x96   :  { %v87_v24 = vadd.f32 %v79_v22, %v58_v18 }
  0x98   :  { %v108_v32 = vadd.f32 %v386_v23, %v87_v24  ;;  %v106_v23 = vadd.f32 %v362_v12, %v85_v16  ;;  %v264_v24 = vld [vmem:[%s519_s1 + $0x8] sm:$0xff] }
  0x9c   :  { %v75_v1 = vpop.permute.xlu0 %74  ;;  %v123_v26 = vpop.permute.xlu1 %122 }
  0x9d   :  { %v80_v27 = vsel %vm76_vm3, %v73_v63, %v75_v1  ;;  %v155_v29 = vpop.permute.xlu2 %154  ;;  %v138_v52 = vsel %vm47_vm2, %v123_v26, %v125_v6  ;;  %v263_v6 = vld [vmem:[%s519_s1] sm:$0xff] }
  0x9e   :  { %v88_v28 = vadd.f32 %v80_v27, %v59_v0  ;;  %v146_v54 = vadd.f32 %v138_v52, %v106_v23 }
  0xa0   :  { %v109_v14 = vadd.f32 %v401_v33, %v88_v28 }
  0xa4   :  { %v127_v30 = vpop.permute.xlu0 %126  ;;  %v129_v31 = vpop.permute.xlu1 %128 }
  0xa5   :  { %v161_v36 = vpop.permute.xlu2 %160  ;;  %v139_v59 = vsel %vm47_vm2, %v127_v30, %v129_v31 }
  0xa6   :  { %v147_v3 = vadd.f32 %v139_v59, %v107_v61 }
  0xac   :  { %v133_v34 = vpop.permute.xlu0 %132  ;;  %v135_v2 = vpop.permute.xlu1 %134 }
  0xad   :  { %v140_v35 = vsel %vm47_vm2, %v131_v17, %v133_v34  ;;  %v208_v41 = vpop.permute.xlu2 %207  ;;  %v141_v20 = vsel %vm47_vm2, %v135_v2, %v137_v25 }
  0xae   :  { %v148_v37 = vadd.f32 %v140_v35, %v108_v32  ;;  %v149_v18 = vadd.f32 %v141_v20, %v109_v14 }
  0xb4   :  { %v151_v38 = vpop.permute.xlu0 %150  ;;  %v153_v39 = vpop.permute.xlu1 %152 }
  0xb5   :  { %v214_v44 = vpop.permute.xlu2 %213  ;;  %v166_v53 = vsel %vm76_vm3, %v151_v38, %v153_v39 }
  0xb6   :  { %v174_v57 = vadd.f32 %v166_v53, %v146_v54 }
  0xb8   :  { %v193_v62 = vadd.f32 %v422_v40, %v174_v57 }
  0xbc   :  { %v157_v7 = vpop.permute.xlu0 %156  ;;  %v159_v42 = vpop.permute.xlu1 %158 }
  0xbd   :  { %v220_v47 = vpop.permute.xlu2 %219  ;;  %v167_v63 = vsel %vm76_vm3, %v155_v29, %v157_v7  ;;  %v168_v16 = vsel %vm76_vm3, %v159_v42, %v161_v36 }
  0xbe   :  { %v175_v9 = vadd.f32 %v167_v63, %v147_v3  ;;  %v176_v25 = vadd.f32 %v168_v16, %v148_v37 }
  0xc0   :  { %v194_v15 = vadd.f32 %v430_v43, %v175_v9  ;;  %v195_v28 = vadd.f32 %v440_v49, %v176_v25 }
  0xc4   :  { %v163_v45 = vpop.permute.xlu0 %162  ;;  %v165_v46 = vpop.permute.xlu1 %164 }
  0xc5   :  { %v238_v58 = vpop.permute.xlu2 %237  ;;  %v169_v17 = vsel %vm76_vm3, %v163_v45, %v165_v46 }
  0xc6   :  { %v177_v43 = vadd.f32 %v169_v17, %v149_v18 }
  0xc8   :  { %v196_v29 = vadd.f32 %v443_v50, %v177_v43 }
  0xcc   :  { %v210_v48 = vpop.permute.xlu0 %209  ;;  %v212_v51 = vpop.permute.xlu1 %211 }
  0xcd   :  { %v223_v60 = vsel %vm47_vm2, %v208_v41, %v210_v48  ;;  %v244_v13 = vpop.permute.xlu2 %243  ;;  %v224_v40 = vsel %vm47_vm2, %v212_v51, %v214_v44 }
  0xce   :  { %v231_v4 = vadd.f32 %v223_v60, %v193_v62  ;;  %v232_v19 = vadd.f32 %v224_v40, %v194_v15 }
  0xd4   :  { %v216_v55 = vpop.permute.xlu0 %215  ;;  %v218_v56 = vpop.permute.xlu1 %217 }
  0xd5   :  { %v225_v26 = vsel %vm47_vm2, %v216_v55, %v218_v56  ;;  %v250_v30 = vpop.permute.xlu2 %249 }
  0xd6   :  { %v233_v31 = vadd.f32 %v225_v26, %v195_v28 }
  0xdc   :  { %v222_v12 = vpop.permute.xlu0 %221  ;;  %v236_v5 = vpop.permute.xlu1 %235 }
  0xdd   :  { %v251_v8 = vsel %vm76_vm3, %v236_v5, %v238_v58  ;;  %v226_v27 = vsel %vm47_vm2, %v220_v47, %v222_v12 }
  0xde   :  { %v259_v10 = vadd.f32 %v251_v8, %v231_v4  ;;  %v234_v32 = vadd.f32 %v226_v27, %v196_v29 }
  0xe0   :  { %v265_v11 = vmul.f32 %v263_v6, %v259_v10 }
  0xe2   :  { %269 = vst [vmem:[%s520_s2] sm:$0xff] %v265_v11 }
  0xe4   :  { %v240_v21 = vpop.permute.xlu0 %239  ;;  %v242_v22 = vpop.permute.xlu1 %241 }
  0xe5   :  { %v252_v33 = vsel %vm76_vm3, %v240_v21, %v242_v22 }
  0xe6   :  { %v260_v0 = vadd.f32 %v252_v33, %v232_v19 }
  0xe8   :  { %v266_v1 = vmul.f32 %v264_v24, %v260_v0 }
  0xea   :  { %270 = vst [vmem:[%s520_s2 + $0x8] sm:$0xff] %v266_v1 }
  0xec   :  { %v246_v34 = vpop.permute.xlu0 %245  ;;  %v248_v2 = vpop.permute.xlu1 %247 }
  0xed   :  { %v253_v35 = vsel %vm76_vm3, %v244_v13, %v246_v34  ;;  %v254_v36 = vsel %vm76_vm3, %v248_v2, %v250_v30 }
  0xee   :  { %v261_v37 = vadd.f32 %v253_v35, %v233_v31  ;;  %v262_v38 = vadd.f32 %v254_v36, %v234_v32 }
  0xf0   :  { %v267_v39 = vmul.f32 %v263_v6, %v261_v37  ;;  %v268_v41 = vmul.f32 %v264_v24, %v262_v38 }
  0xf2   :  { %271 = vst [vmem:[%s520_s2 + $0x10] sm:$0xff] %v267_v39 }
  0xf3   :  { %272 = vst [vmem:[%s520_s2 + $0x18] sm:$0xff] %v268_v41 }

</bundles_post_ra>
